<compile_context>
chip_gen: v7x
topology: tpu7x:2x2x1
jax: 0.10.0
libtpu: 0.0.40
codegen_flags: <defaults>
</compile_context>

<pallas_src>
import math

import jax
import jax.numpy as jnp
from jax.experimental import pallas as pl
from jax.experimental.pallas import tpu as pltpu


# --------------------------------------------------------------------------
# Kernel
# --------------------------------------------------------------------------
def _make_kernel(T, BB, H1, H2, H3):
    """Fused 3-layer LSTM stack + FC head for compile-time T and batch block BB."""

    def _sig(x):
        # sigmoid(x) = 0.5*(tanh(x/2)+1): exactly one EUP tanh + VPU fma.
        return jnp.tanh(x * 0.5) * 0.5 + 0.5

    def _cell(x_in, h, c, w_ih_ref, w_hh_ref, b_ref, H):
        """One LSTM cell step. Weight refs are loaded at the use site."""
        gates = (jnp.dot(x_in, w_ih_ref[...], preferred_element_type=jnp.float32)
                 + jnp.dot(h, w_hh_ref[...], preferred_element_type=jnp.float32)
                 + b_ref[...])                                   # (BB, 4H)
        i = _sig(gates[:, 0 * H:1 * H])
        f = _sig(gates[:, 1 * H:2 * H])
        g = jnp.tanh(gates[:, 2 * H:3 * H])
        o = _sig(gates[:, 3 * H:4 * H])
        c_new = f * c + i * g
        h_new = o * jnp.tanh(c_new)
        return h_new, c_new

    def kernel(x_ref,
               w_ih1_ref, w_hh1_ref, b1_ref,
               w_ih2_ref, w_hh2_ref, b2_ref,
               w_ih3_ref, w_hh3_ref, b3_ref,
               w_fc_ref, b_fc_ref,
               out_ref):
        f32 = jnp.float32
        h1 = jnp.zeros((BB, H1), f32); c1 = jnp.zeros((BB, H1), f32)
        h2 = jnp.zeros((BB, H2), f32); c2 = jnp.zeros((BB, H2), f32)
        h3 = jnp.zeros((BB, H3), f32); c3 = jnp.zeros((BB, H3), f32)

        # Wavefront over T + 2 static (fully unrolled) steps.  Deeper layers
        # are updated first so each layer reads the PREVIOUS step's output of
        # the layer below -> all three cells in a step are independent.
        for s in range(T + 2):
            if 0 <= s - 2 < T:        # layer 3 @ time s-2  (reads old h2)
                h3, c3 = _cell(h2, h3, c3, w_ih3_ref, w_hh3_ref, b3_ref, H3)
            if 0 <= s - 1 < T:        # layer 2 @ time s-1  (reads old h1)
                h2, c2 = _cell(h1, h2, c2, w_ih2_ref, w_hh2_ref, b2_ref, H2)
            if s < T:                 # layer 1 @ time s    (reads x[s])
                h1, c1 = _cell(x_ref[s], h1, c1, w_ih1_ref, w_hh1_ref, b1_ref, H1)

        # out = h3_last @ W_fc + b_fc
        out_ref[...] = (jnp.dot(h3, w_fc_ref[...],
                                preferred_element_type=jnp.float32)
                        + b_fc_ref[...]).astype(out_ref.dtype)

    return kernel


# --------------------------------------------------------------------------
# Wrapper
# --------------------------------------------------------------------------
def lstm_model_forward(x_btd, params, units):
    """x_btd: (B, T, D_in) float32, PyTorch batch_first convention."""
    B, T, D = x_btd.shape
    H1, H2, H3 = units, 128, 32

    Bp = max(8, ((B + 7) // 8) * 8)                  # sublane-aligned batch
    BB = 128 if Bp % 128 == 0 else 8                 # batch rows per grid step

    x_tbd = jnp.transpose(x_btd, (1, 0, 2))          # time-major (T, B, D)
    x_pad = jnp.pad(x_tbd, ((0, 0), (0, Bp - B), (0, 0)))   # (T, Bp, D)

    vmem_full = pl.BlockSpec(memory_space=pltpu.MemorySpace.VMEM)
    in_specs = [pl.BlockSpec((T, BB, D), lambda b: (0, b, 0))] + [vmem_full] * 11
    out_specs = pl.BlockSpec((BB, 1), lambda b: (b, 0))

    out = pl.pallas_call(
        _make_kernel(T, BB, H1, H2, H3),
        out_shape=jax.ShapeDtypeStruct((Bp, 1), jnp.float32),
        grid=(Bp // BB,),
        in_specs=in_specs,
        out_specs=out_specs,
        compiler_params=pltpu.CompilerParams(dimension_semantics=("parallel",)),
    )(x_pad,
      params["w_ih1"], params["w_hh1"], params["b1"],
      params["w_ih2"], params["w_hh2"], params["b2"],
      params["w_ih3"], params["w_hh3"], params["b3"],
      params["w_fc"], params["b_fc"])
    return out[:B]


# --------------------------------------------------------------------------
# Params: PyTorch-shaped init (pre-transposed), no hidden-dim padding needed
# --------------------------------------------------------------------------
def init_params(key, input_size, units):
    """Deterministic init matching PyTorch LSTM/Linear shapes.

    PyTorch stores weight_ih as (4H, D); we keep the transposed (D, 4H) and
    fold b_ih + b_hh into a single (1, 4H) bias. Gate order is [i | f | g | o].
    """
    dims = [(input_size, units), (units, 128), (128, 32)]
    params = {}
    for idx, (d_in, h) in enumerate(dims, start=1):
        k = 1.0 / math.sqrt(h)
        key, k1, k2, k3, k4 = jax.random.split(key, 5)
        params[f"w_ih{idx}"] = jax.random.uniform(k1, (d_in, 4 * h), jnp.float32, -k, k)
        params[f"w_hh{idx}"] = jax.random.uniform(k2, (h, 4 * h), jnp.float32, -k, k)
        b_ih = jax.random.uniform(k3, (4 * h,), jnp.float32, -k, k)
        b_hh = jax.random.uniform(k4, (4 * h,), jnp.float32, -k, k)
        params[f"b{idx}"] = (b_ih + b_hh).reshape(1, 4 * h)
    k = 1.0 / math.sqrt(32)
    key, k1, k2 = jax.random.split(key, 3)
    params["w_fc"] = jax.random.uniform(k1, (32, 1), jnp.float32, -k, k)
    params["b_fc"] = jax.random.uniform(k2, (1, 1), jnp.float32, -k, k)
    return params


# --------------------------------------------------------------------------
# Pure-JAX reference for a correctness check
# --------------------------------------------------------------------------
def _reference_forward(x_btd, p):
    def cell(x_t, h, c, w_ih, w_hh, b):
        gates = x_t @ w_ih + h @ w_hh + b
        H = h.shape[-1]
        i = jax.nn.sigmoid(gates[:, 0 * H:1 * H])
        f = jax.nn.sigmoid(gates[:, 1 * H:2 * H])
        g = jnp.tanh(gates[:, 2 * H:3 * H])
        o = jax.nn.sigmoid(gates[:, 3 * H:4 * H])
        c = f * c + i * g
        return o * jnp.tanh(c), c

    B, T, _ = x_btd.shape
    hs = [jnp.zeros((B, p[f"w_hh{i}"].shape[0]), jnp.float32) for i in (1, 2, 3)]
    cs = [jnp.zeros_like(h) for h in hs]
    for t in range(T):
        inp = x_btd[:, t, :]
        for li in range(3):
            hs[li], cs[li] = cell(inp, hs[li], cs[li],
                                  p[f"w_ih{li+1}"], p[f"w_hh{li+1}"], p[f"b{li+1}"])
            inp = hs[li]
    return hs[2] @ p["w_fc"] + p["b_fc"]


if __name__ == "__main__":
    INPUT_SIZE = 16   # inputSize
    UNITS = 32        # units (lstm1 hidden size)
    BATCH = 2
    SEQ = 8

    key = jax.random.PRNGKey(0)
    key, xk, pk = jax.random.split(key, 3)
    x = jax.random.normal(xk, (BATCH, SEQ, INPUT_SIZE), jnp.float32)

    params = init_params(pk, INPUT_SIZE, UNITS)

    out = lstm_model_forward(x, params, UNITS)
    out = jax.block_until_ready(out)
    assert out.shape == (BATCH, 1), out.shape

    ref = jax.block_until_ready(_reference_forward(x, params))
    assert jnp.allclose(out, ref, atol=1e-3, rtol=1e-3), (out, ref)

    print("KERNEL_OK")
</pallas_src>

<mosaic_0001>
module attributes {stable_mosaic.version = 11 : i64} {
  func.func @kernel(%arg0: i32, %arg1: memref<8x8x16xf32, #tpu.memory_space<vmem>>, %arg2: memref<16x128xf32, #tpu.memory_space<vmem>>, %arg3: memref<32x128xf32, #tpu.memory_space<vmem>>, %arg4: memref<1x128xf32, #tpu.memory_space<vmem>>, %arg5: memref<32x512xf32, #tpu.memory_space<vmem>>, %arg6: memref<128x512xf32, #tpu.memory_space<vmem>>, %arg7: memref<1x512xf32, #tpu.memory_space<vmem>>, %arg8: memref<128x128xf32, #tpu.memory_space<vmem>>, %arg9: memref<32x128xf32, #tpu.memory_space<vmem>>, %arg10: memref<1x128xf32, #tpu.memory_space<vmem>>, %arg11: memref<32x1xf32, #tpu.memory_space<vmem>>, %arg12: memref<1x1xf32, #tpu.memory_space<vmem>>, %arg13: memref<8x1xf32, #tpu.memory_space<vmem>>) attributes {dimension_semantics = [#tpu.dimension_semantics<parallel>], iteration_bounds = array<i64: 1>, scalar_prefetch = 0 : i64, scratch_operands = 0 : i64, tpu.core_type = #tpu.core_type<tc>, window_params = [{transform_indices = @transform_0, window_bounds = array<i64: 8, 8, 16>}, {pipeline_mode = #tpu.pipeline_mode<synchronous>, transform_indices = @transform_1, window_bounds = array<i64: 16, 128>}, {pipeline_mode = #tpu.pipeline_mode<synchronous>, transform_indices = @transform_2, window_bounds = array<i64: 32, 128>}, {pipeline_mode = #tpu.pipeline_mode<synchronous>, transform_indices = @transform_3, window_bounds = array<i64: 1, 128>}, {pipeline_mode = #tpu.pipeline_mode<synchronous>, transform_indices = @transform_4, window_bounds = array<i64: 32, 512>}, {pipeline_mode = #tpu.pipeline_mode<synchronous>, transform_indices = @transform_5, window_bounds = array<i64: 128, 512>}, {pipeline_mode = #tpu.pipeline_mode<synchronous>, transform_indices = @transform_6, window_bounds = array<i64: 1, 512>}, {pipeline_mode = #tpu.pipeline_mode<synchronous>, transform_indices = @transform_7, window_bounds = array<i64: 128, 128>}, {pipeline_mode = #tpu.pipeline_mode<synchronous>, transform_indices = @transform_8, window_bounds = array<i64: 32, 128>}, {pipeline_mode = #tpu.pipeline_mode<synchronous>, transform_indices = @transform_9, window_bounds = array<i64: 1, 128>}, {pipeline_mode = #tpu.pipeline_mode<synchronous>, transform_indices = @transform_10, window_bounds = array<i64: 32, 1>}, {pipeline_mode = #tpu.pipeline_mode<synchronous>, transform_indices = @transform_11, window_bounds = array<i64: 1, 1>}, {transform_indices = @transform_12, window_bounds = array<i64: 8, 1>}]} {
    %cst = arith.constant 0.000000e+00 : f32
    %0 = vector.broadcast %cst : f32 to vector<8x32xf32>
    %cst_0 = arith.constant 0.000000e+00 : f32
    %1 = vector.broadcast %cst_0 : f32 to vector<8x32xf32>
    %cst_1 = arith.constant 0.000000e+00 : f32
    %2 = vector.broadcast %cst_1 : f32 to vector<8x128xf32>
    %cst_2 = arith.constant 0.000000e+00 : f32
    %3 = vector.broadcast %cst_2 : f32 to vector<8x128xf32>
    %cst_3 = arith.constant 0.000000e+00 : f32
    %4 = vector.broadcast %cst_3 : f32 to vector<8x32xf32>
    %cst_4 = arith.constant 0.000000e+00 : f32
    %5 = vector.broadcast %cst_4 : f32 to vector<8x32xf32>
    %c0 = arith.constant 0 : index
    %c0_5 = arith.constant 0 : index
    %c0_6 = arith.constant 0 : index
    %6 = vector.load %arg1[%c0, %c0_5, %c0_6] : memref<8x8x16xf32, #tpu.memory_space<vmem>>, vector<1x8x16xf32>
    %7 = vector.shape_cast %6 : vector<1x8x16xf32> to vector<8x16xf32>
    %c0_7 = arith.constant 0 : index
    %c0_8 = arith.constant 0 : index
    %8 = vector.load %arg2[%c0_7, %c0_8] : memref<16x128xf32, #tpu.memory_space<vmem>>, vector<16x128xf32>
    %cst_9 = arith.constant dense<0.000000e+00> : vector<8x128xf32>
    %9 = tpu.matmul %7, %8, %cst_9 {dimension_numbers = #tpu.dot_dimension_numbers<[1], [0], [0], [1], [0, 0, 1, 1], [], []>} : vector<8x16xf32>, vector<16x128xf32>, vector<8x128xf32> -> vector<8x128xf32>
    %c0_10 = arith.constant 0 : index
    %c0_11 = arith.constant 0 : index
    %10 = vector.load %arg3[%c0_10, %c0_11] : memref<32x128xf32, #tpu.memory_space<vmem>>, vector<32x128xf32>
    %cst_12 = arith.constant dense<0.000000e+00> : vector<8x128xf32>
    %11 = tpu.matmul %0, %10, %cst_12 {dimension_numbers = #tpu.dot_dimension_numbers<[1], [0], [0], [1], [0, 0, 1, 1], [], []>} : vector<8x32xf32>, vector<32x128xf32>, vector<8x128xf32> -> vector<8x128xf32>
    %12 = arith.addf %9, %11 : vector<8x128xf32>
    %c0_13 = arith.constant 0 : index
    %c0_14 = arith.constant 0 : index
    %13 = vector.load %arg4[%c0_13, %c0_14] : memref<1x128xf32, #tpu.memory_space<vmem>>, vector<1x128xf32>
    %14 = vector.broadcast %13 : vector<1x128xf32> to vector<8x128xf32>
    %15 = arith.addf %12, %14 : vector<8x128xf32>
    %16 = vector.extract_strided_slice %15 {offsets = [0, 0], sizes = [8, 32], strides = [1, 1]} : vector<8x128xf32> to vector<8x32xf32>
    %cst_15 = arith.constant 5.000000e-01 : f32
    %17 = vector.broadcast %cst_15 : f32 to vector<8x32xf32>
    %18 = arith.mulf %16, %17 : vector<8x32xf32>
    %19 = math.tanh %18 : vector<8x32xf32>
    %cst_16 = arith.constant 5.000000e-01 : f32
    %20 = vector.broadcast %cst_16 : f32 to vector<8x32xf32>
    %21 = arith.mulf %19, %20 : vector<8x32xf32>
    %cst_17 = arith.constant 5.000000e-01 : f32
    %22 = vector.broadcast %cst_17 : f32 to vector<8x32xf32>
    %23 = arith.addf %21, %22 : vector<8x32xf32>
    %24 = vector.extract_strided_slice %15 {offsets = [0, 32], sizes = [8, 32], strides = [1, 1]} : vector<8x128xf32> to vector<8x32xf32>
    %cst_18 = arith.constant 5.000000e-01 : f32
    %25 = vector.broadcast %cst_18 : f32 to vector<8x32xf32>
    %26 = arith.mulf %24, %25 : vector<8x32xf32>
    %27 = math.tanh %26 : vector<8x32xf32>
    %cst_19 = arith.constant 5.000000e-01 : f32
    %28 = vector.broadcast %cst_19 : f32 to vector<8x32xf32>
    %29 = arith.mulf %27, %28 : vector<8x32xf32>
    %cst_20 = arith.constant 5.000000e-01 : f32
    %30 = vector.broadcast %cst_20 : f32 to vector<8x32xf32>
    %31 = arith.addf %29, %30 : vector<8x32xf32>
    %32 = vector.extract_strided_slice %15 {offsets = [0, 64], sizes = [8, 32], strides = [1, 1]} : vector<8x128xf32> to vector<8x32xf32>
    %33 = math.tanh %32 : vector<8x32xf32>
    %34 = vector.extract_strided_slice %15 {offsets = [0, 96], sizes = [8, 32], strides = [1, 1]} : vector<8x128xf32> to vector<8x32xf32>
    %cst_21 = arith.constant 5.000000e-01 : f32
    %35 = vector.broadcast %cst_21 : f32 to vector<8x32xf32>
    %36 = arith.mulf %34, %35 : vector<8x32xf32>
    %37 = math.tanh %36 : vector<8x32xf32>
    %cst_22 = arith.constant 5.000000e-01 : f32
    %38 = vector.broadcast %cst_22 : f32 to vector<8x32xf32>
    %39 = arith.mulf %37, %38 : vector<8x32xf32>
    %cst_23 = arith.constant 5.000000e-01 : f32
    %40 = vector.broadcast %cst_23 : f32 to vector<8x32xf32>
    %41 = arith.addf %39, %40 : vector<8x32xf32>
    %42 = arith.mulf %31, %1 : vector<8x32xf32>
    %43 = arith.mulf %23, %33 : vector<8x32xf32>
    %44 = arith.addf %42, %43 : vector<8x32xf32>
    %45 = math.tanh %44 : vector<8x32xf32>
    %46 = arith.mulf %41, %45 : vector<8x32xf32>
    %c0_24 = arith.constant 0 : index
    %c0_25 = arith.constant 0 : index
    %47 = vector.load %arg5[%c0_24, %c0_25] : memref<32x512xf32, #tpu.memory_space<vmem>>, vector<32x512xf32>
    %cst_26 = arith.constant dense<0.000000e+00> : vector<8x512xf32>
    %48 = tpu.matmul %46, %47, %cst_26 {dimension_numbers = #tpu.dot_dimension_numbers<[1], [0], [0], [1], [0, 0, 1, 1], [], []>} : vector<8x32xf32>, vector<32x512xf32>, vector<8x512xf32> -> vector<8x512xf32>
    %c0_27 = arith.constant 0 : index
    %c0_28 = arith.constant 0 : index
    %49 = vector.load %arg6[%c0_27, %c0_28] : memref<128x512xf32, #tpu.memory_space<vmem>>, vector<128x512xf32>
    %cst_29 = arith.constant dense<0.000000e+00> : vector<8x512xf32>
    %50 = tpu.matmul %2, %49, %cst_29 {dimension_numbers = #tpu.dot_dimension_numbers<[1], [0], [0], [1], [0, 0, 1, 1], [], []>} : vector<8x128xf32>, vector<128x512xf32>, vector<8x512xf32> -> vector<8x512xf32>
    %51 = arith.addf %48, %50 : vector<8x512xf32>
    %c0_30 = arith.constant 0 : index
    %c0_31 = arith.constant 0 : index
    %52 = vector.load %arg7[%c0_30, %c0_31] : memref<1x512xf32, #tpu.memory_space<vmem>>, vector<1x512xf32>
    %53 = vector.broadcast %52 : vector<1x512xf32> to vector<8x512xf32>
    %54 = arith.addf %51, %53 : vector<8x512xf32>
    %55 = vector.extract_strided_slice %54 {offsets = [0, 0], sizes = [8, 128], strides = [1, 1]} : vector<8x512xf32> to vector<8x128xf32>
    %cst_32 = arith.constant 5.000000e-01 : f32
    %56 = vector.broadcast %cst_32 : f32 to vector<8x128xf32>
    %57 = arith.mulf %55, %56 : vector<8x128xf32>
    %58 = math.tanh %57 : vector<8x128xf32>
    %cst_33 = arith.constant 5.000000e-01 : f32
    %59 = vector.broadcast %cst_33 : f32 to vector<8x128xf32>
    %60 = arith.mulf %58, %59 : vector<8x128xf32>
    %cst_34 = arith.constant 5.000000e-01 : f32
    %61 = vector.broadcast %cst_34 : f32 to vector<8x128xf32>
    %62 = arith.addf %60, %61 : vector<8x128xf32>
    %63 = vector.extract_strided_slice %54 {offsets = [0, 128], sizes = [8, 128], strides = [1, 1]} : vector<8x512xf32> to vector<8x128xf32>
    %cst_35 = arith.constant 5.000000e-01 : f32
    %64 = vector.broadcast %cst_35 : f32 to vector<8x128xf32>
    %65 = arith.mulf %63, %64 : vector<8x128xf32>
    %66 = math.tanh %65 : vector<8x128xf32>
    %cst_36 = arith.constant 5.000000e-01 : f32
    %67 = vector.broadcast %cst_36 : f32 to vector<8x128xf32>
    %68 = arith.mulf %66, %67 : vector<8x128xf32>
    %cst_37 = arith.constant 5.000000e-01 : f32
    %69 = vector.broadcast %cst_37 : f32 to vector<8x128xf32>
    %70 = arith.addf %68, %69 : vector<8x128xf32>
    %71 = vector.extract_strided_slice %54 {offsets = [0, 256], sizes = [8, 128], strides = [1, 1]} : vector<8x512xf32> to vector<8x128xf32>
    %72 = math.tanh %71 : vector<8x128xf32>
    %73 = vector.extract_strided_slice %54 {offsets = [0, 384], sizes = [8, 128], strides = [1, 1]} : vector<8x512xf32> to vector<8x128xf32>
    %cst_38 = arith.constant 5.000000e-01 : f32
    %74 = vector.broadcast %cst_38 : f32 to vector<8x128xf32>
    %75 = arith.mulf %73, %74 : vector<8x128xf32>
    %76 = math.tanh %75 : vector<8x128xf32>
    %cst_39 = arith.constant 5.000000e-01 : f32
    %77 = vector.broadcast %cst_39 : f32 to vector<8x128xf32>
    %78 = arith.mulf %76, %77 : vector<8x128xf32>
    %cst_40 = arith.constant 5.000000e-01 : f32
    %79 = vector.broadcast %cst_40 : f32 to vector<8x128xf32>
    %80 = arith.addf %78, %79 : vector<8x128xf32>
    %81 = arith.mulf %70, %3 : vector<8x128xf32>
    %82 = arith.mulf %62, %72 : vector<8x128xf32>
    %83 = arith.addf %81, %82 : vector<8x128xf32>
    %84 = math.tanh %83 : vector<8x128xf32>
    %85 = arith.mulf %80, %84 : vector<8x128xf32>
    %c1 = arith.constant 1 : index
    %c0_41 = arith.constant 0 : index
    %c0_42 = arith.constant 0 : index
    %86 = vector.load %arg1[%c1, %c0_41, %c0_42] : memref<8x8x16xf32, #tpu.memory_space<vmem>>, vector<1x8x16xf32>
    %87 = vector.shape_cast %86 : vector<1x8x16xf32> to vector<8x16xf32>
    %c0_43 = arith.constant 0 : index
    %c0_44 = arith.constant 0 : index
    %88 = vector.load %arg2[%c0_43, %c0_44] : memref<16x128xf32, #tpu.memory_space<vmem>>, vector<16x128xf32>
    %cst_45 = arith.constant dense<0.000000e+00> : vector<8x128xf32>
    %89 = tpu.matmul %87, %88, %cst_45 {dimension_numbers = #tpu.dot_dimension_numbers<[1], [0], [0], [1], [0, 0, 1, 1], [], []>} : vector<8x16xf32>, vector<16x128xf32>, vector<8x128xf32> -> vector<8x128xf32>
    %c0_46 = arith.constant 0 : index
    %c0_47 = arith.constant 0 : index
    %90 = vector.load %arg3[%c0_46, %c0_47] : memref<32x128xf32, #tpu.memory_space<vmem>>, vector<32x128xf32>
    %cst_48 = arith.constant dense<0.000000e+00> : vector<8x128xf32>
    %91 = tpu.matmul %46, %90, %cst_48 {dimension_numbers = #tpu.dot_dimension_numbers<[1], [0], [0], [1], [0, 0, 1, 1], [], []>} : vector<8x32xf32>, vector<32x128xf32>, vector<8x128xf32> -> vector<8x128xf32>
    %92 = arith.addf %89, %91 : vector<8x128xf32>
    %c0_49 = arith.constant 0 : index
    %c0_50 = arith.constant 0 : index
    %93 = vector.load %arg4[%c0_49, %c0_50] : memref<1x128xf32, #tpu.memory_space<vmem>>, vector<1x128xf32>
    %94 = vector.broadcast %93 : vector<1x128xf32> to vector<8x128xf32>
    %95 = arith.addf %92, %94 : vector<8x128xf32>
    %96 = vector.extract_strided_slice %95 {offsets = [0, 0], sizes = [8, 32], strides = [1, 1]} : vector<8x128xf32> to vector<8x32xf32>
    %cst_51 = arith.constant 5.000000e-01 : f32
    %97 = vector.broadcast %cst_51 : f32 to vector<8x32xf32>
    %98 = arith.mulf %96, %97 : vector<8x32xf32>
    %99 = math.tanh %98 : vector<8x32xf32>
    %cst_52 = arith.constant 5.000000e-01 : f32
    %100 = vector.broadcast %cst_52 : f32 to vector<8x32xf32>
    %101 = arith.mulf %99, %100 : vector<8x32xf32>
    %cst_53 = arith.constant 5.000000e-01 : f32
    %102 = vector.broadcast %cst_53 : f32 to vector<8x32xf32>
    %103 = arith.addf %101, %102 : vector<8x32xf32>
    %104 = vector.extract_strided_slice %95 {offsets = [0, 32], sizes = [8, 32], strides = [1, 1]} : vector<8x128xf32> to vector<8x32xf32>
    %cst_54 = arith.constant 5.000000e-01 : f32
    %105 = vector.broadcast %cst_54 : f32 to vector<8x32xf32>
    %106 = arith.mulf %104, %105 : vector<8x32xf32>
    %107 = math.tanh %106 : vector<8x32xf32>
    %cst_55 = arith.constant 5.000000e-01 : f32
    %108 = vector.broadcast %cst_55 : f32 to vector<8x32xf32>
    %109 = arith.mulf %107, %108 : vector<8x32xf32>
    %cst_56 = arith.constant 5.000000e-01 : f32
    %110 = vector.broadcast %cst_56 : f32 to vector<8x32xf32>
    %111 = arith.addf %109, %110 : vector<8x32xf32>
    %112 = vector.extract_strided_slice %95 {offsets = [0, 64], sizes = [8, 32], strides = [1, 1]} : vector<8x128xf32> to vector<8x32xf32>
    %113 = math.tanh %112 : vector<8x32xf32>
    %114 = vector.extract_strided_slice %95 {offsets = [0, 96], sizes = [8, 32], strides = [1, 1]} : vector<8x128xf32> to vector<8x32xf32>
    %cst_57 = arith.constant 5.000000e-01 : f32
    %115 = vector.broadcast %cst_57 : f32 to vector<8x32xf32>
    %116 = arith.mulf %114, %115 : vector<8x32xf32>
    %117 = math.tanh %116 : vector<8x32xf32>
    %cst_58 = arith.constant 5.000000e-01 : f32
    %118 = vector.broadcast %cst_58 : f32 to vector<8x32xf32>
    %119 = arith.mulf %117, %118 : vector<8x32xf32>
    %cst_59 = arith.constant 5.000000e-01 : f32
    %120 = vector.broadcast %cst_59 : f32 to vector<8x32xf32>
    %121 = arith.addf %119, %120 : vector<8x32xf32>
    %122 = arith.mulf %111, %44 : vector<8x32xf32>
    %123 = arith.mulf %103, %113 : vector<8x32xf32>
    %124 = arith.addf %122, %123 : vector<8x32xf32>
    %125 = math.tanh %124 : vector<8x32xf32>
    %126 = arith.mulf %121, %125 : vector<8x32xf32>
    %c0_60 = arith.constant 0 : index
    %c0_61 = arith.constant 0 : index
    %127 = vector.load %arg8[%c0_60, %c0_61] : memref<128x128xf32, #tpu.memory_space<vmem>>, vector<128x128xf32>
    %cst_62 = arith.constant dense<0.000000e+00> : vector<8x128xf32>
    %128 = tpu.matmul %85, %127, %cst_62 {dimension_numbers = #tpu.dot_dimension_numbers<[1], [0], [0], [1], [0, 0, 1, 1], [], []>} : vector<8x128xf32>, vector<128x128xf32>, vector<8x128xf32> -> vector<8x128xf32>
    %c0_63 = arith.constant 0 : index
    %c0_64 = arith.constant 0 : index
    %129 = vector.load %arg9[%c0_63, %c0_64] : memref<32x128xf32, #tpu.memory_space<vmem>>, vector<32x128xf32>
    %cst_65 = arith.constant dense<0.000000e+00> : vector<8x128xf32>
    %130 = tpu.matmul %4, %129, %cst_65 {dimension_numbers = #tpu.dot_dimension_numbers<[1], [0], [0], [1], [0, 0, 1, 1], [], []>} : vector<8x32xf32>, vector<32x128xf32>, vector<8x128xf32> -> vector<8x128xf32>
    %131 = arith.addf %128, %130 : vector<8x128xf32>
    %c0_66 = arith.constant 0 : index
    %c0_67 = arith.constant 0 : index
    %132 = vector.load %arg10[%c0_66, %c0_67] : memref<1x128xf32, #tpu.memory_space<vmem>>, vector<1x128xf32>
    %133 = vector.broadcast %132 : vector<1x128xf32> to vector<8x128xf32>
    %134 = arith.addf %131, %133 : vector<8x128xf32>
    %135 = vector.extract_strided_slice %134 {offsets = [0, 0], sizes = [8, 32], strides = [1, 1]} : vector<8x128xf32> to vector<8x32xf32>
    %cst_68 = arith.constant 5.000000e-01 : f32
    %136 = vector.broadcast %cst_68 : f32 to vector<8x32xf32>
    %137 = arith.mulf %135, %136 : vector<8x32xf32>
    %138 = math.tanh %137 : vector<8x32xf32>
    %cst_69 = arith.constant 5.000000e-01 : f32
    %139 = vector.broadcast %cst_69 : f32 to vector<8x32xf32>
    %140 = arith.mulf %138, %139 : vector<8x32xf32>
    %cst_70 = arith.constant 5.000000e-01 : f32
    %141 = vector.broadcast %cst_70 : f32 to vector<8x32xf32>
    %142 = arith.addf %140, %141 : vector<8x32xf32>
    %143 = vector.extract_strided_slice %134 {offsets = [0, 32], sizes = [8, 32], strides = [1, 1]} : vector<8x128xf32> to vector<8x32xf32>
    %cst_71 = arith.constant 5.000000e-01 : f32
    %144 = vector.broadcast %cst_71 : f32 to vector<8x32xf32>
    %145 = arith.mulf %143, %144 : vector<8x32xf32>
    %146 = math.tanh %145 : vector<8x32xf32>
    %cst_72 = arith.constant 5.000000e-01 : f32
    %147 = vector.broadcast %cst_72 : f32 to vector<8x32xf32>
    %148 = arith.mulf %146, %147 : vector<8x32xf32>
    %cst_73 = arith.constant 5.000000e-01 : f32
    %149 = vector.broadcast %cst_73 : f32 to vector<8x32xf32>
    %150 = arith.addf %148, %149 : vector<8x32xf32>
    %151 = vector.extract_strided_slice %134 {offsets = [0, 64], sizes = [8, 32], strides = [1, 1]} : vector<8x128xf32> to vector<8x32xf32>
    %152 = math.tanh %151 : vector<8x32xf32>
    %153 = vector.extract_strided_slice %134 {offsets = [0, 96], sizes = [8, 32], strides = [1, 1]} : vector<8x128xf32> to vector<8x32xf32>
    %cst_74 = arith.constant 5.000000e-01 : f32
    %154 = vector.broadcast %cst_74 : f32 to vector<8x32xf32>
    %155 = arith.mulf %153, %154 : vector<8x32xf32>
    %156 = math.tanh %155 : vector<8x32xf32>
    %cst_75 = arith.constant 5.000000e-01 : f32
    %157 = vector.broadcast %cst_75 : f32 to vector<8x32xf32>
    %158 = arith.mulf %156, %157 : vector<8x32xf32>
    %cst_76 = arith.constant 5.000000e-01 : f32
    %159 = vector.broadcast %cst_76 : f32 to vector<8x32xf32>
    %160 = arith.addf %158, %159 : vector<8x32xf32>
    %161 = arith.mulf %150, %5 : vector<8x32xf32>
    %162 = arith.mulf %142, %152 : vector<8x32xf32>
    %163 = arith.addf %161, %162 : vector<8x32xf32>
    %164 = math.tanh %163 : vector<8x32xf32>
    %165 = arith.mulf %160, %164 : vector<8x32xf32>
    %c0_77 = arith.constant 0 : index
    %c0_78 = arith.constant 0 : index
    %166 = vector.load %arg5[%c0_77, %c0_78] : memref<32x512xf32, #tpu.memory_space<vmem>>, vector<32x512xf32>
    %cst_79 = arith.constant dense<0.000000e+00> : vector<8x512xf32>
    %167 = tpu.matmul %126, %166, %cst_79 {dimension_numbers = #tpu.dot_dimension_numbers<[1], [0], [0], [1], [0, 0, 1, 1], [], []>} : vector<8x32xf32>, vector<32x512xf32>, vector<8x512xf32> -> vector<8x512xf32>
    %c0_80 = arith.constant 0 : index
    %c0_81 = arith.constant 0 : index
    %168 = vector.load %arg6[%c0_80, %c0_81] : memref<128x512xf32, #tpu.memory_space<vmem>>, vector<128x512xf32>
    %cst_82 = arith.constant dense<0.000000e+00> : vector<8x512xf32>
    %169 = tpu.matmul %85, %168, %cst_82 {dimension_numbers = #tpu.dot_dimension_numbers<[1], [0], [0], [1], [0, 0, 1, 1], [], []>} : vector<8x128xf32>, vector<128x512xf32>, vector<8x512xf32> -> vector<8x512xf32>
    %170 = arith.addf %167, %169 : vector<8x512xf32>
    %c0_83 = arith.constant 0 : index
    %c0_84 = arith.constant 0 : index
    %171 = vector.load %arg7[%c0_83, %c0_84] : memref<1x512xf32, #tpu.memory_space<vmem>>, vector<1x512xf32>
    %172 = vector.broadcast %171 : vector<1x512xf32> to vector<8x512xf32>
    %173 = arith.addf %170, %172 : vector<8x512xf32>
    %174 = vector.extract_strided_slice %173 {offsets = [0, 0], sizes = [8, 128], strides = [1, 1]} : vector<8x512xf32> to vector<8x128xf32>
    %cst_85 = arith.constant 5.000000e-01 : f32
    %175 = vector.broadcast %cst_85 : f32 to vector<8x128xf32>
    %176 = arith.mulf %174, %175 : vector<8x128xf32>
    %177 = math.tanh %176 : vector<8x128xf32>
    %cst_86 = arith.constant 5.000000e-01 : f32
    %178 = vector.broadcast %cst_86 : f32 to vector<8x128xf32>
    %179 = arith.mulf %177, %178 : vector<8x128xf32>
    %cst_87 = arith.constant 5.000000e-01 : f32
    %180 = vector.broadcast %cst_87 : f32 to vector<8x128xf32>
    %181 = arith.addf %179, %180 : vector<8x128xf32>
    %182 = vector.extract_strided_slice %173 {offsets = [0, 128], sizes = [8, 128], strides = [1, 1]} : vector<8x512xf32> to vector<8x128xf32>
    %cst_88 = arith.constant 5.000000e-01 : f32
    %183 = vector.broadcast %cst_88 : f32 to vector<8x128xf32>
    %184 = arith.mulf %182, %183 : vector<8x128xf32>
    %185 = math.tanh %184 : vector<8x128xf32>
    %cst_89 = arith.constant 5.000000e-01 : f32
    %186 = vector.broadcast %cst_89 : f32 to vector<8x128xf32>
    %187 = arith.mulf %185, %186 : vector<8x128xf32>
    %cst_90 = arith.constant 5.000000e-01 : f32
    %188 = vector.broadcast %cst_90 : f32 to vector<8x128xf32>
    %189 = arith.addf %187, %188 : vector<8x128xf32>
    %190 = vector.extract_strided_slice %173 {offsets = [0, 256], sizes = [8, 128], strides = [1, 1]} : vector<8x512xf32> to vector<8x128xf32>
    %191 = math.tanh %190 : vector<8x128xf32>
    %192 = vector.extract_strided_slice %173 {offsets = [0, 384], sizes = [8, 128], strides = [1, 1]} : vector<8x512xf32> to vector<8x128xf32>
    %cst_91 = arith.constant 5.000000e-01 : f32
    %193 = vector.broadcast %cst_91 : f32 to vector<8x128xf32>
    %194 = arith.mulf %192, %193 : vector<8x128xf32>
    %195 = math.tanh %194 : vector<8x128xf32>
    %cst_92 = arith.constant 5.000000e-01 : f32
    %196 = vector.broadcast %cst_92 : f32 to vector<8x128xf32>
    %197 = arith.mulf %195, %196 : vector<8x128xf32>
    %cst_93 = arith.constant 5.000000e-01 : f32
    %198 = vector.broadcast %cst_93 : f32 to vector<8x128xf32>
    %199 = arith.addf %197, %198 : vector<8x128xf32>
    %200 = arith.mulf %189, %83 : vector<8x128xf32>
    %201 = arith.mulf %181, %191 : vector<8x128xf32>
    %202 = arith.addf %200, %201 : vector<8x128xf32>
    %203 = math.tanh %202 : vector<8x128xf32>
    %204 = arith.mulf %199, %203 : vector<8x128xf32>
    %c2 = arith.constant 2 : index
    %c0_94 = arith.constant 0 : index
    %c0_95 = arith.constant 0 : index
    %205 = vector.load %arg1[%c2, %c0_94, %c0_95] : memref<8x8x16xf32, #tpu.memory_space<vmem>>, vector<1x8x16xf32>
    %206 = vector.shape_cast %205 : vector<1x8x16xf32> to vector<8x16xf32>
    %c0_96 = arith.constant 0 : index
    %c0_97 = arith.constant 0 : index
    %207 = vector.load %arg2[%c0_96, %c0_97] : memref<16x128xf32, #tpu.memory_space<vmem>>, vector<16x128xf32>
    %cst_98 = arith.constant dense<0.000000e+00> : vector<8x128xf32>
    %208 = tpu.matmul %206, %207, %cst_98 {dimension_numbers = #tpu.dot_dimension_numbers<[1], [0], [0], [1], [0, 0, 1, 1], [], []>} : vector<8x16xf32>, vector<16x128xf32>, vector<8x128xf32> -> vector<8x128xf32>
    %c0_99 = arith.constant 0 : index
    %c0_100 = arith.constant 0 : index
    %209 = vector.load %arg3[%c0_99, %c0_100] : memref<32x128xf32, #tpu.memory_space<vmem>>, vector<32x128xf32>
    %cst_101 = arith.constant dense<0.000000e+00> : vector<8x128xf32>
    %210 = tpu.matmul %126, %209, %cst_101 {dimension_numbers = #tpu.dot_dimension_numbers<[1], [0], [0], [1], [0, 0, 1, 1], [], []>} : vector<8x32xf32>, vector<32x128xf32>, vector<8x128xf32> -> vector<8x128xf32>
    %211 = arith.addf %208, %210 : vector<8x128xf32>
    %c0_102 = arith.constant 0 : index
    %c0_103 = arith.constant 0 : index
    %212 = vector.load %arg4[%c0_102, %c0_103] : memref<1x128xf32, #tpu.memory_space<vmem>>, vector<1x128xf32>
    %213 = vector.broadcast %212 : vector<1x128xf32> to vector<8x128xf32>
    %214 = arith.addf %211, %213 : vector<8x128xf32>
    %215 = vector.extract_strided_slice %214 {offsets = [0, 0], sizes = [8, 32], strides = [1, 1]} : vector<8x128xf32> to vector<8x32xf32>
    %cst_104 = arith.constant 5.000000e-01 : f32
    %216 = vector.broadcast %cst_104 : f32 to vector<8x32xf32>
    %217 = arith.mulf %215, %216 : vector<8x32xf32>
    %218 = math.tanh %217 : vector<8x32xf32>
    %cst_105 = arith.constant 5.000000e-01 : f32
    %219 = vector.broadcast %cst_105 : f32 to vector<8x32xf32>
    %220 = arith.mulf %218, %219 : vector<8x32xf32>
    %cst_106 = arith.constant 5.000000e-01 : f32
    %221 = vector.broadcast %cst_106 : f32 to vector<8x32xf32>
    %222 = arith.addf %220, %221 : vector<8x32xf32>
    %223 = vector.extract_strided_slice %214 {offsets = [0, 32], sizes = [8, 32], strides = [1, 1]} : vector<8x128xf32> to vector<8x32xf32>
    %cst_107 = arith.constant 5.000000e-01 : f32
    %224 = vector.broadcast %cst_107 : f32 to vector<8x32xf32>
    %225 = arith.mulf %223, %224 : vector<8x32xf32>
    %226 = math.tanh %225 : vector<8x32xf32>
    %cst_108 = arith.constant 5.000000e-01 : f32
    %227 = vector.broadcast %cst_108 : f32 to vector<8x32xf32>
    %228 = arith.mulf %226, %227 : vector<8x32xf32>
    %cst_109 = arith.constant 5.000000e-01 : f32
    %229 = vector.broadcast %cst_109 : f32 to vector<8x32xf32>
    %230 = arith.addf %228, %229 : vector<8x32xf32>
    %231 = vector.extract_strided_slice %214 {offsets = [0, 64], sizes = [8, 32], strides = [1, 1]} : vector<8x128xf32> to vector<8x32xf32>
    %232 = math.tanh %231 : vector<8x32xf32>
    %233 = vector.extract_strided_slice %214 {offsets = [0, 96], sizes = [8, 32], strides = [1, 1]} : vector<8x128xf32> to vector<8x32xf32>
    %cst_110 = arith.constant 5.000000e-01 : f32
    %234 = vector.broadcast %cst_110 : f32 to vector<8x32xf32>
    %235 = arith.mulf %233, %234 : vector<8x32xf32>
    %236 = math.tanh %235 : vector<8x32xf32>
    %cst_111 = arith.constant 5.000000e-01 : f32
    %237 = vector.broadcast %cst_111 : f32 to vector<8x32xf32>
    %238 = arith.mulf %236, %237 : vector<8x32xf32>
    %cst_112 = arith.constant 5.000000e-01 : f32
    %239 = vector.broadcast %cst_112 : f32 to vector<8x32xf32>
    %240 = arith.addf %238, %239 : vector<8x32xf32>
    %241 = arith.mulf %230, %124 : vector<8x32xf32>
    %242 = arith.mulf %222, %232 : vector<8x32xf32>
    %243 = arith.addf %241, %242 : vector<8x32xf32>
    %244 = math.tanh %243 : vector<8x32xf32>
    %245 = arith.mulf %240, %244 : vector<8x32xf32>
    %c0_113 = arith.constant 0 : index
    %c0_114 = arith.constant 0 : index
    %246 = vector.load %arg8[%c0_113, %c0_114] : memref<128x128xf32, #tpu.memory_space<vmem>>, vector<128x128xf32>
    %cst_115 = arith.constant dense<0.000000e+00> : vector<8x128xf32>
    %247 = tpu.matmul %204, %246, %cst_115 {dimension_numbers = #tpu.dot_dimension_numbers<[1], [0], [0], [1], [0, 0, 1, 1], [], []>} : vector<8x128xf32>, vector<128x128xf32>, vector<8x128xf32> -> vector<8x128xf32>
    %c0_116 = arith.constant 0 : index
    %c0_117 = arith.constant 0 : index
    %248 = vector.load %arg9[%c0_116, %c0_117] : memref<32x128xf32, #tpu.memory_space<vmem>>, vector<32x128xf32>
    %cst_118 = arith.constant dense<0.000000e+00> : vector<8x128xf32>
    %249 = tpu.matmul %165, %248, %cst_118 {dimension_numbers = #tpu.dot_dimension_numbers<[1], [0], [0], [1], [0, 0, 1, 1], [], []>} : vector<8x32xf32>, vector<32x128xf32>, vector<8x128xf32> -> vector<8x128xf32>
    %250 = arith.addf %247, %249 : vector<8x128xf32>
    %c0_119 = arith.constant 0 : index
    %c0_120 = arith.constant 0 : index
    %251 = vector.load %arg10[%c0_119, %c0_120] : memref<1x128xf32, #tpu.memory_space<vmem>>, vector<1x128xf32>
    %252 = vector.broadcast %251 : vector<1x128xf32> to vector<8x128xf32>
    %253 = arith.addf %250, %252 : vector<8x128xf32>
    %254 = vector.extract_strided_slice %253 {offsets = [0, 0], sizes = [8, 32], strides = [1, 1]} : vector<8x128xf32> to vector<8x32xf32>
    %cst_121 = arith.constant 5.000000e-01 : f32
    %255 = vector.broadcast %cst_121 : f32 to vector<8x32xf32>
    %256 = arith.mulf %254, %255 : vector<8x32xf32>
    %257 = math.tanh %256 : vector<8x32xf32>
    %cst_122 = arith.constant 5.000000e-01 : f32
    %258 = vector.broadcast %cst_122 : f32 to vector<8x32xf32>
    %259 = arith.mulf %257, %258 : vector<8x32xf32>
    %cst_123 = arith.constant 5.000000e-01 : f32
    %260 = vector.broadcast %cst_123 : f32 to vector<8x32xf32>
    %261 = arith.addf %259, %260 : vector<8x32xf32>
    %262 = vector.extract_strided_slice %253 {offsets = [0, 32], sizes = [8, 32], strides = [1, 1]} : vector<8x128xf32> to vector<8x32xf32>
    %cst_124 = arith.constant 5.000000e-01 : f32
    %263 = vector.broadcast %cst_124 : f32 to vector<8x32xf32>
    %264 = arith.mulf %262, %263 : vector<8x32xf32>
    %265 = math.tanh %264 : vector<8x32xf32>
    %cst_125 = arith.constant 5.000000e-01 : f32
    %266 = vector.broadcast %cst_125 : f32 to vector<8x32xf32>
    %267 = arith.mulf %265, %266 : vector<8x32xf32>
    %cst_126 = arith.constant 5.000000e-01 : f32
    %268 = vector.broadcast %cst_126 : f32 to vector<8x32xf32>
    %269 = arith.addf %267, %268 : vector<8x32xf32>
    %270 = vector.extract_strided_slice %253 {offsets = [0, 64], sizes = [8, 32], strides = [1, 1]} : vector<8x128xf32> to vector<8x32xf32>
    %271 = math.tanh %270 : vector<8x32xf32>
    %272 = vector.extract_strided_slice %253 {offsets = [0, 96], sizes = [8, 32], strides = [1, 1]} : vector<8x128xf32> to vector<8x32xf32>
    %cst_127 = arith.constant 5.000000e-01 : f32
    %273 = vector.broadcast %cst_127 : f32 to vector<8x32xf32>
    %274 = arith.mulf %272, %273 : vector<8x32xf32>
    %275 = math.tanh %274 : vector<8x32xf32>
    %cst_128 = arith.constant 5.000000e-01 : f32
    %276 = vector.broadcast %cst_128 : f32 to vector<8x32xf32>
    %277 = arith.mulf %275, %276 : vector<8x32xf32>
    %cst_129 = arith.constant 5.000000e-01 : f32
    %278 = vector.broadcast %cst_129 : f32 to vector<8x32xf32>
    %279 = arith.addf %277, %278 : vector<8x32xf32>
    %280 = arith.mulf %269, %163 : vector<8x32xf32>
    %281 = arith.mulf %261, %271 : vector<8x32xf32>
    %282 = arith.addf %280, %281 : vector<8x32xf32>
    %283 = math.tanh %282 : vector<8x32xf32>
    %284 = arith.mulf %279, %283 : vector<8x32xf32>
    %c0_130 = arith.constant 0 : index
    %c0_131 = arith.constant 0 : index
    %285 = vector.load %arg5[%c0_130, %c0_131] : memref<32x512xf32, #tpu.memory_space<vmem>>, vector<32x512xf32>
    %cst_132 = arith.constant dense<0.000000e+00> : vector<8x512xf32>
    %286 = tpu.matmul %245, %285, %cst_132 {dimension_numbers = #tpu.dot_dimension_numbers<[1], [0], [0], [1], [0, 0, 1, 1], [], []>} : vector<8x32xf32>, vector<32x512xf32>, vector<8x512xf32> -> vector<8x512xf32>
    %c0_133 = arith.constant 0 : index
    %c0_134 = arith.constant 0 : index
    %287 = vector.load %arg6[%c0_133, %c0_134] : memref<128x512xf32, #tpu.memory_space<vmem>>, vector<128x512xf32>
    %cst_135 = arith.constant dense<0.000000e+00> : vector<8x512xf32>
    %288 = tpu.matmul %204, %287, %cst_135 {dimension_numbers = #tpu.dot_dimension_numbers<[1], [0], [0], [1], [0, 0, 1, 1], [], []>} : vector<8x128xf32>, vector<128x512xf32>, vector<8x512xf32> -> vector<8x512xf32>
    %289 = arith.addf %286, %288 : vector<8x512xf32>
    %c0_136 = arith.constant 0 : index
    %c0_137 = arith.constant 0 : index
    %290 = vector.load %arg7[%c0_136, %c0_137] : memref<1x512xf32, #tpu.memory_space<vmem>>, vector<1x512xf32>
    %291 = vector.broadcast %290 : vector<1x512xf32> to vector<8x512xf32>
    %292 = arith.addf %289, %291 : vector<8x512xf32>
    %293 = vector.extract_strided_slice %292 {offsets = [0, 0], sizes = [8, 128], strides = [1, 1]} : vector<8x512xf32> to vector<8x128xf32>
    %cst_138 = arith.constant 5.000000e-01 : f32
    %294 = vector.broadcast %cst_138 : f32 to vector<8x128xf32>
    %295 = arith.mulf %293, %294 : vector<8x128xf32>
    %296 = math.tanh %295 : vector<8x128xf32>
    %cst_139 = arith.constant 5.000000e-01 : f32
    %297 = vector.broadcast %cst_139 : f32 to vector<8x128xf32>
    %298 = arith.mulf %296, %297 : vector<8x128xf32>
    %cst_140 = arith.constant 5.000000e-01 : f32
    %299 = vector.broadcast %cst_140 : f32 to vector<8x128xf32>
    %300 = arith.addf %298, %299 : vector<8x128xf32>
    %301 = vector.extract_strided_slice %292 {offsets = [0, 128], sizes = [8, 128], strides = [1, 1]} : vector<8x512xf32> to vector<8x128xf32>
    %cst_141 = arith.constant 5.000000e-01 : f32
    %302 = vector.broadcast %cst_141 : f32 to vector<8x128xf32>
    %303 = arith.mulf %301, %302 : vector<8x128xf32>
    %304 = math.tanh %303 : vector<8x128xf32>
    %cst_142 = arith.constant 5.000000e-01 : f32
    %305 = vector.broadcast %cst_142 : f32 to vector<8x128xf32>
    %306 = arith.mulf %304, %305 : vector<8x128xf32>
    %cst_143 = arith.constant 5.000000e-01 : f32
    %307 = vector.broadcast %cst_143 : f32 to vector<8x128xf32>
    %308 = arith.addf %306, %307 : vector<8x128xf32>
    %309 = vector.extract_strided_slice %292 {offsets = [0, 256], sizes = [8, 128], strides = [1, 1]} : vector<8x512xf32> to vector<8x128xf32>
    %310 = math.tanh %309 : vector<8x128xf32>
    %311 = vector.extract_strided_slice %292 {offsets = [0, 384], sizes = [8, 128], strides = [1, 1]} : vector<8x512xf32> to vector<8x128xf32>
    %cst_144 = arith.constant 5.000000e-01 : f32
    %312 = vector.broadcast %cst_144 : f32 to vector<8x128xf32>
    %313 = arith.mulf %311, %312 : vector<8x128xf32>
    %314 = math.tanh %313 : vector<8x128xf32>
    %cst_145 = arith.constant 5.000000e-01 : f32
    %315 = vector.broadcast %cst_145 : f32 to vector<8x128xf32>
    %316 = arith.mulf %314, %315 : vector<8x128xf32>
    %cst_146 = arith.constant 5.000000e-01 : f32
    %317 = vector.broadcast %cst_146 : f32 to vector<8x128xf32>
    %318 = arith.addf %316, %317 : vector<8x128xf32>
    %319 = arith.mulf %308, %202 : vector<8x128xf32>
    %320 = arith.mulf %300, %310 : vector<8x128xf32>
    %321 = arith.addf %319, %320 : vector<8x128xf32>
    %322 = math.tanh %321 : vector<8x128xf32>
    %323 = arith.mulf %318, %322 : vector<8x128xf32>
    %c3 = arith.constant 3 : index
    %c0_147 = arith.constant 0 : index
    %c0_148 = arith.constant 0 : index
    %324 = vector.load %arg1[%c3, %c0_147, %c0_148] : memref<8x8x16xf32, #tpu.memory_space<vmem>>, vector<1x8x16xf32>
    %325 = vector.shape_cast %324 : vector<1x8x16xf32> to vector<8x16xf32>
    %c0_149 = arith.constant 0 : index
    %c0_150 = arith.constant 0 : index
    %326 = vector.load %arg2[%c0_149, %c0_150] : memref<16x128xf32, #tpu.memory_space<vmem>>, vector<16x128xf32>
    %cst_151 = arith.constant dense<0.000000e+00> : vector<8x128xf32>
    %327 = tpu.matmul %325, %326, %cst_151 {dimension_numbers = #tpu.dot_dimension_numbers<[1], [0], [0], [1], [0, 0, 1, 1], [], []>} : vector<8x16xf32>, vector<16x128xf32>, vector<8x128xf32> -> vector<8x128xf32>
    %c0_152 = arith.constant 0 : index
    %c0_153 = arith.constant 0 : index
    %328 = vector.load %arg3[%c0_152, %c0_153] : memref<32x128xf32, #tpu.memory_space<vmem>>, vector<32x128xf32>
    %cst_154 = arith.constant dense<0.000000e+00> : vector<8x128xf32>
    %329 = tpu.matmul %245, %328, %cst_154 {dimension_numbers = #tpu.dot_dimension_numbers<[1], [0], [0], [1], [0, 0, 1, 1], [], []>} : vector<8x32xf32>, vector<32x128xf32>, vector<8x128xf32> -> vector<8x128xf32>
    %330 = arith.addf %327, %329 : vector<8x128xf32>
    %c0_155 = arith.constant 0 : index
    %c0_156 = arith.constant 0 : index
    %331 = vector.load %arg4[%c0_155, %c0_156] : memref<1x128xf32, #tpu.memory_space<vmem>>, vector<1x128xf32>
    %332 = vector.broadcast %331 : vector<1x128xf32> to vector<8x128xf32>
    %333 = arith.addf %330, %332 : vector<8x128xf32>
    %334 = vector.extract_strided_slice %333 {offsets = [0, 0], sizes = [8, 32], strides = [1, 1]} : vector<8x128xf32> to vector<8x32xf32>
    %cst_157 = arith.constant 5.000000e-01 : f32
    %335 = vector.broadcast %cst_157 : f32 to vector<8x32xf32>
    %336 = arith.mulf %334, %335 : vector<8x32xf32>
    %337 = math.tanh %336 : vector<8x32xf32>
    %cst_158 = arith.constant 5.000000e-01 : f32
    %338 = vector.broadcast %cst_158 : f32 to vector<8x32xf32>
    %339 = arith.mulf %337, %338 : vector<8x32xf32>
    %cst_159 = arith.constant 5.000000e-01 : f32
    %340 = vector.broadcast %cst_159 : f32 to vector<8x32xf32>
    %341 = arith.addf %339, %340 : vector<8x32xf32>
    %342 = vector.extract_strided_slice %333 {offsets = [0, 32], sizes = [8, 32], strides = [1, 1]} : vector<8x128xf32> to vector<8x32xf32>
    %cst_160 = arith.constant 5.000000e-01 : f32
    %343 = vector.broadcast %cst_160 : f32 to vector<8x32xf32>
    %344 = arith.mulf %342, %343 : vector<8x32xf32>
    %345 = math.tanh %344 : vector<8x32xf32>
    %cst_161 = arith.constant 5.000000e-01 : f32
    %346 = vector.broadcast %cst_161 : f32 to vector<8x32xf32>
    %347 = arith.mulf %345, %346 : vector<8x32xf32>
    %cst_162 = arith.constant 5.000000e-01 : f32
    %348 = vector.broadcast %cst_162 : f32 to vector<8x32xf32>
    %349 = arith.addf %347, %348 : vector<8x32xf32>
    %350 = vector.extract_strided_slice %333 {offsets = [0, 64], sizes = [8, 32], strides = [1, 1]} : vector<8x128xf32> to vector<8x32xf32>
    %351 = math.tanh %350 : vector<8x32xf32>
    %352 = vector.extract_strided_slice %333 {offsets = [0, 96], sizes = [8, 32], strides = [1, 1]} : vector<8x128xf32> to vector<8x32xf32>
    %cst_163 = arith.constant 5.000000e-01 : f32
    %353 = vector.broadcast %cst_163 : f32 to vector<8x32xf32>
    %354 = arith.mulf %352, %353 : vector<8x32xf32>
    %355 = math.tanh %354 : vector<8x32xf32>
    %cst_164 = arith.constant 5.000000e-01 : f32
    %356 = vector.broadcast %cst_164 : f32 to vector<8x32xf32>
    %357 = arith.mulf %355, %356 : vector<8x32xf32>
    %cst_165 = arith.constant 5.000000e-01 : f32
    %358 = vector.broadcast %cst_165 : f32 to vector<8x32xf32>
    %359 = arith.addf %357, %358 : vector<8x32xf32>
    %360 = arith.mulf %349, %243 : vector<8x32xf32>
    %361 = arith.mulf %341, %351 : vector<8x32xf32>
    %362 = arith.addf %360, %361 : vector<8x32xf32>
    %363 = math.tanh %362 : vector<8x32xf32>
    %364 = arith.mulf %359, %363 : vector<8x32xf32>
    %c0_166 = arith.constant 0 : index
    %c0_167 = arith.constant 0 : index
    %365 = vector.load %arg8[%c0_166, %c0_167] : memref<128x128xf32, #tpu.memory_space<vmem>>, vector<128x128xf32>
    %cst_168 = arith.constant dense<0.000000e+00> : vector<8x128xf32>
    %366 = tpu.matmul %323, %365, %cst_168 {dimension_numbers = #tpu.dot_dimension_numbers<[1], [0], [0], [1], [0, 0, 1, 1], [], []>} : vector<8x128xf32>, vector<128x128xf32>, vector<8x128xf32> -> vector<8x128xf32>
    %c0_169 = arith.constant 0 : index
    %c0_170 = arith.constant 0 : index
    %367 = vector.load %arg9[%c0_169, %c0_170] : memref<32x128xf32, #tpu.memory_space<vmem>>, vector<32x128xf32>
    %cst_171 = arith.constant dense<0.000000e+00> : vector<8x128xf32>
    %368 = tpu.matmul %284, %367, %cst_171 {dimension_numbers = #tpu.dot_dimension_numbers<[1], [0], [0], [1], [0, 0, 1, 1], [], []>} : vector<8x32xf32>, vector<32x128xf32>, vector<8x128xf32> -> vector<8x128xf32>
    %369 = arith.addf %366, %368 : vector<8x128xf32>
    %c0_172 = arith.constant 0 : index
    %c0_173 = arith.constant 0 : index
    %370 = vector.load %arg10[%c0_172, %c0_173] : memref<1x128xf32, #tpu.memory_space<vmem>>, vector<1x128xf32>
    %371 = vector.broadcast %370 : vector<1x128xf32> to vector<8x128xf32>
    %372 = arith.addf %369, %371 : vector<8x128xf32>
    %373 = vector.extract_strided_slice %372 {offsets = [0, 0], sizes = [8, 32], strides = [1, 1]} : vector<8x128xf32> to vector<8x32xf32>
    %cst_174 = arith.constant 5.000000e-01 : f32
    %374 = vector.broadcast %cst_174 : f32 to vector<8x32xf32>
    %375 = arith.mulf %373, %374 : vector<8x32xf32>
    %376 = math.tanh %375 : vector<8x32xf32>
    %cst_175 = arith.constant 5.000000e-01 : f32
    %377 = vector.broadcast %cst_175 : f32 to vector<8x32xf32>
    %378 = arith.mulf %376, %377 : vector<8x32xf32>
    %cst_176 = arith.constant 5.000000e-01 : f32
    %379 = vector.broadcast %cst_176 : f32 to vector<8x32xf32>
    %380 = arith.addf %378, %379 : vector<8x32xf32>
    %381 = vector.extract_strided_slice %372 {offsets = [0, 32], sizes = [8, 32], strides = [1, 1]} : vector<8x128xf32> to vector<8x32xf32>
    %cst_177 = arith.constant 5.000000e-01 : f32
    %382 = vector.broadcast %cst_177 : f32 to vector<8x32xf32>
    %383 = arith.mulf %381, %382 : vector<8x32xf32>
    %384 = math.tanh %383 : vector<8x32xf32>
    %cst_178 = arith.constant 5.000000e-01 : f32
    %385 = vector.broadcast %cst_178 : f32 to vector<8x32xf32>
    %386 = arith.mulf %384, %385 : vector<8x32xf32>
    %cst_179 = arith.constant 5.000000e-01 : f32
    %387 = vector.broadcast %cst_179 : f32 to vector<8x32xf32>
    %388 = arith.addf %386, %387 : vector<8x32xf32>
    %389 = vector.extract_strided_slice %372 {offsets = [0, 64], sizes = [8, 32], strides = [1, 1]} : vector<8x128xf32> to vector<8x32xf32>
    %390 = math.tanh %389 : vector<8x32xf32>
    %391 = vector.extract_strided_slice %372 {offsets = [0, 96], sizes = [8, 32], strides = [1, 1]} : vector<8x128xf32> to vector<8x32xf32>
    %cst_180 = arith.constant 5.000000e-01 : f32
    %392 = vector.broadcast %cst_180 : f32 to vector<8x32xf32>
    %393 = arith.mulf %391, %392 : vector<8x32xf32>
    %394 = math.tanh %393 : vector<8x32xf32>
    %cst_181 = arith.constant 5.000000e-01 : f32
    %395 = vector.broadcast %cst_181 : f32 to vector<8x32xf32>
    %396 = arith.mulf %394, %395 : vector<8x32xf32>
    %cst_182 = arith.constant 5.000000e-01 : f32
    %397 = vector.broadcast %cst_182 : f32 to vector<8x32xf32>
    %398 = arith.addf %396, %397 : vector<8x32xf32>
    %399 = arith.mulf %388, %282 : vector<8x32xf32>
    %400 = arith.mulf %380, %390 : vector<8x32xf32>
    %401 = arith.addf %399, %400 : vector<8x32xf32>
    %402 = math.tanh %401 : vector<8x32xf32>
    %403 = arith.mulf %398, %402 : vector<8x32xf32>
    %c0_183 = arith.constant 0 : index
    %c0_184 = arith.constant 0 : index
    %404 = vector.load %arg5[%c0_183, %c0_184] : memref<32x512xf32, #tpu.memory_space<vmem>>, vector<32x512xf32>
    %cst_185 = arith.constant dense<0.000000e+00> : vector<8x512xf32>
    %405 = tpu.matmul %364, %404, %cst_185 {dimension_numbers = #tpu.dot_dimension_numbers<[1], [0], [0], [1], [0, 0, 1, 1], [], []>} : vector<8x32xf32>, vector<32x512xf32>, vector<8x512xf32> -> vector<8x512xf32>
    %c0_186 = arith.constant 0 : index
    %c0_187 = arith.constant 0 : index
    %406 = vector.load %arg6[%c0_186, %c0_187] : memref<128x512xf32, #tpu.memory_space<vmem>>, vector<128x512xf32>
    %cst_188 = arith.constant dense<0.000000e+00> : vector<8x512xf32>
    %407 = tpu.matmul %323, %406, %cst_188 {dimension_numbers = #tpu.dot_dimension_numbers<[1], [0], [0], [1], [0, 0, 1, 1], [], []>} : vector<8x128xf32>, vector<128x512xf32>, vector<8x512xf32> -> vector<8x512xf32>
    %408 = arith.addf %405, %407 : vector<8x512xf32>
    %c0_189 = arith.constant 0 : index
    %c0_190 = arith.constant 0 : index
    %409 = vector.load %arg7[%c0_189, %c0_190] : memref<1x512xf32, #tpu.memory_space<vmem>>, vector<1x512xf32>
    %410 = vector.broadcast %409 : vector<1x512xf32> to vector<8x512xf32>
    %411 = arith.addf %408, %410 : vector<8x512xf32>
    %412 = vector.extract_strided_slice %411 {offsets = [0, 0], sizes = [8, 128], strides = [1, 1]} : vector<8x512xf32> to vector<8x128xf32>
    %cst_191 = arith.constant 5.000000e-01 : f32
    %413 = vector.broadcast %cst_191 : f32 to vector<8x128xf32>
    %414 = arith.mulf %412, %413 : vector<8x128xf32>
    %415 = math.tanh %414 : vector<8x128xf32>
    %cst_192 = arith.constant 5.000000e-01 : f32
    %416 = vector.broadcast %cst_192 : f32 to vector<8x128xf32>
    %417 = arith.mulf %415, %416 : vector<8x128xf32>
    %cst_193 = arith.constant 5.000000e-01 : f32
    %418 = vector.broadcast %cst_193 : f32 to vector<8x128xf32>
    %419 = arith.addf %417, %418 : vector<8x128xf32>
    %420 = vector.extract_strided_slice %411 {offsets = [0, 128], sizes = [8, 128], strides = [1, 1]} : vector<8x512xf32> to vector<8x128xf32>
    %cst_194 = arith.constant 5.000000e-01 : f32
    %421 = vector.broadcast %cst_194 : f32 to vector<8x128xf32>
    %422 = arith.mulf %420, %421 : vector<8x128xf32>
    %423 = math.tanh %422 : vector<8x128xf32>
    %cst_195 = arith.constant 5.000000e-01 : f32
    %424 = vector.broadcast %cst_195 : f32 to vector<8x128xf32>
    %425 = arith.mulf %423, %424 : vector<8x128xf32>
    %cst_196 = arith.constant 5.000000e-01 : f32
    %426 = vector.broadcast %cst_196 : f32 to vector<8x128xf32>
    %427 = arith.addf %425, %426 : vector<8x128xf32>
    %428 = vector.extract_strided_slice %411 {offsets = [0, 256], sizes = [8, 128], strides = [1, 1]} : vector<8x512xf32> to vector<8x128xf32>
    %429 = math.tanh %428 : vector<8x128xf32>
    %430 = vector.extract_strided_slice %411 {offsets = [0, 384], sizes = [8, 128], strides = [1, 1]} : vector<8x512xf32> to vector<8x128xf32>
    %cst_197 = arith.constant 5.000000e-01 : f32
    %431 = vector.broadcast %cst_197 : f32 to vector<8x128xf32>
    %432 = arith.mulf %430, %431 : vector<8x128xf32>
    %433 = math.tanh %432 : vector<8x128xf32>
    %cst_198 = arith.constant 5.000000e-01 : f32
    %434 = vector.broadcast %cst_198 : f32 to vector<8x128xf32>
    %435 = arith.mulf %433, %434 : vector<8x128xf32>
    %cst_199 = arith.constant 5.000000e-01 : f32
    %436 = vector.broadcast %cst_199 : f32 to vector<8x128xf32>
    %437 = arith.addf %435, %436 : vector<8x128xf32>
    %438 = arith.mulf %427, %321 : vector<8x128xf32>
    %439 = arith.mulf %419, %429 : vector<8x128xf32>
    %440 = arith.addf %438, %439 : vector<8x128xf32>
    %441 = math.tanh %440 : vector<8x128xf32>
    %442 = arith.mulf %437, %441 : vector<8x128xf32>
    %c4 = arith.constant 4 : index
    %c0_200 = arith.constant 0 : index
    %c0_201 = arith.constant 0 : index
    %443 = vector.load %arg1[%c4, %c0_200, %c0_201] : memref<8x8x16xf32, #tpu.memory_space<vmem>>, vector<1x8x16xf32>
    %444 = vector.shape_cast %443 : vector<1x8x16xf32> to vector<8x16xf32>
    %c0_202 = arith.constant 0 : index
    %c0_203 = arith.constant 0 : index
    %445 = vector.load %arg2[%c0_202, %c0_203] : memref<16x128xf32, #tpu.memory_space<vmem>>, vector<16x128xf32>
    %cst_204 = arith.constant dense<0.000000e+00> : vector<8x128xf32>
    %446 = tpu.matmul %444, %445, %cst_204 {dimension_numbers = #tpu.dot_dimension_numbers<[1], [0], [0], [1], [0, 0, 1, 1], [], []>} : vector<8x16xf32>, vector<16x128xf32>, vector<8x128xf32> -> vector<8x128xf32>
    %c0_205 = arith.constant 0 : index
    %c0_206 = arith.constant 0 : index
    %447 = vector.load %arg3[%c0_205, %c0_206] : memref<32x128xf32, #tpu.memory_space<vmem>>, vector<32x128xf32>
    %cst_207 = arith.constant dense<0.000000e+00> : vector<8x128xf32>
    %448 = tpu.matmul %364, %447, %cst_207 {dimension_numbers = #tpu.dot_dimension_numbers<[1], [0], [0], [1], [0, 0, 1, 1], [], []>} : vector<8x32xf32>, vector<32x128xf32>, vector<8x128xf32> -> vector<8x128xf32>
    %449 = arith.addf %446, %448 : vector<8x128xf32>
    %c0_208 = arith.constant 0 : index
    %c0_209 = arith.constant 0 : index
    %450 = vector.load %arg4[%c0_208, %c0_209] : memref<1x128xf32, #tpu.memory_space<vmem>>, vector<1x128xf32>
    %451 = vector.broadcast %450 : vector<1x128xf32> to vector<8x128xf32>
    %452 = arith.addf %449, %451 : vector<8x128xf32>
    %453 = vector.extract_strided_slice %452 {offsets = [0, 0], sizes = [8, 32], strides = [1, 1]} : vector<8x128xf32> to vector<8x32xf32>
    %cst_210 = arith.constant 5.000000e-01 : f32
    %454 = vector.broadcast %cst_210 : f32 to vector<8x32xf32>
    %455 = arith.mulf %453, %454 : vector<8x32xf32>
    %456 = math.tanh %455 : vector<8x32xf32>
    %cst_211 = arith.constant 5.000000e-01 : f32
    %457 = vector.broadcast %cst_211 : f32 to vector<8x32xf32>
    %458 = arith.mulf %456, %457 : vector<8x32xf32>
    %cst_212 = arith.constant 5.000000e-01 : f32
    %459 = vector.broadcast %cst_212 : f32 to vector<8x32xf32>
    %460 = arith.addf %458, %459 : vector<8x32xf32>
    %461 = vector.extract_strided_slice %452 {offsets = [0, 32], sizes = [8, 32], strides = [1, 1]} : vector<8x128xf32> to vector<8x32xf32>
    %cst_213 = arith.constant 5.000000e-01 : f32
    %462 = vector.broadcast %cst_213 : f32 to vector<8x32xf32>
    %463 = arith.mulf %461, %462 : vector<8x32xf32>
    %464 = math.tanh %463 : vector<8x32xf32>
    %cst_214 = arith.constant 5.000000e-01 : f32
    %465 = vector.broadcast %cst_214 : f32 to vector<8x32xf32>
    %466 = arith.mulf %464, %465 : vector<8x32xf32>
    %cst_215 = arith.constant 5.000000e-01 : f32
    %467 = vector.broadcast %cst_215 : f32 to vector<8x32xf32>
    %468 = arith.addf %466, %467 : vector<8x32xf32>
    %469 = vector.extract_strided_slice %452 {offsets = [0, 64], sizes = [8, 32], strides = [1, 1]} : vector<8x128xf32> to vector<8x32xf32>
    %470 = math.tanh %469 : vector<8x32xf32>
    %471 = vector.extract_strided_slice %452 {offsets = [0, 96], sizes = [8, 32], strides = [1, 1]} : vector<8x128xf32> to vector<8x32xf32>
    %cst_216 = arith.constant 5.000000e-01 : f32
    %472 = vector.broadcast %cst_216 : f32 to vector<8x32xf32>
    %473 = arith.mulf %471, %472 : vector<8x32xf32>
    %474 = math.tanh %473 : vector<8x32xf32>
    %cst_217 = arith.constant 5.000000e-01 : f32
    %475 = vector.broadcast %cst_217 : f32 to vector<8x32xf32>
    %476 = arith.mulf %474, %475 : vector<8x32xf32>
    %cst_218 = arith.constant 5.000000e-01 : f32
    %477 = vector.broadcast %cst_218 : f32 to vector<8x32xf32>
    %478 = arith.addf %476, %477 : vector<8x32xf32>
    %479 = arith.mulf %468, %362 : vector<8x32xf32>
    %480 = arith.mulf %460, %470 : vector<8x32xf32>
    %481 = arith.addf %479, %480 : vector<8x32xf32>
    %482 = math.tanh %481 : vector<8x32xf32>
    %483 = arith.mulf %478, %482 : vector<8x32xf32>
    %c0_219 = arith.constant 0 : index
    %c0_220 = arith.constant 0 : index
    %484 = vector.load %arg8[%c0_219, %c0_220] : memref<128x128xf32, #tpu.memory_space<vmem>>, vector<128x128xf32>
    %cst_221 = arith.constant dense<0.000000e+00> : vector<8x128xf32>
    %485 = tpu.matmul %442, %484, %cst_221 {dimension_numbers = #tpu.dot_dimension_numbers<[1], [0], [0], [1], [0, 0, 1, 1], [], []>} : vector<8x128xf32>, vector<128x128xf32>, vector<8x128xf32> -> vector<8x128xf32>
    %c0_222 = arith.constant 0 : index
    %c0_223 = arith.constant 0 : index
    %486 = vector.load %arg9[%c0_222, %c0_223] : memref<32x128xf32, #tpu.memory_space<vmem>>, vector<32x128xf32>
    %cst_224 = arith.constant dense<0.000000e+00> : vector<8x128xf32>
    %487 = tpu.matmul %403, %486, %cst_224 {dimension_numbers = #tpu.dot_dimension_numbers<[1], [0], [0], [1], [0, 0, 1, 1], [], []>} : vector<8x32xf32>, vector<32x128xf32>, vector<8x128xf32> -> vector<8x128xf32>
    %488 = arith.addf %485, %487 : vector<8x128xf32>
    %c0_225 = arith.constant 0 : index
    %c0_226 = arith.constant 0 : index
    %489 = vector.load %arg10[%c0_225, %c0_226] : memref<1x128xf32, #tpu.memory_space<vmem>>, vector<1x128xf32>
    %490 = vector.broadcast %489 : vector<1x128xf32> to vector<8x128xf32>
    %491 = arith.addf %488, %490 : vector<8x128xf32>
    %492 = vector.extract_strided_slice %491 {offsets = [0, 0], sizes = [8, 32], strides = [1, 1]} : vector<8x128xf32> to vector<8x32xf32>
    %cst_227 = arith.constant 5.000000e-01 : f32
    %493 = vector.broadcast %cst_227 : f32 to vector<8x32xf32>
    %494 = arith.mulf %492, %493 : vector<8x32xf32>
    %495 = math.tanh %494 : vector<8x32xf32>
    %cst_228 = arith.constant 5.000000e-01 : f32
    %496 = vector.broadcast %cst_228 : f32 to vector<8x32xf32>
    %497 = arith.mulf %495, %496 : vector<8x32xf32>
    %cst_229 = arith.constant 5.000000e-01 : f32
    %498 = vector.broadcast %cst_229 : f32 to vector<8x32xf32>
    %499 = arith.addf %497, %498 : vector<8x32xf32>
    %500 = vector.extract_strided_slice %491 {offsets = [0, 32], sizes = [8, 32], strides = [1, 1]} : vector<8x128xf32> to vector<8x32xf32>
    %cst_230 = arith.constant 5.000000e-01 : f32
    %501 = vector.broadcast %cst_230 : f32 to vector<8x32xf32>
    %502 = arith.mulf %500, %501 : vector<8x32xf32>
    %503 = math.tanh %502 : vector<8x32xf32>
    %cst_231 = arith.constant 5.000000e-01 : f32
    %504 = vector.broadcast %cst_231 : f32 to vector<8x32xf32>
    %505 = arith.mulf %503, %504 : vector<8x32xf32>
    %cst_232 = arith.constant 5.000000e-01 : f32
    %506 = vector.broadcast %cst_232 : f32 to vector<8x32xf32>
    %507 = arith.addf %505, %506 : vector<8x32xf32>
    %508 = vector.extract_strided_slice %491 {offsets = [0, 64], sizes = [8, 32], strides = [1, 1]} : vector<8x128xf32> to vector<8x32xf32>
    %509 = math.tanh %508 : vector<8x32xf32>
    %510 = vector.extract_strided_slice %491 {offsets = [0, 96], sizes = [8, 32], strides = [1, 1]} : vector<8x128xf32> to vector<8x32xf32>
    %cst_233 = arith.constant 5.000000e-01 : f32
    %511 = vector.broadcast %cst_233 : f32 to vector<8x32xf32>
    %512 = arith.mulf %510, %511 : vector<8x32xf32>
    %513 = math.tanh %512 : vector<8x32xf32>
    %cst_234 = arith.constant 5.000000e-01 : f32
    %514 = vector.broadcast %cst_234 : f32 to vector<8x32xf32>
    %515 = arith.mulf %513, %514 : vector<8x32xf32>
    %cst_235 = arith.constant 5.000000e-01 : f32
    %516 = vector.broadcast %cst_235 : f32 to vector<8x32xf32>
    %517 = arith.addf %515, %516 : vector<8x32xf32>
    %518 = arith.mulf %507, %401 : vector<8x32xf32>
    %519 = arith.mulf %499, %509 : vector<8x32xf32>
    %520 = arith.addf %518, %519 : vector<8x32xf32>
    %521 = math.tanh %520 : vector<8x32xf32>
    %522 = arith.mulf %517, %521 : vector<8x32xf32>
    %c0_236 = arith.constant 0 : index
    %c0_237 = arith.constant 0 : index
    %523 = vector.load %arg5[%c0_236, %c0_237] : memref<32x512xf32, #tpu.memory_space<vmem>>, vector<32x512xf32>
    %cst_238 = arith.constant dense<0.000000e+00> : vector<8x512xf32>
    %524 = tpu.matmul %483, %523, %cst_238 {dimension_numbers = #tpu.dot_dimension_numbers<[1], [0], [0], [1], [0, 0, 1, 1], [], []>} : vector<8x32xf32>, vector<32x512xf32>, vector<8x512xf32> -> vector<8x512xf32>
    %c0_239 = arith.constant 0 : index
    %c0_240 = arith.constant 0 : index
    %525 = vector.load %arg6[%c0_239, %c0_240] : memref<128x512xf32, #tpu.memory_space<vmem>>, vector<128x512xf32>
    %cst_241 = arith.constant dense<0.000000e+00> : vector<8x512xf32>
    %526 = tpu.matmul %442, %525, %cst_241 {dimension_numbers = #tpu.dot_dimension_numbers<[1], [0], [0], [1], [0, 0, 1, 1], [], []>} : vector<8x128xf32>, vector<128x512xf32>, vector<8x512xf32> -> vector<8x512xf32>
    %527 = arith.addf %524, %526 : vector<8x512xf32>
    %c0_242 = arith.constant 0 : index
    %c0_243 = arith.constant 0 : index
    %528 = vector.load %arg7[%c0_242, %c0_243] : memref<1x512xf32, #tpu.memory_space<vmem>>, vector<1x512xf32>
    %529 = vector.broadcast %528 : vector<1x512xf32> to vector<8x512xf32>
    %530 = arith.addf %527, %529 : vector<8x512xf32>
    %531 = vector.extract_strided_slice %530 {offsets = [0, 0], sizes = [8, 128], strides = [1, 1]} : vector<8x512xf32> to vector<8x128xf32>
    %cst_244 = arith.constant 5.000000e-01 : f32
    %532 = vector.broadcast %cst_244 : f32 to vector<8x128xf32>
    %533 = arith.mulf %531, %532 : vector<8x128xf32>
    %534 = math.tanh %533 : vector<8x128xf32>
    %cst_245 = arith.constant 5.000000e-01 : f32
    %535 = vector.broadcast %cst_245 : f32 to vector<8x128xf32>
    %536 = arith.mulf %534, %535 : vector<8x128xf32>
    %cst_246 = arith.constant 5.000000e-01 : f32
    %537 = vector.broadcast %cst_246 : f32 to vector<8x128xf32>
    %538 = arith.addf %536, %537 : vector<8x128xf32>
    %539 = vector.extract_strided_slice %530 {offsets = [0, 128], sizes = [8, 128], strides = [1, 1]} : vector<8x512xf32> to vector<8x128xf32>
    %cst_247 = arith.constant 5.000000e-01 : f32
    %540 = vector.broadcast %cst_247 : f32 to vector<8x128xf32>
    %541 = arith.mulf %539, %540 : vector<8x128xf32>
    %542 = math.tanh %541 : vector<8x128xf32>
    %cst_248 = arith.constant 5.000000e-01 : f32
    %543 = vector.broadcast %cst_248 : f32 to vector<8x128xf32>
    %544 = arith.mulf %542, %543 : vector<8x128xf32>
    %cst_249 = arith.constant 5.000000e-01 : f32
    %545 = vector.broadcast %cst_249 : f32 to vector<8x128xf32>
    %546 = arith.addf %544, %545 : vector<8x128xf32>
    %547 = vector.extract_strided_slice %530 {offsets = [0, 256], sizes = [8, 128], strides = [1, 1]} : vector<8x512xf32> to vector<8x128xf32>
    %548 = math.tanh %547 : vector<8x128xf32>
    %549 = vector.extract_strided_slice %530 {offsets = [0, 384], sizes = [8, 128], strides = [1, 1]} : vector<8x512xf32> to vector<8x128xf32>
    %cst_250 = arith.constant 5.000000e-01 : f32
    %550 = vector.broadcast %cst_250 : f32 to vector<8x128xf32>
    %551 = arith.mulf %549, %550 : vector<8x128xf32>
    %552 = math.tanh %551 : vector<8x128xf32>
    %cst_251 = arith.constant 5.000000e-01 : f32
    %553 = vector.broadcast %cst_251 : f32 to vector<8x128xf32>
    %554 = arith.mulf %552, %553 : vector<8x128xf32>
    %cst_252 = arith.constant 5.000000e-01 : f32
    %555 = vector.broadcast %cst_252 : f32 to vector<8x128xf32>
    %556 = arith.addf %554, %555 : vector<8x128xf32>
    %557 = arith.mulf %546, %440 : vector<8x128xf32>
    %558 = arith.mulf %538, %548 : vector<8x128xf32>
    %559 = arith.addf %557, %558 : vector<8x128xf32>
    %560 = math.tanh %559 : vector<8x128xf32>
    %561 = arith.mulf %556, %560 : vector<8x128xf32>
    %c5 = arith.constant 5 : index
    %c0_253 = arith.constant 0 : index
    %c0_254 = arith.constant 0 : index
    %562 = vector.load %arg1[%c5, %c0_253, %c0_254] : memref<8x8x16xf32, #tpu.memory_space<vmem>>, vector<1x8x16xf32>
    %563 = vector.shape_cast %562 : vector<1x8x16xf32> to vector<8x16xf32>
    %c0_255 = arith.constant 0 : index
    %c0_256 = arith.constant 0 : index
    %564 = vector.load %arg2[%c0_255, %c0_256] : memref<16x128xf32, #tpu.memory_space<vmem>>, vector<16x128xf32>
    %cst_257 = arith.constant dense<0.000000e+00> : vector<8x128xf32>
    %565 = tpu.matmul %563, %564, %cst_257 {dimension_numbers = #tpu.dot_dimension_numbers<[1], [0], [0], [1], [0, 0, 1, 1], [], []>} : vector<8x16xf32>, vector<16x128xf32>, vector<8x128xf32> -> vector<8x128xf32>
    %c0_258 = arith.constant 0 : index
    %c0_259 = arith.constant 0 : index
    %566 = vector.load %arg3[%c0_258, %c0_259] : memref<32x128xf32, #tpu.memory_space<vmem>>, vector<32x128xf32>
    %cst_260 = arith.constant dense<0.000000e+00> : vector<8x128xf32>
    %567 = tpu.matmul %483, %566, %cst_260 {dimension_numbers = #tpu.dot_dimension_numbers<[1], [0], [0], [1], [0, 0, 1, 1], [], []>} : vector<8x32xf32>, vector<32x128xf32>, vector<8x128xf32> -> vector<8x128xf32>
    %568 = arith.addf %565, %567 : vector<8x128xf32>
    %c0_261 = arith.constant 0 : index
    %c0_262 = arith.constant 0 : index
    %569 = vector.load %arg4[%c0_261, %c0_262] : memref<1x128xf32, #tpu.memory_space<vmem>>, vector<1x128xf32>
    %570 = vector.broadcast %569 : vector<1x128xf32> to vector<8x128xf32>
    %571 = arith.addf %568, %570 : vector<8x128xf32>
    %572 = vector.extract_strided_slice %571 {offsets = [0, 0], sizes = [8, 32], strides = [1, 1]} : vector<8x128xf32> to vector<8x32xf32>
    %cst_263 = arith.constant 5.000000e-01 : f32
    %573 = vector.broadcast %cst_263 : f32 to vector<8x32xf32>
    %574 = arith.mulf %572, %573 : vector<8x32xf32>
    %575 = math.tanh %574 : vector<8x32xf32>
    %cst_264 = arith.constant 5.000000e-01 : f32
    %576 = vector.broadcast %cst_264 : f32 to vector<8x32xf32>
    %577 = arith.mulf %575, %576 : vector<8x32xf32>
    %cst_265 = arith.constant 5.000000e-01 : f32
    %578 = vector.broadcast %cst_265 : f32 to vector<8x32xf32>
    %579 = arith.addf %577, %578 : vector<8x32xf32>
    %580 = vector.extract_strided_slice %571 {offsets = [0, 32], sizes = [8, 32], strides = [1, 1]} : vector<8x128xf32> to vector<8x32xf32>
    %cst_266 = arith.constant 5.000000e-01 : f32
    %581 = vector.broadcast %cst_266 : f32 to vector<8x32xf32>
    %582 = arith.mulf %580, %581 : vector<8x32xf32>
    %583 = math.tanh %582 : vector<8x32xf32>
    %cst_267 = arith.constant 5.000000e-01 : f32
    %584 = vector.broadcast %cst_267 : f32 to vector<8x32xf32>
    %585 = arith.mulf %583, %584 : vector<8x32xf32>
    %cst_268 = arith.constant 5.000000e-01 : f32
    %586 = vector.broadcast %cst_268 : f32 to vector<8x32xf32>
    %587 = arith.addf %585, %586 : vector<8x32xf32>
    %588 = vector.extract_strided_slice %571 {offsets = [0, 64], sizes = [8, 32], strides = [1, 1]} : vector<8x128xf32> to vector<8x32xf32>
    %589 = math.tanh %588 : vector<8x32xf32>
    %590 = vector.extract_strided_slice %571 {offsets = [0, 96], sizes = [8, 32], strides = [1, 1]} : vector<8x128xf32> to vector<8x32xf32>
    %cst_269 = arith.constant 5.000000e-01 : f32
    %591 = vector.broadcast %cst_269 : f32 to vector<8x32xf32>
    %592 = arith.mulf %590, %591 : vector<8x32xf32>
    %593 = math.tanh %592 : vector<8x32xf32>
    %cst_270 = arith.constant 5.000000e-01 : f32
    %594 = vector.broadcast %cst_270 : f32 to vector<8x32xf32>
    %595 = arith.mulf %593, %594 : vector<8x32xf32>
    %cst_271 = arith.constant 5.000000e-01 : f32
    %596 = vector.broadcast %cst_271 : f32 to vector<8x32xf32>
    %597 = arith.addf %595, %596 : vector<8x32xf32>
    %598 = arith.mulf %587, %481 : vector<8x32xf32>
    %599 = arith.mulf %579, %589 : vector<8x32xf32>
    %600 = arith.addf %598, %599 : vector<8x32xf32>
    %601 = math.tanh %600 : vector<8x32xf32>
    %602 = arith.mulf %597, %601 : vector<8x32xf32>
    %c0_272 = arith.constant 0 : index
    %c0_273 = arith.constant 0 : index
    %603 = vector.load %arg8[%c0_272, %c0_273] : memref<128x128xf32, #tpu.memory_space<vmem>>, vector<128x128xf32>
    %cst_274 = arith.constant dense<0.000000e+00> : vector<8x128xf32>
    %604 = tpu.matmul %561, %603, %cst_274 {dimension_numbers = #tpu.dot_dimension_numbers<[1], [0], [0], [1], [0, 0, 1, 1], [], []>} : vector<8x128xf32>, vector<128x128xf32>, vector<8x128xf32> -> vector<8x128xf32>
    %c0_275 = arith.constant 0 : index
    %c0_276 = arith.constant 0 : index
    %605 = vector.load %arg9[%c0_275, %c0_276] : memref<32x128xf32, #tpu.memory_space<vmem>>, vector<32x128xf32>
    %cst_277 = arith.constant dense<0.000000e+00> : vector<8x128xf32>
    %606 = tpu.matmul %522, %605, %cst_277 {dimension_numbers = #tpu.dot_dimension_numbers<[1], [0], [0], [1], [0, 0, 1, 1], [], []>} : vector<8x32xf32>, vector<32x128xf32>, vector<8x128xf32> -> vector<8x128xf32>
    %607 = arith.addf %604, %606 : vector<8x128xf32>
    %c0_278 = arith.constant 0 : index
    %c0_279 = arith.constant 0 : index
    %608 = vector.load %arg10[%c0_278, %c0_279] : memref<1x128xf32, #tpu.memory_space<vmem>>, vector<1x128xf32>
    %609 = vector.broadcast %608 : vector<1x128xf32> to vector<8x128xf32>
    %610 = arith.addf %607, %609 : vector<8x128xf32>
    %611 = vector.extract_strided_slice %610 {offsets = [0, 0], sizes = [8, 32], strides = [1, 1]} : vector<8x128xf32> to vector<8x32xf32>
    %cst_280 = arith.constant 5.000000e-01 : f32
    %612 = vector.broadcast %cst_280 : f32 to vector<8x32xf32>
    %613 = arith.mulf %611, %612 : vector<8x32xf32>
    %614 = math.tanh %613 : vector<8x32xf32>
    %cst_281 = arith.constant 5.000000e-01 : f32
    %615 = vector.broadcast %cst_281 : f32 to vector<8x32xf32>
    %616 = arith.mulf %614, %615 : vector<8x32xf32>
    %cst_282 = arith.constant 5.000000e-01 : f32
    %617 = vector.broadcast %cst_282 : f32 to vector<8x32xf32>
    %618 = arith.addf %616, %617 : vector<8x32xf32>
    %619 = vector.extract_strided_slice %610 {offsets = [0, 32], sizes = [8, 32], strides = [1, 1]} : vector<8x128xf32> to vector<8x32xf32>
    %cst_283 = arith.constant 5.000000e-01 : f32
    %620 = vector.broadcast %cst_283 : f32 to vector<8x32xf32>
    %621 = arith.mulf %619, %620 : vector<8x32xf32>
    %622 = math.tanh %621 : vector<8x32xf32>
    %cst_284 = arith.constant 5.000000e-01 : f32
    %623 = vector.broadcast %cst_284 : f32 to vector<8x32xf32>
    %624 = arith.mulf %622, %623 : vector<8x32xf32>
    %cst_285 = arith.constant 5.000000e-01 : f32
    %625 = vector.broadcast %cst_285 : f32 to vector<8x32xf32>
    %626 = arith.addf %624, %625 : vector<8x32xf32>
    %627 = vector.extract_strided_slice %610 {offsets = [0, 64], sizes = [8, 32], strides = [1, 1]} : vector<8x128xf32> to vector<8x32xf32>
    %628 = math.tanh %627 : vector<8x32xf32>
    %629 = vector.extract_strided_slice %610 {offsets = [0, 96], sizes = [8, 32], strides = [1, 1]} : vector<8x128xf32> to vector<8x32xf32>
    %cst_286 = arith.constant 5.000000e-01 : f32
    %630 = vector.broadcast %cst_286 : f32 to vector<8x32xf32>
    %631 = arith.mulf %629, %630 : vector<8x32xf32>
    %632 = math.tanh %631 : vector<8x32xf32>
    %cst_287 = arith.constant 5.000000e-01 : f32
    %633 = vector.broadcast %cst_287 : f32 to vector<8x32xf32>
    %634 = arith.mulf %632, %633 : vector<8x32xf32>
    %cst_288 = arith.constant 5.000000e-01 : f32
    %635 = vector.broadcast %cst_288 : f32 to vector<8x32xf32>
    %636 = arith.addf %634, %635 : vector<8x32xf32>
    %637 = arith.mulf %626, %520 : vector<8x32xf32>
    %638 = arith.mulf %618, %628 : vector<8x32xf32>
    %639 = arith.addf %637, %638 : vector<8x32xf32>
    %640 = math.tanh %639 : vector<8x32xf32>
    %641 = arith.mulf %636, %640 : vector<8x32xf32>
    %c0_289 = arith.constant 0 : index
    %c0_290 = arith.constant 0 : index
    %642 = vector.load %arg5[%c0_289, %c0_290] : memref<32x512xf32, #tpu.memory_space<vmem>>, vector<32x512xf32>
    %cst_291 = arith.constant dense<0.000000e+00> : vector<8x512xf32>
    %643 = tpu.matmul %602, %642, %cst_291 {dimension_numbers = #tpu.dot_dimension_numbers<[1], [0], [0], [1], [0, 0, 1, 1], [], []>} : vector<8x32xf32>, vector<32x512xf32>, vector<8x512xf32> -> vector<8x512xf32>
    %c0_292 = arith.constant 0 : index
    %c0_293 = arith.constant 0 : index
    %644 = vector.load %arg6[%c0_292, %c0_293] : memref<128x512xf32, #tpu.memory_space<vmem>>, vector<128x512xf32>
    %cst_294 = arith.constant dense<0.000000e+00> : vector<8x512xf32>
    %645 = tpu.matmul %561, %644, %cst_294 {dimension_numbers = #tpu.dot_dimension_numbers<[1], [0], [0], [1], [0, 0, 1, 1], [], []>} : vector<8x128xf32>, vector<128x512xf32>, vector<8x512xf32> -> vector<8x512xf32>
    %646 = arith.addf %643, %645 : vector<8x512xf32>
    %c0_295 = arith.constant 0 : index
    %c0_296 = arith.constant 0 : index
    %647 = vector.load %arg7[%c0_295, %c0_296] : memref<1x512xf32, #tpu.memory_space<vmem>>, vector<1x512xf32>
    %648 = vector.broadcast %647 : vector<1x512xf32> to vector<8x512xf32>
    %649 = arith.addf %646, %648 : vector<8x512xf32>
    %650 = vector.extract_strided_slice %649 {offsets = [0, 0], sizes = [8, 128], strides = [1, 1]} : vector<8x512xf32> to vector<8x128xf32>
    %cst_297 = arith.constant 5.000000e-01 : f32
    %651 = vector.broadcast %cst_297 : f32 to vector<8x128xf32>
    %652 = arith.mulf %650, %651 : vector<8x128xf32>
    %653 = math.tanh %652 : vector<8x128xf32>
    %cst_298 = arith.constant 5.000000e-01 : f32
    %654 = vector.broadcast %cst_298 : f32 to vector<8x128xf32>
    %655 = arith.mulf %653, %654 : vector<8x128xf32>
    %cst_299 = arith.constant 5.000000e-01 : f32
    %656 = vector.broadcast %cst_299 : f32 to vector<8x128xf32>
    %657 = arith.addf %655, %656 : vector<8x128xf32>
    %658 = vector.extract_strided_slice %649 {offsets = [0, 128], sizes = [8, 128], strides = [1, 1]} : vector<8x512xf32> to vector<8x128xf32>
    %cst_300 = arith.constant 5.000000e-01 : f32
    %659 = vector.broadcast %cst_300 : f32 to vector<8x128xf32>
    %660 = arith.mulf %658, %659 : vector<8x128xf32>
    %661 = math.tanh %660 : vector<8x128xf32>
    %cst_301 = arith.constant 5.000000e-01 : f32
    %662 = vector.broadcast %cst_301 : f32 to vector<8x128xf32>
    %663 = arith.mulf %661, %662 : vector<8x128xf32>
    %cst_302 = arith.constant 5.000000e-01 : f32
    %664 = vector.broadcast %cst_302 : f32 to vector<8x128xf32>
    %665 = arith.addf %663, %664 : vector<8x128xf32>
    %666 = vector.extract_strided_slice %649 {offsets = [0, 256], sizes = [8, 128], strides = [1, 1]} : vector<8x512xf32> to vector<8x128xf32>
    %667 = math.tanh %666 : vector<8x128xf32>
    %668 = vector.extract_strided_slice %649 {offsets = [0, 384], sizes = [8, 128], strides = [1, 1]} : vector<8x512xf32> to vector<8x128xf32>
    %cst_303 = arith.constant 5.000000e-01 : f32
    %669 = vector.broadcast %cst_303 : f32 to vector<8x128xf32>
    %670 = arith.mulf %668, %669 : vector<8x128xf32>
    %671 = math.tanh %670 : vector<8x128xf32>
    %cst_304 = arith.constant 5.000000e-01 : f32
    %672 = vector.broadcast %cst_304 : f32 to vector<8x128xf32>
    %673 = arith.mulf %671, %672 : vector<8x128xf32>
    %cst_305 = arith.constant 5.000000e-01 : f32
    %674 = vector.broadcast %cst_305 : f32 to vector<8x128xf32>
    %675 = arith.addf %673, %674 : vector<8x128xf32>
    %676 = arith.mulf %665, %559 : vector<8x128xf32>
    %677 = arith.mulf %657, %667 : vector<8x128xf32>
    %678 = arith.addf %676, %677 : vector<8x128xf32>
    %679 = math.tanh %678 : vector<8x128xf32>
    %680 = arith.mulf %675, %679 : vector<8x128xf32>
    %c6 = arith.constant 6 : index
    %c0_306 = arith.constant 0 : index
    %c0_307 = arith.constant 0 : index
    %681 = vector.load %arg1[%c6, %c0_306, %c0_307] : memref<8x8x16xf32, #tpu.memory_space<vmem>>, vector<1x8x16xf32>
    %682 = vector.shape_cast %681 : vector<1x8x16xf32> to vector<8x16xf32>
    %c0_308 = arith.constant 0 : index
    %c0_309 = arith.constant 0 : index
    %683 = vector.load %arg2[%c0_308, %c0_309] : memref<16x128xf32, #tpu.memory_space<vmem>>, vector<16x128xf32>
    %cst_310 = arith.constant dense<0.000000e+00> : vector<8x128xf32>
    %684 = tpu.matmul %682, %683, %cst_310 {dimension_numbers = #tpu.dot_dimension_numbers<[1], [0], [0], [1], [0, 0, 1, 1], [], []>} : vector<8x16xf32>, vector<16x128xf32>, vector<8x128xf32> -> vector<8x128xf32>
    %c0_311 = arith.constant 0 : index
    %c0_312 = arith.constant 0 : index
    %685 = vector.load %arg3[%c0_311, %c0_312] : memref<32x128xf32, #tpu.memory_space<vmem>>, vector<32x128xf32>
    %cst_313 = arith.constant dense<0.000000e+00> : vector<8x128xf32>
    %686 = tpu.matmul %602, %685, %cst_313 {dimension_numbers = #tpu.dot_dimension_numbers<[1], [0], [0], [1], [0, 0, 1, 1], [], []>} : vector<8x32xf32>, vector<32x128xf32>, vector<8x128xf32> -> vector<8x128xf32>
    %687 = arith.addf %684, %686 : vector<8x128xf32>
    %c0_314 = arith.constant 0 : index
    %c0_315 = arith.constant 0 : index
    %688 = vector.load %arg4[%c0_314, %c0_315] : memref<1x128xf32, #tpu.memory_space<vmem>>, vector<1x128xf32>
    %689 = vector.broadcast %688 : vector<1x128xf32> to vector<8x128xf32>
    %690 = arith.addf %687, %689 : vector<8x128xf32>
    %691 = vector.extract_strided_slice %690 {offsets = [0, 0], sizes = [8, 32], strides = [1, 1]} : vector<8x128xf32> to vector<8x32xf32>
    %cst_316 = arith.constant 5.000000e-01 : f32
    %692 = vector.broadcast %cst_316 : f32 to vector<8x32xf32>
    %693 = arith.mulf %691, %692 : vector<8x32xf32>
    %694 = math.tanh %693 : vector<8x32xf32>
    %cst_317 = arith.constant 5.000000e-01 : f32
    %695 = vector.broadcast %cst_317 : f32 to vector<8x32xf32>
    %696 = arith.mulf %694, %695 : vector<8x32xf32>
    %cst_318 = arith.constant 5.000000e-01 : f32
    %697 = vector.broadcast %cst_318 : f32 to vector<8x32xf32>
    %698 = arith.addf %696, %697 : vector<8x32xf32>
    %699 = vector.extract_strided_slice %690 {offsets = [0, 32], sizes = [8, 32], strides = [1, 1]} : vector<8x128xf32> to vector<8x32xf32>
    %cst_319 = arith.constant 5.000000e-01 : f32
    %700 = vector.broadcast %cst_319 : f32 to vector<8x32xf32>
    %701 = arith.mulf %699, %700 : vector<8x32xf32>
    %702 = math.tanh %701 : vector<8x32xf32>
    %cst_320 = arith.constant 5.000000e-01 : f32
    %703 = vector.broadcast %cst_320 : f32 to vector<8x32xf32>
    %704 = arith.mulf %702, %703 : vector<8x32xf32>
    %cst_321 = arith.constant 5.000000e-01 : f32
    %705 = vector.broadcast %cst_321 : f32 to vector<8x32xf32>
    %706 = arith.addf %704, %705 : vector<8x32xf32>
    %707 = vector.extract_strided_slice %690 {offsets = [0, 64], sizes = [8, 32], strides = [1, 1]} : vector<8x128xf32> to vector<8x32xf32>
    %708 = math.tanh %707 : vector<8x32xf32>
    %709 = vector.extract_strided_slice %690 {offsets = [0, 96], sizes = [8, 32], strides = [1, 1]} : vector<8x128xf32> to vector<8x32xf32>
    %cst_322 = arith.constant 5.000000e-01 : f32
    %710 = vector.broadcast %cst_322 : f32 to vector<8x32xf32>
    %711 = arith.mulf %709, %710 : vector<8x32xf32>
    %712 = math.tanh %711 : vector<8x32xf32>
    %cst_323 = arith.constant 5.000000e-01 : f32
    %713 = vector.broadcast %cst_323 : f32 to vector<8x32xf32>
    %714 = arith.mulf %712, %713 : vector<8x32xf32>
    %cst_324 = arith.constant 5.000000e-01 : f32
    %715 = vector.broadcast %cst_324 : f32 to vector<8x32xf32>
    %716 = arith.addf %714, %715 : vector<8x32xf32>
    %717 = arith.mulf %706, %600 : vector<8x32xf32>
    %718 = arith.mulf %698, %708 : vector<8x32xf32>
    %719 = arith.addf %717, %718 : vector<8x32xf32>
    %720 = math.tanh %719 : vector<8x32xf32>
    %721 = arith.mulf %716, %720 : vector<8x32xf32>
    %c0_325 = arith.constant 0 : index
    %c0_326 = arith.constant 0 : index
    %722 = vector.load %arg8[%c0_325, %c0_326] : memref<128x128xf32, #tpu.memory_space<vmem>>, vector<128x128xf32>
    %cst_327 = arith.constant dense<0.000000e+00> : vector<8x128xf32>
    %723 = tpu.matmul %680, %722, %cst_327 {dimension_numbers = #tpu.dot_dimension_numbers<[1], [0], [0], [1], [0, 0, 1, 1], [], []>} : vector<8x128xf32>, vector<128x128xf32>, vector<8x128xf32> -> vector<8x128xf32>
    %c0_328 = arith.constant 0 : index
    %c0_329 = arith.constant 0 : index
    %724 = vector.load %arg9[%c0_328, %c0_329] : memref<32x128xf32, #tpu.memory_space<vmem>>, vector<32x128xf32>
    %cst_330 = arith.constant dense<0.000000e+00> : vector<8x128xf32>
    %725 = tpu.matmul %641, %724, %cst_330 {dimension_numbers = #tpu.dot_dimension_numbers<[1], [0], [0], [1], [0, 0, 1, 1], [], []>} : vector<8x32xf32>, vector<32x128xf32>, vector<8x128xf32> -> vector<8x128xf32>
    %726 = arith.addf %723, %725 : vector<8x128xf32>
    %c0_331 = arith.constant 0 : index
    %c0_332 = arith.constant 0 : index
    %727 = vector.load %arg10[%c0_331, %c0_332] : memref<1x128xf32, #tpu.memory_space<vmem>>, vector<1x128xf32>
    %728 = vector.broadcast %727 : vector<1x128xf32> to vector<8x128xf32>
    %729 = arith.addf %726, %728 : vector<8x128xf32>
    %730 = vector.extract_strided_slice %729 {offsets = [0, 0], sizes = [8, 32], strides = [1, 1]} : vector<8x128xf32> to vector<8x32xf32>
    %cst_333 = arith.constant 5.000000e-01 : f32
    %731 = vector.broadcast %cst_333 : f32 to vector<8x32xf32>
    %732 = arith.mulf %730, %731 : vector<8x32xf32>
    %733 = math.tanh %732 : vector<8x32xf32>
    %cst_334 = arith.constant 5.000000e-01 : f32
    %734 = vector.broadcast %cst_334 : f32 to vector<8x32xf32>
    %735 = arith.mulf %733, %734 : vector<8x32xf32>
    %cst_335 = arith.constant 5.000000e-01 : f32
    %736 = vector.broadcast %cst_335 : f32 to vector<8x32xf32>
    %737 = arith.addf %735, %736 : vector<8x32xf32>
    %738 = vector.extract_strided_slice %729 {offsets = [0, 32], sizes = [8, 32], strides = [1, 1]} : vector<8x128xf32> to vector<8x32xf32>
    %cst_336 = arith.constant 5.000000e-01 : f32
    %739 = vector.broadcast %cst_336 : f32 to vector<8x32xf32>
    %740 = arith.mulf %738, %739 : vector<8x32xf32>
    %741 = math.tanh %740 : vector<8x32xf32>
    %cst_337 = arith.constant 5.000000e-01 : f32
    %742 = vector.broadcast %cst_337 : f32 to vector<8x32xf32>
    %743 = arith.mulf %741, %742 : vector<8x32xf32>
    %cst_338 = arith.constant 5.000000e-01 : f32
    %744 = vector.broadcast %cst_338 : f32 to vector<8x32xf32>
    %745 = arith.addf %743, %744 : vector<8x32xf32>
    %746 = vector.extract_strided_slice %729 {offsets = [0, 64], sizes = [8, 32], strides = [1, 1]} : vector<8x128xf32> to vector<8x32xf32>
    %747 = math.tanh %746 : vector<8x32xf32>
    %748 = vector.extract_strided_slice %729 {offsets = [0, 96], sizes = [8, 32], strides = [1, 1]} : vector<8x128xf32> to vector<8x32xf32>
    %cst_339 = arith.constant 5.000000e-01 : f32
    %749 = vector.broadcast %cst_339 : f32 to vector<8x32xf32>
    %750 = arith.mulf %748, %749 : vector<8x32xf32>
    %751 = math.tanh %750 : vector<8x32xf32>
    %cst_340 = arith.constant 5.000000e-01 : f32
    %752 = vector.broadcast %cst_340 : f32 to vector<8x32xf32>
    %753 = arith.mulf %751, %752 : vector<8x32xf32>
    %cst_341 = arith.constant 5.000000e-01 : f32
    %754 = vector.broadcast %cst_341 : f32 to vector<8x32xf32>
    %755 = arith.addf %753, %754 : vector<8x32xf32>
    %756 = arith.mulf %745, %639 : vector<8x32xf32>
    %757 = arith.mulf %737, %747 : vector<8x32xf32>
    %758 = arith.addf %756, %757 : vector<8x32xf32>
    %759 = math.tanh %758 : vector<8x32xf32>
    %760 = arith.mulf %755, %759 : vector<8x32xf32>
    %c0_342 = arith.constant 0 : index
    %c0_343 = arith.constant 0 : index
    %761 = vector.load %arg5[%c0_342, %c0_343] : memref<32x512xf32, #tpu.memory_space<vmem>>, vector<32x512xf32>
    %cst_344 = arith.constant dense<0.000000e+00> : vector<8x512xf32>
    %762 = tpu.matmul %721, %761, %cst_344 {dimension_numbers = #tpu.dot_dimension_numbers<[1], [0], [0], [1], [0, 0, 1, 1], [], []>} : vector<8x32xf32>, vector<32x512xf32>, vector<8x512xf32> -> vector<8x512xf32>
    %c0_345 = arith.constant 0 : index
    %c0_346 = arith.constant 0 : index
    %763 = vector.load %arg6[%c0_345, %c0_346] : memref<128x512xf32, #tpu.memory_space<vmem>>, vector<128x512xf32>
    %cst_347 = arith.constant dense<0.000000e+00> : vector<8x512xf32>
    %764 = tpu.matmul %680, %763, %cst_347 {dimension_numbers = #tpu.dot_dimension_numbers<[1], [0], [0], [1], [0, 0, 1, 1], [], []>} : vector<8x128xf32>, vector<128x512xf32>, vector<8x512xf32> -> vector<8x512xf32>
    %765 = arith.addf %762, %764 : vector<8x512xf32>
    %c0_348 = arith.constant 0 : index
    %c0_349 = arith.constant 0 : index
    %766 = vector.load %arg7[%c0_348, %c0_349] : memref<1x512xf32, #tpu.memory_space<vmem>>, vector<1x512xf32>
    %767 = vector.broadcast %766 : vector<1x512xf32> to vector<8x512xf32>
    %768 = arith.addf %765, %767 : vector<8x512xf32>
    %769 = vector.extract_strided_slice %768 {offsets = [0, 0], sizes = [8, 128], strides = [1, 1]} : vector<8x512xf32> to vector<8x128xf32>
    %cst_350 = arith.constant 5.000000e-01 : f32
    %770 = vector.broadcast %cst_350 : f32 to vector<8x128xf32>
    %771 = arith.mulf %769, %770 : vector<8x128xf32>
    %772 = math.tanh %771 : vector<8x128xf32>
    %cst_351 = arith.constant 5.000000e-01 : f32
    %773 = vector.broadcast %cst_351 : f32 to vector<8x128xf32>
    %774 = arith.mulf %772, %773 : vector<8x128xf32>
    %cst_352 = arith.constant 5.000000e-01 : f32
    %775 = vector.broadcast %cst_352 : f32 to vector<8x128xf32>
    %776 = arith.addf %774, %775 : vector<8x128xf32>
    %777 = vector.extract_strided_slice %768 {offsets = [0, 128], sizes = [8, 128], strides = [1, 1]} : vector<8x512xf32> to vector<8x128xf32>
    %cst_353 = arith.constant 5.000000e-01 : f32
    %778 = vector.broadcast %cst_353 : f32 to vector<8x128xf32>
    %779 = arith.mulf %777, %778 : vector<8x128xf32>
    %780 = math.tanh %779 : vector<8x128xf32>
    %cst_354 = arith.constant 5.000000e-01 : f32
    %781 = vector.broadcast %cst_354 : f32 to vector<8x128xf32>
    %782 = arith.mulf %780, %781 : vector<8x128xf32>
    %cst_355 = arith.constant 5.000000e-01 : f32
    %783 = vector.broadcast %cst_355 : f32 to vector<8x128xf32>
    %784 = arith.addf %782, %783 : vector<8x128xf32>
    %785 = vector.extract_strided_slice %768 {offsets = [0, 256], sizes = [8, 128], strides = [1, 1]} : vector<8x512xf32> to vector<8x128xf32>
    %786 = math.tanh %785 : vector<8x128xf32>
    %787 = vector.extract_strided_slice %768 {offsets = [0, 384], sizes = [8, 128], strides = [1, 1]} : vector<8x512xf32> to vector<8x128xf32>
    %cst_356 = arith.constant 5.000000e-01 : f32
    %788 = vector.broadcast %cst_356 : f32 to vector<8x128xf32>
    %789 = arith.mulf %787, %788 : vector<8x128xf32>
    %790 = math.tanh %789 : vector<8x128xf32>
    %cst_357 = arith.constant 5.000000e-01 : f32
    %791 = vector.broadcast %cst_357 : f32 to vector<8x128xf32>
    %792 = arith.mulf %790, %791 : vector<8x128xf32>
    %cst_358 = arith.constant 5.000000e-01 : f32
    %793 = vector.broadcast %cst_358 : f32 to vector<8x128xf32>
    %794 = arith.addf %792, %793 : vector<8x128xf32>
    %795 = arith.mulf %784, %678 : vector<8x128xf32>
    %796 = arith.mulf %776, %786 : vector<8x128xf32>
    %797 = arith.addf %795, %796 : vector<8x128xf32>
    %798 = math.tanh %797 : vector<8x128xf32>
    %799 = arith.mulf %794, %798 : vector<8x128xf32>
    %c7 = arith.constant 7 : index
    %c0_359 = arith.constant 0 : index
    %c0_360 = arith.constant 0 : index
    %800 = vector.load %arg1[%c7, %c0_359, %c0_360] : memref<8x8x16xf32, #tpu.memory_space<vmem>>, vector<1x8x16xf32>
    %801 = vector.shape_cast %800 : vector<1x8x16xf32> to vector<8x16xf32>
    %c0_361 = arith.constant 0 : index
    %c0_362 = arith.constant 0 : index
    %802 = vector.load %arg2[%c0_361, %c0_362] : memref<16x128xf32, #tpu.memory_space<vmem>>, vector<16x128xf32>
    %cst_363 = arith.constant dense<0.000000e+00> : vector<8x128xf32>
    %803 = tpu.matmul %801, %802, %cst_363 {dimension_numbers = #tpu.dot_dimension_numbers<[1], [0], [0], [1], [0, 0, 1, 1], [], []>} : vector<8x16xf32>, vector<16x128xf32>, vector<8x128xf32> -> vector<8x128xf32>
    %c0_364 = arith.constant 0 : index
    %c0_365 = arith.constant 0 : index
    %804 = vector.load %arg3[%c0_364, %c0_365] : memref<32x128xf32, #tpu.memory_space<vmem>>, vector<32x128xf32>
    %cst_366 = arith.constant dense<0.000000e+00> : vector<8x128xf32>
    %805 = tpu.matmul %721, %804, %cst_366 {dimension_numbers = #tpu.dot_dimension_numbers<[1], [0], [0], [1], [0, 0, 1, 1], [], []>} : vector<8x32xf32>, vector<32x128xf32>, vector<8x128xf32> -> vector<8x128xf32>
    %806 = arith.addf %803, %805 : vector<8x128xf32>
    %c0_367 = arith.constant 0 : index
    %c0_368 = arith.constant 0 : index
    %807 = vector.load %arg4[%c0_367, %c0_368] : memref<1x128xf32, #tpu.memory_space<vmem>>, vector<1x128xf32>
    %808 = vector.broadcast %807 : vector<1x128xf32> to vector<8x128xf32>
    %809 = arith.addf %806, %808 : vector<8x128xf32>
    %810 = vector.extract_strided_slice %809 {offsets = [0, 0], sizes = [8, 32], strides = [1, 1]} : vector<8x128xf32> to vector<8x32xf32>
    %cst_369 = arith.constant 5.000000e-01 : f32
    %811 = vector.broadcast %cst_369 : f32 to vector<8x32xf32>
    %812 = arith.mulf %810, %811 : vector<8x32xf32>
    %813 = math.tanh %812 : vector<8x32xf32>
    %cst_370 = arith.constant 5.000000e-01 : f32
    %814 = vector.broadcast %cst_370 : f32 to vector<8x32xf32>
    %815 = arith.mulf %813, %814 : vector<8x32xf32>
    %cst_371 = arith.constant 5.000000e-01 : f32
    %816 = vector.broadcast %cst_371 : f32 to vector<8x32xf32>
    %817 = arith.addf %815, %816 : vector<8x32xf32>
    %818 = vector.extract_strided_slice %809 {offsets = [0, 32], sizes = [8, 32], strides = [1, 1]} : vector<8x128xf32> to vector<8x32xf32>
    %cst_372 = arith.constant 5.000000e-01 : f32
    %819 = vector.broadcast %cst_372 : f32 to vector<8x32xf32>
    %820 = arith.mulf %818, %819 : vector<8x32xf32>
    %821 = math.tanh %820 : vector<8x32xf32>
    %cst_373 = arith.constant 5.000000e-01 : f32
    %822 = vector.broadcast %cst_373 : f32 to vector<8x32xf32>
    %823 = arith.mulf %821, %822 : vector<8x32xf32>
    %cst_374 = arith.constant 5.000000e-01 : f32
    %824 = vector.broadcast %cst_374 : f32 to vector<8x32xf32>
    %825 = arith.addf %823, %824 : vector<8x32xf32>
    %826 = vector.extract_strided_slice %809 {offsets = [0, 64], sizes = [8, 32], strides = [1, 1]} : vector<8x128xf32> to vector<8x32xf32>
    %827 = math.tanh %826 : vector<8x32xf32>
    %828 = vector.extract_strided_slice %809 {offsets = [0, 96], sizes = [8, 32], strides = [1, 1]} : vector<8x128xf32> to vector<8x32xf32>
    %cst_375 = arith.constant 5.000000e-01 : f32
    %829 = vector.broadcast %cst_375 : f32 to vector<8x32xf32>
    %830 = arith.mulf %828, %829 : vector<8x32xf32>
    %831 = math.tanh %830 : vector<8x32xf32>
    %cst_376 = arith.constant 5.000000e-01 : f32
    %832 = vector.broadcast %cst_376 : f32 to vector<8x32xf32>
    %833 = arith.mulf %831, %832 : vector<8x32xf32>
    %cst_377 = arith.constant 5.000000e-01 : f32
    %834 = vector.broadcast %cst_377 : f32 to vector<8x32xf32>
    %835 = arith.addf %833, %834 : vector<8x32xf32>
    %836 = arith.mulf %825, %719 : vector<8x32xf32>
    %837 = arith.mulf %817, %827 : vector<8x32xf32>
    %838 = arith.addf %836, %837 : vector<8x32xf32>
    %839 = math.tanh %838 : vector<8x32xf32>
    %840 = arith.mulf %835, %839 : vector<8x32xf32>
    %c0_378 = arith.constant 0 : index
    %c0_379 = arith.constant 0 : index
    %841 = vector.load %arg8[%c0_378, %c0_379] : memref<128x128xf32, #tpu.memory_space<vmem>>, vector<128x128xf32>
    %cst_380 = arith.constant dense<0.000000e+00> : vector<8x128xf32>
    %842 = tpu.matmul %799, %841, %cst_380 {dimension_numbers = #tpu.dot_dimension_numbers<[1], [0], [0], [1], [0, 0, 1, 1], [], []>} : vector<8x128xf32>, vector<128x128xf32>, vector<8x128xf32> -> vector<8x128xf32>
    %c0_381 = arith.constant 0 : index
    %c0_382 = arith.constant 0 : index
    %843 = vector.load %arg9[%c0_381, %c0_382] : memref<32x128xf32, #tpu.memory_space<vmem>>, vector<32x128xf32>
    %cst_383 = arith.constant dense<0.000000e+00> : vector<8x128xf32>
    %844 = tpu.matmul %760, %843, %cst_383 {dimension_numbers = #tpu.dot_dimension_numbers<[1], [0], [0], [1], [0, 0, 1, 1], [], []>} : vector<8x32xf32>, vector<32x128xf32>, vector<8x128xf32> -> vector<8x128xf32>
    %845 = arith.addf %842, %844 : vector<8x128xf32>
    %c0_384 = arith.constant 0 : index
    %c0_385 = arith.constant 0 : index
    %846 = vector.load %arg10[%c0_384, %c0_385] : memref<1x128xf32, #tpu.memory_space<vmem>>, vector<1x128xf32>
    %847 = vector.broadcast %846 : vector<1x128xf32> to vector<8x128xf32>
    %848 = arith.addf %845, %847 : vector<8x128xf32>
    %849 = vector.extract_strided_slice %848 {offsets = [0, 0], sizes = [8, 32], strides = [1, 1]} : vector<8x128xf32> to vector<8x32xf32>
    %cst_386 = arith.constant 5.000000e-01 : f32
    %850 = vector.broadcast %cst_386 : f32 to vector<8x32xf32>
    %851 = arith.mulf %849, %850 : vector<8x32xf32>
    %852 = math.tanh %851 : vector<8x32xf32>
    %cst_387 = arith.constant 5.000000e-01 : f32
    %853 = vector.broadcast %cst_387 : f32 to vector<8x32xf32>
    %854 = arith.mulf %852, %853 : vector<8x32xf32>
    %cst_388 = arith.constant 5.000000e-01 : f32
    %855 = vector.broadcast %cst_388 : f32 to vector<8x32xf32>
    %856 = arith.addf %854, %855 : vector<8x32xf32>
    %857 = vector.extract_strided_slice %848 {offsets = [0, 32], sizes = [8, 32], strides = [1, 1]} : vector<8x128xf32> to vector<8x32xf32>
    %cst_389 = arith.constant 5.000000e-01 : f32
    %858 = vector.broadcast %cst_389 : f32 to vector<8x32xf32>
    %859 = arith.mulf %857, %858 : vector<8x32xf32>
    %860 = math.tanh %859 : vector<8x32xf32>
    %cst_390 = arith.constant 5.000000e-01 : f32
    %861 = vector.broadcast %cst_390 : f32 to vector<8x32xf32>
    %862 = arith.mulf %860, %861 : vector<8x32xf32>
    %cst_391 = arith.constant 5.000000e-01 : f32
    %863 = vector.broadcast %cst_391 : f32 to vector<8x32xf32>
    %864 = arith.addf %862, %863 : vector<8x32xf32>
    %865 = vector.extract_strided_slice %848 {offsets = [0, 64], sizes = [8, 32], strides = [1, 1]} : vector<8x128xf32> to vector<8x32xf32>
    %866 = math.tanh %865 : vector<8x32xf32>
    %867 = vector.extract_strided_slice %848 {offsets = [0, 96], sizes = [8, 32], strides = [1, 1]} : vector<8x128xf32> to vector<8x32xf32>
    %cst_392 = arith.constant 5.000000e-01 : f32
    %868 = vector.broadcast %cst_392 : f32 to vector<8x32xf32>
    %869 = arith.mulf %867, %868 : vector<8x32xf32>
    %870 = math.tanh %869 : vector<8x32xf32>
    %cst_393 = arith.constant 5.000000e-01 : f32
    %871 = vector.broadcast %cst_393 : f32 to vector<8x32xf32>
    %872 = arith.mulf %870, %871 : vector<8x32xf32>
    %cst_394 = arith.constant 5.000000e-01 : f32
    %873 = vector.broadcast %cst_394 : f32 to vector<8x32xf32>
    %874 = arith.addf %872, %873 : vector<8x32xf32>
    %875 = arith.mulf %864, %758 : vector<8x32xf32>
    %876 = arith.mulf %856, %866 : vector<8x32xf32>
    %877 = arith.addf %875, %876 : vector<8x32xf32>
    %878 = math.tanh %877 : vector<8x32xf32>
    %879 = arith.mulf %874, %878 : vector<8x32xf32>
    %c0_395 = arith.constant 0 : index
    %c0_396 = arith.constant 0 : index
    %880 = vector.load %arg5[%c0_395, %c0_396] : memref<32x512xf32, #tpu.memory_space<vmem>>, vector<32x512xf32>
    %cst_397 = arith.constant dense<0.000000e+00> : vector<8x512xf32>
    %881 = tpu.matmul %840, %880, %cst_397 {dimension_numbers = #tpu.dot_dimension_numbers<[1], [0], [0], [1], [0, 0, 1, 1], [], []>} : vector<8x32xf32>, vector<32x512xf32>, vector<8x512xf32> -> vector<8x512xf32>
    %c0_398 = arith.constant 0 : index
    %c0_399 = arith.constant 0 : index
    %882 = vector.load %arg6[%c0_398, %c0_399] : memref<128x512xf32, #tpu.memory_space<vmem>>, vector<128x512xf32>
    %cst_400 = arith.constant dense<0.000000e+00> : vector<8x512xf32>
    %883 = tpu.matmul %799, %882, %cst_400 {dimension_numbers = #tpu.dot_dimension_numbers<[1], [0], [0], [1], [0, 0, 1, 1], [], []>} : vector<8x128xf32>, vector<128x512xf32>, vector<8x512xf32> -> vector<8x512xf32>
    %884 = arith.addf %881, %883 : vector<8x512xf32>
    %c0_401 = arith.constant 0 : index
    %c0_402 = arith.constant 0 : index
    %885 = vector.load %arg7[%c0_401, %c0_402] : memref<1x512xf32, #tpu.memory_space<vmem>>, vector<1x512xf32>
    %886 = vector.broadcast %885 : vector<1x512xf32> to vector<8x512xf32>
    %887 = arith.addf %884, %886 : vector<8x512xf32>
    %888 = vector.extract_strided_slice %887 {offsets = [0, 0], sizes = [8, 128], strides = [1, 1]} : vector<8x512xf32> to vector<8x128xf32>
    %cst_403 = arith.constant 5.000000e-01 : f32
    %889 = vector.broadcast %cst_403 : f32 to vector<8x128xf32>
    %890 = arith.mulf %888, %889 : vector<8x128xf32>
    %891 = math.tanh %890 : vector<8x128xf32>
    %cst_404 = arith.constant 5.000000e-01 : f32
    %892 = vector.broadcast %cst_404 : f32 to vector<8x128xf32>
    %893 = arith.mulf %891, %892 : vector<8x128xf32>
    %cst_405 = arith.constant 5.000000e-01 : f32
    %894 = vector.broadcast %cst_405 : f32 to vector<8x128xf32>
    %895 = arith.addf %893, %894 : vector<8x128xf32>
    %896 = vector.extract_strided_slice %887 {offsets = [0, 128], sizes = [8, 128], strides = [1, 1]} : vector<8x512xf32> to vector<8x128xf32>
    %cst_406 = arith.constant 5.000000e-01 : f32
    %897 = vector.broadcast %cst_406 : f32 to vector<8x128xf32>
    %898 = arith.mulf %896, %897 : vector<8x128xf32>
    %899 = math.tanh %898 : vector<8x128xf32>
    %cst_407 = arith.constant 5.000000e-01 : f32
    %900 = vector.broadcast %cst_407 : f32 to vector<8x128xf32>
    %901 = arith.mulf %899, %900 : vector<8x128xf32>
    %cst_408 = arith.constant 5.000000e-01 : f32
    %902 = vector.broadcast %cst_408 : f32 to vector<8x128xf32>
    %903 = arith.addf %901, %902 : vector<8x128xf32>
    %904 = vector.extract_strided_slice %887 {offsets = [0, 256], sizes = [8, 128], strides = [1, 1]} : vector<8x512xf32> to vector<8x128xf32>
    %905 = math.tanh %904 : vector<8x128xf32>
    %906 = vector.extract_strided_slice %887 {offsets = [0, 384], sizes = [8, 128], strides = [1, 1]} : vector<8x512xf32> to vector<8x128xf32>
    %cst_409 = arith.constant 5.000000e-01 : f32
    %907 = vector.broadcast %cst_409 : f32 to vector<8x128xf32>
    %908 = arith.mulf %906, %907 : vector<8x128xf32>
    %909 = math.tanh %908 : vector<8x128xf32>
    %cst_410 = arith.constant 5.000000e-01 : f32
    %910 = vector.broadcast %cst_410 : f32 to vector<8x128xf32>
    %911 = arith.mulf %909, %910 : vector<8x128xf32>
    %cst_411 = arith.constant 5.000000e-01 : f32
    %912 = vector.broadcast %cst_411 : f32 to vector<8x128xf32>
    %913 = arith.addf %911, %912 : vector<8x128xf32>
    %914 = arith.mulf %903, %797 : vector<8x128xf32>
    %915 = arith.mulf %895, %905 : vector<8x128xf32>
    %916 = arith.addf %914, %915 : vector<8x128xf32>
    %917 = math.tanh %916 : vector<8x128xf32>
    %918 = arith.mulf %913, %917 : vector<8x128xf32>
    %c0_412 = arith.constant 0 : index
    %c0_413 = arith.constant 0 : index
    %919 = vector.load %arg8[%c0_412, %c0_413] : memref<128x128xf32, #tpu.memory_space<vmem>>, vector<128x128xf32>
    %cst_414 = arith.constant dense<0.000000e+00> : vector<8x128xf32>
    %920 = tpu.matmul %918, %919, %cst_414 {dimension_numbers = #tpu.dot_dimension_numbers<[1], [0], [0], [1], [0, 0, 1, 1], [], []>} : vector<8x128xf32>, vector<128x128xf32>, vector<8x128xf32> -> vector<8x128xf32>
    %c0_415 = arith.constant 0 : index
    %c0_416 = arith.constant 0 : index
    %921 = vector.load %arg9[%c0_415, %c0_416] : memref<32x128xf32, #tpu.memory_space<vmem>>, vector<32x128xf32>
    %cst_417 = arith.constant dense<0.000000e+00> : vector<8x128xf32>
    %922 = tpu.matmul %879, %921, %cst_417 {dimension_numbers = #tpu.dot_dimension_numbers<[1], [0], [0], [1], [0, 0, 1, 1], [], []>} : vector<8x32xf32>, vector<32x128xf32>, vector<8x128xf32> -> vector<8x128xf32>
    %923 = arith.addf %920, %922 : vector<8x128xf32>
    %c0_418 = arith.constant 0 : index
    %c0_419 = arith.constant 0 : index
    %924 = vector.load %arg10[%c0_418, %c0_419] : memref<1x128xf32, #tpu.memory_space<vmem>>, vector<1x128xf32>
    %925 = vector.broadcast %924 : vector<1x128xf32> to vector<8x128xf32>
    %926 = arith.addf %923, %925 : vector<8x128xf32>
    %927 = vector.extract_strided_slice %926 {offsets = [0, 0], sizes = [8, 32], strides = [1, 1]} : vector<8x128xf32> to vector<8x32xf32>
    %cst_420 = arith.constant 5.000000e-01 : f32
    %928 = vector.broadcast %cst_420 : f32 to vector<8x32xf32>
    %929 = arith.mulf %927, %928 : vector<8x32xf32>
    %930 = math.tanh %929 : vector<8x32xf32>
    %cst_421 = arith.constant 5.000000e-01 : f32
    %931 = vector.broadcast %cst_421 : f32 to vector<8x32xf32>
    %932 = arith.mulf %930, %931 : vector<8x32xf32>
    %cst_422 = arith.constant 5.000000e-01 : f32
    %933 = vector.broadcast %cst_422 : f32 to vector<8x32xf32>
    %934 = arith.addf %932, %933 : vector<8x32xf32>
    %935 = vector.extract_strided_slice %926 {offsets = [0, 32], sizes = [8, 32], strides = [1, 1]} : vector<8x128xf32> to vector<8x32xf32>
    %cst_423 = arith.constant 5.000000e-01 : f32
    %936 = vector.broadcast %cst_423 : f32 to vector<8x32xf32>
    %937 = arith.mulf %935, %936 : vector<8x32xf32>
    %938 = math.tanh %937 : vector<8x32xf32>
    %cst_424 = arith.constant 5.000000e-01 : f32
    %939 = vector.broadcast %cst_424 : f32 to vector<8x32xf32>
    %940 = arith.mulf %938, %939 : vector<8x32xf32>
    %cst_425 = arith.constant 5.000000e-01 : f32
    %941 = vector.broadcast %cst_425 : f32 to vector<8x32xf32>
    %942 = arith.addf %940, %941 : vector<8x32xf32>
    %943 = vector.extract_strided_slice %926 {offsets = [0, 64], sizes = [8, 32], strides = [1, 1]} : vector<8x128xf32> to vector<8x32xf32>
    %944 = math.tanh %943 : vector<8x32xf32>
    %945 = vector.extract_strided_slice %926 {offsets = [0, 96], sizes = [8, 32], strides = [1, 1]} : vector<8x128xf32> to vector<8x32xf32>
    %cst_426 = arith.constant 5.000000e-01 : f32
    %946 = vector.broadcast %cst_426 : f32 to vector<8x32xf32>
    %947 = arith.mulf %945, %946 : vector<8x32xf32>
    %948 = math.tanh %947 : vector<8x32xf32>
    %cst_427 = arith.constant 5.000000e-01 : f32
    %949 = vector.broadcast %cst_427 : f32 to vector<8x32xf32>
    %950 = arith.mulf %948, %949 : vector<8x32xf32>
    %cst_428 = arith.constant 5.000000e-01 : f32
    %951 = vector.broadcast %cst_428 : f32 to vector<8x32xf32>
    %952 = arith.addf %950, %951 : vector<8x32xf32>
    %953 = arith.mulf %942, %877 : vector<8x32xf32>
    %954 = arith.mulf %934, %944 : vector<8x32xf32>
    %955 = arith.addf %953, %954 : vector<8x32xf32>
    %956 = math.tanh %955 : vector<8x32xf32>
    %957 = arith.mulf %952, %956 : vector<8x32xf32>
    %c0_429 = arith.constant 0 : index
    %c0_430 = arith.constant 0 : index
    %958 = vector.load %arg11[%c0_429, %c0_430] : memref<32x1xf32, #tpu.memory_space<vmem>>, vector<32x1xf32>
    %cst_431 = arith.constant dense<0.000000e+00> : vector<8x1xf32>
    %959 = tpu.matmul %957, %958, %cst_431 {dimension_numbers = #tpu.dot_dimension_numbers<[1], [0], [0], [1], [0, 0, 1, 1], [], []>} : vector<8x32xf32>, vector<32x1xf32>, vector<8x1xf32> -> vector<8x1xf32>
    %c0_432 = arith.constant 0 : index
    %c0_433 = arith.constant 0 : index
    %960 = vector.load %arg12[%c0_432, %c0_433] : memref<1x1xf32, #tpu.memory_space<vmem>>, vector<1x1xf32>
    %961 = vector.broadcast %960 : vector<1x1xf32> to vector<8x1xf32>
    %962 = arith.addf %959, %961 : vector<8x1xf32>
    %c0_434 = arith.constant 0 : index
    %c0_435 = arith.constant 0 : index
    %963 = vector.load %arg13[%c0_434, %c0_435] : memref<8x1xf32, #tpu.memory_space<vmem>>, vector<8x1xf32>
    tpu.vector_store %arg13[%c0_434, %c0_435], %962 {strides = array<i32>} : memref<8x1xf32, #tpu.memory_space<vmem>>, vector<8x1xf32>,
    return
  }
  func.func @transform_0(%arg0: i32) -> (i32, i32, i32) {
    %c0_i32 = arith.constant 0 : i32
    %c0_i32_0 = arith.constant 0 : i32
    %c0_i32_1 = arith.constant 0 : i32
    return %c0_i32, %arg0, %c0_i32_0 : i32, i32, i32
  }
  func.func @transform_1(%arg0: i32) -> (i32, i32) {
    %c0_i32 = arith.constant 0 : i32
    %c0_i32_0 = arith.constant 0 : i32
    %c0_i32_1 = arith.constant 0 : i32
    return %c0_i32, %c0_i32_0 : i32, i32
  }
  func.func @transform_2(%arg0: i32) -> (i32, i32) {
    %c0_i32 = arith.constant 0 : i32
    %c0_i32_0 = arith.constant 0 : i32
    %c0_i32_1 = arith.constant 0 : i32
    return %c0_i32, %c0_i32_0 : i32, i32
  }
  func.func @transform_3(%arg0: i32) -> (i32, i32) {
    %c0_i32 = arith.constant 0 : i32
    %c0_i32_0 = arith.constant 0 : i32
    %c0_i32_1 = arith.constant 0 : i32
    return %c0_i32, %c0_i32_0 : i32, i32
  }
  func.func @transform_4(%arg0: i32) -> (i32, i32) {
    %c0_i32 = arith.constant 0 : i32
    %c0_i32_0 = arith.constant 0 : i32
    %c0_i32_1 = arith.constant 0 : i32
    return %c0_i32, %c0_i32_0 : i32, i32
  }
  func.func @transform_5(%arg0: i32) -> (i32, i32) {
    %c0_i32 = arith.constant 0 : i32
    %c0_i32_0 = arith.constant 0 : i32
    %c0_i32_1 = arith.constant 0 : i32
    return %c0_i32, %c0_i32_0 : i32, i32
  }
  func.func @transform_6(%arg0: i32) -> (i32, i32) {
    %c0_i32 = arith.constant 0 : i32
    %c0_i32_0 = arith.constant 0 : i32
    %c0_i32_1 = arith.constant 0 : i32
    return %c0_i32, %c0_i32_0 : i32, i32
  }
  func.func @transform_7(%arg0: i32) -> (i32, i32) {
    %c0_i32 = arith.constant 0 : i32
    %c0_i32_0 = arith.constant 0 : i32
    %c0_i32_1 = arith.constant 0 : i32
    return %c0_i32, %c0_i32_0 : i32, i32
  }
  func.func @transform_8(%arg0: i32) -> (i32, i32) {
    %c0_i32 = arith.constant 0 : i32
    %c0_i32_0 = arith.constant 0 : i32
    %c0_i32_1 = arith.constant 0 : i32
    return %c0_i32, %c0_i32_0 : i32, i32
  }
  func.func @transform_9(%arg0: i32) -> (i32, i32) {
    %c0_i32 = arith.constant 0 : i32
    %c0_i32_0 = arith.constant 0 : i32
    %c0_i32_1 = arith.constant 0 : i32
    return %c0_i32, %c0_i32_0 : i32, i32
  }
  func.func @transform_10(%arg0: i32) -> (i32, i32) {
    %c0_i32 = arith.constant 0 : i32
    %c0_i32_0 = arith.constant 0 : i32
    %c0_i32_1 = arith.constant 0 : i32
    return %c0_i32, %c0_i32_0 : i32, i32
  }
  func.func @transform_11(%arg0: i32) -> (i32, i32) {
    %c0_i32 = arith.constant 0 : i32
    %c0_i32_0 = arith.constant 0 : i32
    %c0_i32_1 = arith.constant 0 : i32
    return %c0_i32, %c0_i32_0 : i32, i32
  }
  func.func @transform_12(%arg0: i32) -> (i32, i32) {
    %c0_i32 = arith.constant 0 : i32
    %c0_i32_0 = arith.constant 0 : i32
    return %arg0, %c0_i32 : i32, i32
  }
}

</mosaic_0001>

<bundles_post_ra>
// kernel: tpu_custom_call.1
= control target key start
LH: loop header
LB: loop body
LE: loop exit
PB: predicated region body
PF: predicated region fallthrough
CT: control target
= control target key end

     0   :  { %s8894_s0 = inlined_call_operand.hbm [shape: f32[8,8,16], index: 0, kind: input, shape index: {}]   ;;  %s8895_s1 = inlined_call_operand.hbm [shape: f32[16,128], index: 1, kind: input, shape index: {}]   ;;  %s8896_s2 = inlined_call_operand.vmem [shape: f32[32,128], index: 2, kind: input, shape index: {}]   ;;  %s8897_s3 = inlined_call_operand.vmem [shape: f32[1,128], index: 3, kind: input, shape index: {}]   ;;  %s8898_s4 = inlined_call_operand.hbm [shape: f32[32,512], index: 4, kind: input, shape index: {}]   ;;  %s8899_s5 = inlined_call_operand.hbm [shape: f32[128,512], index: 5, kind: input, shape index: {}]   ;;  %s8900_s6 = inlined_call_operand.hbm [shape: f32[1,512], index: 6, kind: input, shape index: {}]   ;;  %s8901_s7 = inlined_call_operand.hbm [shape: f32[128,128], index: 7, kind: input, shape index: {}]   ;;  %s8902_s8 = inlined_call_operand.vmem [shape: f32[32,128], index: 8, kind: input, shape index: {}]   ;;  %s8903_s9 = inlined_call_operand.vmem [shape: f32[1,128], index: 9, kind: input, shape index: {}]   ;;  %s8904_s10 = inlined_call_operand.vmem [shape: f32[32,1], index: 10, kind: input, shape index: {}]   ;;  %s8905_s11 = inlined_call_operand.<no memory space> [shape: f32[1,1], index: 11, kind: input, shape index: {}]   ;;  %s8906_s12 = inlined_call_operand.vmem [shape: f32[8,1], index: 12, kind: output, shape index: {}]  }
   0x1   :  { %v17_v0 = vstv %s8905_s11 }
   0x2   :  { %18 = vst [vmem:[#allocation2] sm:$0x1] %v17_v0 }
   0x3   :  { %19 = vsyncpa [#allocation4], 0 }
   0x4   :  { %20 = vsyncpa [#allocation6], 0 }
   0x5   :  { %21 = vsyncpa [#allocation9], 0 }
   0x6   :  { %22 = vsyncpa [#allocation12], 0  ;;  %s7669_s23 = smov [#allocation5]   ;;  %s7529_s27 = scalar_lea.hbm %s8895_s1, 256 }
   0x7   :  { %s40_s24 = sshll.u32 %s7669_s23, 4  ;;  %p7530_p0 = scmp.ne.s32.totalorder %s8895_s1, %s7529_s27  ;;  %s41_s24 = int_to_ptr.vmem [resolvable:$true] %s40_s24 }
   0x8   :  { %p7533_p1 = scmp.lt.u32.totalorder %s7529_s27, %s8895_s1 }
   0xa   :  { %p7535_p2 = pnand %p7533_p1, %p7530_p0 }
   0xc   :  { %7538 = shalt.err (!%p7535_p2)
}
   0xd   :  { %s7539_s11 = scalar_lea.vmem %s41_s24, 256  ;;  %p7544_p4 = scmp.lt.s32.totalorder %s41_s24, %s41_s24 }
   0xe   :  { %p7540_p3 = scmp.ne.s32.totalorder %s41_s24, %s7539_s11  ;;  %p7545_p5 = scmp.lt.s32.totalorder %s7539_s11, %s7539_s11 }
  0x10   :  { %p7546_p6 = por %p7545_p5, %p7544_p4 }
  0x12   :  { %p7547_p7 = pnand %p7546_p6, %p7540_p3 }
  0x14   :  { %7550 = shalt.err (!%p7547_p7)
}
  0x15   :  { %s7670_s14 = smov 128   ;;  %s7671_s15 = smov 8  }
  0x16   :  { %46 = dma.hbm_to_vmem [thread:$0]  %s8895_s1, 256, %s41_s24, [#allocation6], %s7670_s14, %s7670_s14, %s7671_s15  }
  0x17   :  { %s7672_s18 = smov [#allocation8]   ;;  %s7673_s20 = smov [#allocation3]  }
  0x18   :  { %s68_s19 = sshll.u32 %s7672_s18, 4  ;;  %s28_s21 = sshll.u32 %s7673_s20, 4  ;;  %s69_s19 = int_to_ptr.vmem [resolvable:$true] %s68_s19  ;;  %s29_s21 = int_to_ptr.vmem [resolvable:$true] %s28_s21 }
  0x19   :  { %s7551_s25 = scalar_lea.hbm %s8899_s5, 8192 }
  0x1a   :  { %p7552_p8 = scmp.ne.s32.totalorder %s8899_s5, %s7551_s25  ;;  %p7555_p9 = scmp.lt.u32.totalorder %s7551_s25, %s8899_s5 }
  0x1c   :  { %p7557_p10 = pnand %p7555_p9, %p7552_p8 }
  0x1e   :  { %7560 = shalt.err (!%p7557_p10)
}
  0x1f   :  { %s7561_s1 = scalar_lea.vmem %s69_s19, 8192  ;;  %p7566_p12 = scmp.lt.s32.totalorder %s69_s19, %s69_s19 }
  0x20   :  { %p7562_p11 = scmp.ne.s32.totalorder %s69_s19, %s7561_s1  ;;  %p7567_p13 = scmp.lt.s32.totalorder %s7561_s1, %s7561_s1 }
  0x22   :  { %p7568_p0 = por %p7567_p13, %p7566_p12 }
  0x24   :  { %p7569_p1 = pnand %p7568_p0, %p7562_p11 }
  0x26   :  { %7572 = shalt.err (!%p7569_p1)
}
  0x27   :  { %s7674_s24 = smov 512   ;;  %s7675_s30 = smov 32  }
  0x28   :  { %74 = dma.hbm_to_vmem [thread:$0]  %s8899_s5, 8192, %s69_s19, [#allocation9], %s7674_s24, %s7674_s24, %s7675_s30  }
  0x29   :  { %s7573_s18 = scalar_lea.hbm %s8894_s0, 1024 }
  0x2a   :  { %p7574_p2 = scmp.ne.s32.totalorder %s8894_s0, %s7573_s18  ;;  %p7577_p3 = scmp.lt.u32.totalorder %s7573_s18, %s8894_s0 }
  0x2c   :  { %p7579_p4 = pnand %p7577_p3, %p7574_p2 }
  0x2e   :  { %7582 = shalt.err (!%p7579_p4)
}
  0x2f   :  { %s7583_s26 = scalar_lea.vmem %s29_s21, 1024  ;;  %p7588_p6 = scmp.lt.s32.totalorder %s29_s21, %s29_s21 }
  0x30   :  { %p7584_p5 = scmp.ne.s32.totalorder %s29_s21, %s7583_s26  ;;  %p7589_p7 = scmp.lt.s32.totalorder %s7583_s26, %s7583_s26 }
  0x32   :  { %p7590_p8 = por %p7589_p7, %p7588_p6 }
  0x34   :  { %p7591_p9 = pnand %p7590_p8, %p7584_p5 }
  0x36   :  { %7594 = shalt.err (!%p7591_p9)
}
  0x37   :  { %34 = dma.hbm_to_vmem [thread:$0]  %s8894_s0, 1024, %s29_s21, [#allocation4], %s7670_s14, %s7670_s14, %s7671_s15  }
  0x38   :  { %s7676_s27 = smov [#allocation7]   ;;  %s7677_s29 = smov [#allocation10]  }
  0x39   :  { %s56_s28 = sshll.u32 %s7676_s27, 4  ;;  %s81_s1 = sshll.u32 %s7677_s29, 4  ;;  %s57_s28 = int_to_ptr.vmem [resolvable:$true] %s56_s28  ;;  %s82_s1 = int_to_ptr.vmem [resolvable:$true] %s81_s1 }
  0x3a   :  { %s7595_s16 = scalar_lea.hbm %s8898_s4, 2048 }
  0x3b   :  { %p7596_p10 = scmp.ne.s32.totalorder %s8898_s4, %s7595_s16  ;;  %p7599_p11 = scmp.lt.u32.totalorder %s7595_s16, %s8898_s4 }
  0x3d   :  { %p7601_p12 = pnand %p7599_p11, %p7596_p10 }
  0x3f   :  { %7604 = shalt.err (!%p7601_p12)
}
  0x40   :  { %s7605_s0 = scalar_lea.vmem %s57_s28, 2048  ;;  %p7610_p0 = scmp.lt.s32.totalorder %s57_s28, %s57_s28 }
  0x41   :  { %p7606_p13 = scmp.ne.s32.totalorder %s57_s28, %s7605_s0  ;;  %p7611_p1 = scmp.lt.s32.totalorder %s7605_s0, %s7605_s0 }
  0x43   :  { %p7612_p2 = por %p7611_p1, %p7610_p0 }
  0x45   :  { %p7613_p3 = pnand %p7612_p2, %p7606_p13 }
  0x47   :  { %7616 = shalt.err (!%p7613_p3)
}
  0x48   :  { %62 = dma.hbm_to_vmem [thread:$0]  %s8898_s4, 2048, %s57_s28, [#allocation6], %s7674_s24, %s7674_s24, %s7675_s30  }
  0x49   :  { %s7617_s5 = scalar_lea.hbm %s8900_s6, 64 }
  0x4a   :  { %p7618_p4 = scmp.ne.s32.totalorder %s8900_s6, %s7617_s5  ;;  %p7621_p5 = scmp.lt.u32.totalorder %s7617_s5, %s8900_s6 }
  0x4c   :  { %p7623_p6 = pnand %p7621_p5, %p7618_p4 }
  0x4e   :  { %7626 = shalt.err (!%p7623_p6)
}
  0x4f   :  { %s7627_s11 = scalar_lea.vmem %s82_s1, 64  ;;  %p7632_p8 = scmp.lt.s32.totalorder %s82_s1, %s82_s1 }
  0x50   :  { %p7628_p7 = scmp.ne.s32.totalorder %s82_s1, %s7627_s11  ;;  %p7633_p9 = scmp.lt.s32.totalorder %s7627_s11, %s7627_s11 }
  0x52   :  { %p7634_p10 = por %p7633_p9, %p7632_p8 }
  0x54   :  { %p7635_p11 = pnand %p7634_p10, %p7628_p7 }
  0x56   :  { %7638 = shalt.err (!%p7635_p11)
}
  0x57   :  { %84 = dma.hbm_to_vmem [thread:$0]  %s8900_s6, 64, %s82_s1, [#allocation9]  }
  0x58   :  { %s7678_s28 = smov [#allocation11]   ;;  %s7639_s20 = scalar_lea.hbm %s8901_s7, 2048 }
  0x59   :  { %s90_s16 = sshll.u32 %s7678_s28, 4  ;;  %p7640_p12 = scmp.ne.s32.totalorder %s8901_s7, %s7639_s20  ;;  %s91_s16 = int_to_ptr.vmem [resolvable:$true] %s90_s16 }
  0x5a   :  { %p7643_p13 = scmp.lt.u32.totalorder %s7639_s20, %s8901_s7 }
  0x5c   :  { %p7645_p0 = pnand %p7643_p13, %p7640_p12 }
  0x5e   :  { %7648 = shalt.err (!%p7645_p0)
}
  0x5f   :  { %s7649_s25 = scalar_lea.vmem %s91_s16, 2048  ;;  %p7654_p2 = scmp.lt.s32.totalorder %s91_s16, %s91_s16 }
  0x60   :  { %p7650_p1 = scmp.ne.s32.totalorder %s91_s16, %s7649_s25  ;;  %p7655_p3 = scmp.lt.s32.totalorder %s7649_s25, %s7649_s25 }
  0x62   :  { %p7656_p4 = por %p7655_p3, %p7654_p2 }
  0x64   :  { %p7657_p5 = pnand %p7656_p4, %p7650_p1 }
  0x66   :  { %7660 = shalt.err (!%p7657_p5)
}
  0x67   :  { %96 = dma.hbm_to_vmem [thread:$0]  %s8901_s7, 2048, %s91_s16, [#allocation12], %s7670_s14, %s7670_s14, %s7671_s15  }
  0x68   :  { %7661 = dma.done.wait [#allocation4], 1024  }
  0x69   :  { %7662 = vsyncadd [#allocation4], 4294966272 }
  0x6a   :  { %7663 = dma.done.wait [#allocation6], 2304  }
  0x6b   :  { %7664 = vsyncadd [#allocation6], 4294964992 }
  0x6c   :  { %7665 = dma.done.wait [#allocation9], 8256  }
  0x6d   :  { %7666 = vsyncadd [#allocation9], 4294959040 }
  0x6e   :  { %7667 = dma.done.wait [#allocation12], 2048  }
  0x6f   :  { %7668 = vsyncadd [#allocation12], 4294965248  ;;  %v8907_v1 = vmov 0.0|0.0   ;;  %vm7680_vm0 = vmmov 0   ;;  %v8909_v2 = vmov 0.0   ;;  %v126_v3 = vld [vmem:[%s8896_s2] sm:$0xff] }
  0x70   :  { %6346 = vmatprep.subr.bf16.mxu0 %v8907_v1  ;;  %6352 = vmatprep.subr.bf16.mxu1 %v8907_v1  ;;  %v127_v4 = vld [vmem:[%s8896_s2 + $0x8] sm:$0xff]  ;;  %v128_v8 = vld [vmem:[%s8896_s2 + $0x10] sm:$0xff]  ;;  %v129_v9 = vld [vmem:[%s8896_s2 + $0x18] sm:$0xff]  ;;  %vm204_vm1 = vcmask 130048   ;;  %s7682_s11 = smov 64   ;;  %vm130_vm2 = vcmask 261120  }
  0x71   :  { %5838 = vmatprep.mubr.msk.f32.mxu1 %vm7680_vm0, %v8909_v2  ;;  %5831 = vmatprep.mubr.msk.f32.mxu0 %vm7680_vm0, %v8909_v2  ;;  %v124_v5 = vld [vmem:[#allocation5] sm:$0xff]  ;;  %v7850_v6 = vpack.c.bf16 %v127_v4, %v126_v3  ;;  %v125_v7 = vld [vmem:[#allocation5 + $0x8] sm:$0xff]  ;;  %v7861_v11 = vpack.c.bf16 %v129_v9, %v128_v8  ;;  %v7873_v16 = vld [vmem:[%s8897_s3] ss:$0 sm:$0xff]  ;;  %vm5526_vm3 = vcmask 7168  }
  0x72   :  { %v7858_v10 = vpack.c.bf16 %v125_v7, %v124_v5  ;;  %v123_v12 = vld [vmem:[#allocation3] sm:$0xff]  ;;  %v325_v30 = vld [vmem:[#allocation8 + $0x8] sm:$0xff]  ;;  %v324_v32 = vld [vmem:[#allocation8] sm:$0xff] }
  0x73   :  { %6348 = vmatpush3.bf16.msra.mxu0 %v7850_v6  ;;  %v329_v31 = vld [vmem:[#allocation8 + $0x28] sm:$0xff]  ;;  %v328_v34 = vld [vmem:[#allocation8 + $0x20] sm:$0xff]  ;;  %v327_v35 = vld [vmem:[#allocation8 + $0x18] sm:$0xff] }
  0x74   :  { %8984 = vst [vmem:[#allocation17_spill] sm:$0xff] %v7858_v10  ;;  %6349 = vmatprep.subr.bf16.mxu0 %v8907_v1  ;;  %6354 = vmatpush3.bf16.msra.mxu1 %v7858_v10  ;;  %v7885_v33 = vpack.c.bf16 %v329_v31, %v325_v30  ;;  %v331_v36 = vld [vmem:[#allocation8 + $0x38] sm:$0xff]  ;;  %v7887_v37 = vpack.c.bf16 %v328_v34, %v324_v32  ;;  %v326_v39 = vld [vmem:[#allocation8 + $0x10] sm:$0xff]  ;;  %v333_v41 = vld [vmem:[#allocation8 + $0x48] sm:$0xff] }
  0x75   :  { %v7889_v38 = vpack.c.bf16 %v331_v36, %v327_v35  ;;  %v330_v40 = vld [vmem:[#allocation8 + $0x30] sm:$0xff]  ;;  %v337_v43 = vld [vmem:[#allocation8 + $0x68] sm:$0xff]  ;;  %v332_v44 = vld [vmem:[#allocation8 + $0x40] sm:$0xff] }
  0x76   :  { %8985 = vst [vmem:[#allocation18_spill] sm:$0xff] %v7885_v33  ;;  %6356 = vmatprep.subr.bf16.mxu1 %v7885_v33  ;;  %v7892_v42 = vpack.c.bf16 %v330_v40, %v326_v39  ;;  %v336_v45 = vld [vmem:[#allocation8 + $0x60] sm:$0xff]  ;;  %v7896_v46 = vpack.c.bf16 %v337_v43, %v333_v41  ;;  %v335_v48 = vld [vmem:[#allocation8 + $0x58] sm:$0xff]  ;;  %v334_v50 = vld [vmem:[#allocation8 + $0x50] sm:$0xff] }
  0x77   :  { %6351 = vmatpush3.bf16.msra.mxu0 %v7861_v11  ;;  %5839 = vmatmul.mubr.msk.f32.vlgmr.msra.gmra.mrb[0].mxu1 %vm204_vm1, %v123_v12  ;;  %8986 = vst [vmem:[#allocation19_spill] sm:$0xff] %v7889_v38  ;;  %v7898_v47 = vpack.c.bf16 %v336_v45, %v332_v44  ;;  %v339_v49 = vld [vmem:[#allocation8 + $0x78] sm:$0xff]  ;;  %v338_v52 = vld [vmem:[#allocation8 + $0x70] sm:$0xff]  ;;  %v341_v53 = vld [vmem:[#allocation8 + $0x88] sm:$0xff] }
  0x78   :  { %452 = vmatprep.mubr.f32.mxu1 %v8909_v2  ;;  %6358 = vmatpush1.bf16.msra.mxu1 %v7887_v37  ;;  %v7901_v51 = vpack.c.bf16 %v339_v49, %v335_v48  ;;  %v345_v54 = vld [vmem:[#allocation8 + $0xa8] sm:$0xff]  ;;  %v7904_v55 = vpack.c.bf16 %v338_v52, %v334_v50  ;;  %v340_v57 = vld [vmem:[#allocation8 + $0x80] sm:$0xff]  ;;  %v343_v59 = vld [vmem:[#allocation8 + $0x98] sm:$0xff] }
  0x79   :  { %6388 = vmatprep.subr.bf16.mxu0 %v7889_v38  ;;  %6360 = vmatprep.subr.bf16.mxu1 %v7896_v46  ;;  %v7906_v56 = vpack.c.bf16 %v345_v54, %v341_v53  ;;  %v344_v58 = vld [vmem:[#allocation8 + $0xa0] sm:$0xff]  ;;  %v347_v60 = vld [vmem:[#allocation8 + $0xb8] sm:$0xff]  ;;  %v342_v61 = vld [vmem:[#allocation8 + $0x90] sm:$0xff] }
  0x7a   :  { %5832 = vmatmul.mubr.f32.vlgmr.msra.gmra.mrb[0].mxu0 %v8909_v2  ;;  %v346_v62 = vld [vmem:[#allocation8 + $0xb0] sm:$0xff]  ;;  %v7910_v63 = vpack.c.bf16 %v344_v58, %v340_v57  ;;  %v7912_v0 = vpack.c.bf16 %v347_v60, %v343_v59  ;;  %v349_v3 = vld [vmem:[#allocation8 + $0xc8] sm:$0xff]  ;;  %v348_v5 = vld [vmem:[#allocation8 + $0xc0] sm:$0xff] }
  0x7b   :  { %523 = vmatprep.mubr.f32.mxu0 %v8909_v2  ;;  %6390 = vmatpush1.bf16.msra.mxu0 %v7892_v42  ;;  %v353_v4 = vld [vmem:[#allocation8 + $0xe8] sm:$0xff]  ;;  %v7916_v7 = vpack.c.bf16 %v346_v62, %v342_v61  ;;  %v352_v9 = vld [vmem:[#allocation8 + $0xe0] sm:$0xff]  ;;  %v351_v12 = vld [vmem:[#allocation8 + $0xd8] sm:$0xff] }
  0x7c   :  { %6392 = vmatprep.subr.bf16.mxu0 %v7901_v51  ;;  %6362 = vmatpush1.bf16.msra.mxu1 %v7898_v47  ;;  %8987 = vst [vmem:[#allocation20_spill] sm:$0xff] %v7910_v63  ;;  %v7918_v8 = vpack.c.bf16 %v353_v4, %v349_v3  ;;  %v358_v30 = vld [vmem:[#allocation8 + $0x110] sm:$0xff]  ;;  %v365_v34 = vld [vmem:[#allocation8 + $0x148] sm:$0xff]  ;;  %v367_v36 = vld [vmem:[#allocation8 + $0x158] sm:$0xff] }
  0x7d   :  { %6364 = vmatprep.subr.bf16.mxu1 %v7906_v56  ;;  %v362_v32 = vld [vmem:[#allocation8 + $0x130] sm:$0xff]  ;;  %v369_v35 = vld [vmem:[#allocation8 + $0x168] sm:$0xff]  ;;  %v371_v39 = vld [vmem:[#allocation8 + $0x178] sm:$0xff] }
  0x7e   :  { %8988 = vst [vmem:[#allocation21_spill] sm:$0xff] %v7918_v8  ;;  %v7941_v41 = vpack.c.bf16 %v362_v32, %v358_v30  ;;  %v7943_v43 = vpack.c.bf16 %v369_v35, %v365_v34  ;;  %v364_v44 = vld [vmem:[#allocation8 + $0x140] sm:$0xff]  ;;  %v366_v48 = vld [vmem:[#allocation8 + $0x150] sm:$0xff]  ;;  %v7946_v49 = vpack.c.bf16 %v371_v39, %v367_v36  ;;  %v373_v52 = vld [vmem:[#allocation8 + $0x188] sm:$0xff] }
  0x7f   :  { %6394 = vmatpush1.bf16.msra.mxu0 %v7904_v55  ;;  %v368_v45 = vld [vmem:[#allocation8 + $0x160] sm:$0xff]  ;;  %v370_v50 = vld [vmem:[#allocation8 + $0x170] sm:$0xff]  ;;  %v377_v53 = vld [vmem:[#allocation8 + $0x1a8] sm:$0xff] }
  0x80   :  { %6396 = vmatprep.subr.bf16.mxu0 %v7912_v0  ;;  %6366 = vmatpush1.bf16.msra.mxu1 %v7910_v63  ;;  %8992 = vst [vmem:[#allocation25_spill] sm:$0xff] %v7943_v43  ;;  %v375_v54 = vld [vmem:[#allocation8 + $0x198] sm:$0xff]  ;;  %v7949_v58 = vpack.c.bf16 %v368_v45, %v364_v44  ;;  %v7953_v59 = vpack.c.bf16 %v370_v50, %v366_v48  ;;  %v372_v61 = vld [vmem:[#allocation8 + $0x180] sm:$0xff]  ;;  %v374_v3 = vld [vmem:[#allocation8 + $0x190] sm:$0xff] }
  0x81   :  { %6368 = vmatprep.subr.bf16.mxu1 %v7918_v8  ;;  %v379_v57 = vld [vmem:[#allocation8 + $0x1b8] sm:$0xff]  ;;  %v7955_v60 = vpack.c.bf16 %v377_v53, %v373_v52  ;;  %v376_v62 = vld [vmem:[#allocation8 + $0x1a0] sm:$0xff]  ;;  %v309_v30 = vld [vmem:[#allocation7 + $0x8] sm:$0xff] }
  0x82   :  { %8993 = vst [vmem:[#allocation26_spill] sm:$0xff] %v7949_v58  ;;  %v7958_v4 = vpack.c.bf16 %v379_v57, %v375_v54  ;;  %v313_v32 = vld [vmem:[#allocation7 + $0x28] sm:$0xff]  ;;  %v311_v34 = vld [vmem:[#allocation7 + $0x18] sm:$0xff]  ;;  %v308_v45 = vld [vmem:[#allocation7] sm:$0xff] }
  0x83   :  { %6398 = vmatpush1.bf16.msra.mxu0 %v7916_v7  ;;  %8994 = vst [vmem:[#allocation27_spill] sm:$0xff] %v7955_v60  ;;  %v315_v35 = vld [vmem:[#allocation7 + $0x38] sm:$0xff]  ;;  %v7979_v44 = vpack.c.bf16 %v313_v32, %v309_v30  ;;  %v312_v48 = vld [vmem:[#allocation7 + $0x20] sm:$0xff]  ;;  %v310_v50 = vld [vmem:[#allocation7 + $0x10] sm:$0xff] }
  0x84   :  { %v7982_v52 = vpack.c.bf16 %v315_v35, %v311_v34  ;;  %v314_v53 = vld [vmem:[#allocation7 + $0x30] sm:$0xff]  ;;  %v317_v54 = vld [vmem:[#allocation7 + $0x48] sm:$0xff] }
  0x85   :  { %8998 = vst [vmem:[#allocation31_spill] sm:$0xff] %v7979_v44  ;;  %v321_v57 = vld [vmem:[#allocation7 + $0x68] sm:$0xff]  ;;  %v906_v35 = vld [vmem:[%s8902_s8 + $0x8] sm:$0xff] }
  0x86   :  { %8999 = vst [vmem:[#allocation32_spill] sm:$0xff] %v7982_v52  ;;  %v905_v34 = vld [vmem:[%s8902_s8] sm:$0xff] }
 0x14a   :  { %v274_v13 = vpop.f32.mrb[0].mxu1 }
 0x14b   :  { %v5840_v14 = vpop.f32.mrb[1].mxu1 }
 0x14d   :  { %v200_v15 = vpop.f32.mrb[0].mxu0 }
 0x14e   :  { %v275_v17 = vadd.f32 %v274_v13, %v200_v15  ;;  %v5833_v18 = vpop.f32.mrb[1].mxu0  ;;  %v355_v13 = vld [vmem:[#allocation8 + $0xf8] sm:$0xff] }
 0x14f   :  { %v7921_v15 = vpack.c.bf16 %v355_v13, %v351_v12  ;;  %v354_v18 = vld [vmem:[#allocation8 + $0xf0] sm:$0xff]  ;;  %v385_v12 = vld [vmem:[#allocation8 + $0x1e8] sm:$0xff]  ;;  %v383_v13 = vld [vmem:[#allocation8 + $0x1d8] sm:$0xff] }
 0x150   :  { %v285_v19 = vadd.f32 %v7873_v16, %v275_v17  ;;  %v350_v17 = vld [vmem:[#allocation8 + $0xd0] sm:$0xff] }
 0x151   :  { %6400 = vmatprep.subr.bf16.mxu0 %v7921_v15 }
 0x152   :  { %7350 = vtanh.f32 %v285_v19  ;;  %v286_v21 = vmul.f32 0.5, %v285_v19  ;;  %v357_v19 = vld [vmem:[#allocation8 + $0x108] sm:$0xff] }
 0x154   :  { %7352 = vtanh.f32 %v286_v21  ;;  %v7925_v21 = vpack.c.bf16 %v352_v9, %v348_v5  ;;  %v378_v5 = vld [vmem:[#allocation8 + $0x1b0] sm:$0xff]  ;;  %v381_v9 = vld [vmem:[#allocation8 + $0x1c8] sm:$0xff] }
 0x156   :  { %8989 = vst [vmem:[#allocation22_spill] sm:$0xff] %v7925_v21  ;;  %6370 = vmatpush1.bf16.msra.mxu1 %v7925_v21 }
 0x15c   :  { %v7351_v20 = vpop.eup %7350 }
 0x15d   :  { %293 = vrot.lane.b32.xlu0 %v7351_v20, %s7682_s11  ;;  %v361_v20 = vld [vmem:[#allocation8 + $0x128] sm:$0xff] }
 0x15e   :  { %v7353_v22 = vpop.eup %7352 }
 0x15f   :  { %v288_v23 = vmul.f32 0.5, %v7353_v22  ;;  %v359_v22 = vld [vmem:[#allocation8 + $0x118] sm:$0xff] }
 0x161   :  { %v7877_v24 = vadd.f32 0.5, %v288_v23  ;;  %v363_v23 = vld [vmem:[#allocation8 + $0x138] sm:$0xff] }
 0x162   :  { %v7934_v31 = vpack.c.bf16 %v363_v23, %v359_v22  ;;  %v384_v22 = vld [vmem:[#allocation8 + $0x1e0] sm:$0xff]  ;;  %v382_v23 = vld [vmem:[#allocation8 + $0x1d0] sm:$0xff] }
 0x163   :  { %v291_v27 = vmul.f32 0.0, %v7877_v24 }
 0x1cf   :  { %v294_v25 = vpop.permute.xlu0 %293 }
 0x1d0   :  { %v296_v26 = vmul.f32 %v294_v25, %v7877_v24  ;;  %v7929_v25 = vpack.c.bf16 %v354_v18, %v350_v17  ;;  %v7961_v17 = vpack.c.bf16 %v376_v62, %v372_v61  ;;  %v7965_v18 = vpack.c.bf16 %v378_v5, %v374_v3  ;;  %v319_v61 = vld [vmem:[#allocation7 + $0x58] sm:$0xff] }
 0x1d1   :  { %v323_v62 = vld [vmem:[#allocation7 + $0x78] sm:$0xff]  ;;  %v7985_v3 = vpack.c.bf16 %v312_v48, %v308_v45  ;;  %v7989_v5 = vpack.c.bf16 %v314_v53, %v310_v50  ;;  %v8020_v45 = vpack.c.bf16 %v906_v35, %v905_v34  ;;  %v908_v53 = vld [vmem:[%s8902_s8 + $0x18] sm:$0xff] }
 0x1d2   :  { %298 = vrot.lane.b32.xlu0 %v296_v26, %s7675_s30  ;;  %v7931_v26 = vpack.c.bf16 %v361_v20, %v357_v19  ;;  %6402 = vmatpush1.bf16.msra.mxu0 %v7929_v25  ;;  %8995 = vst [vmem:[#allocation28_spill] sm:$0xff] %v7961_v17  ;;  %v7967_v19 = vpack.c.bf16 %v385_v12, %v381_v9  ;;  %v380_v20 = vld [vmem:[#allocation8 + $0x1c0] sm:$0xff]  ;;  %v895_v34 = vld [vmem:[#allocation11 + $0x30] sm:$0xff] }
 0x1d3   :  { %6404 = vmatprep.subr.bf16.mxu0 %v7934_v31  ;;  %v7973_v36 = vpack.c.bf16 %v384_v22, %v380_v20  ;;  %9000 = vst [vmem:[#allocation33_spill] sm:$0xff] %v7989_v5  ;;  %v7991_v9 = vpack.c.bf16 %v321_v57, %v317_v54  ;;  %v316_v12 = vld [vmem:[#allocation7 + $0x40] sm:$0xff]  ;;  %v318_v20 = vld [vmem:[#allocation7 + $0x50] sm:$0xff]  ;;  %9003 = vst [vmem:[#allocation36_spill] sm:$0xff] %v8020_v45 }
 0x1d4   :  { %8990 = vst [vmem:[#allocation23_spill] sm:$0xff] %v7931_v26  ;;  %6372 = vmatprep.subr.bf16.mxu1 %v7931_v26  ;;  %8996 = vst [vmem:[#allocation29_spill] sm:$0xff] %v7967_v19  ;;  %v322_v22 = vld [vmem:[#allocation7 + $0x70] sm:$0xff]  ;;  %v907_v50 = vld [vmem:[%s8902_s8 + $0x10] sm:$0xff] }
 0x1d5   :  { %8997 = vst [vmem:[#allocation30_spill] sm:$0xff] %v7973_v36  ;;  %v8048_v54 = vpack.c.bf16 %v908_v53, %v907_v50  ;;  %v889_v57 = vld [vmem:[#allocation11] sm:$0xff]  ;;  %v896_v35 = vld [vmem:[#allocation11 + $0x38] sm:$0xff]  ;;  %v898_v50 = vld [vmem:[#allocation11 + $0x48] sm:$0xff] }
 0x1d6   :  { %6406 = vmatpush1.bf16.msra.mxu0 %v7941_v41 }
 0x1d7   :  { %6408 = vmatprep.subr.bf16.mxu0 %v7946_v49  ;;  %9004 = vst [vmem:[#allocation37_spill] sm:$0xff] %v8048_v54 }
 0x1da   :  { %6410 = vmatpush1.bf16.msra.mxu0 %v7953_v59 }
 0x1db   :  { %6412 = vmatprep.subr.bf16.mxu0 %v7958_v4 }
 0x1de   :  { %6414 = vmatpush1.bf16.msra.mxu0 %v7965_v18 }
 0x244   :  { %v299_v28 = vpop.permute.xlu0 %298 }
 0x245   :  { %v7882_v29 = vadd.f32 %v299_v28, %v291_v27  ;;  %v356_v27 = vld [vmem:[#allocation8 + $0x100] sm:$0xff] }
 0x246   :  { %v360_v28 = vld [vmem:[#allocation8 + $0x120] sm:$0xff] }
 0x247   :  { %7354 = vtanh.f32 %v7882_v29  ;;  %v7937_v40 = vpack.c.bf16 %v360_v28, %v356_v27  ;;  %v386_v28 = vld [vmem:[#allocation8 + $0x1f0] sm:$0xff] }
 0x248   :  { %v7977_v39 = vpack.c.bf16 %v386_v28, %v382_v23  ;;  %v8003_v28 = vpack.c.bf16 %v322_v22, %v318_v20  ;;  %v893_v22 = vld [vmem:[#allocation11 + $0x20] sm:$0xff] }
 0x249   :  { %8991 = vst [vmem:[#allocation24_spill] sm:$0xff] %v7937_v40  ;;  %6374 = vmatpush1.bf16.msra.mxu1 %v7937_v40 }
 0x24a   :  { %6376 = vmatprep.subr.bf16.mxu1 %v7943_v43  ;;  %9002 = vst [vmem:[#allocation35_spill] sm:$0xff] %v8003_v28 }
 0x24d   :  { %6378 = vmatpush1.bf16.msra.mxu1 %v7949_v58 }
 0x24e   :  { %6380 = vmatprep.subr.bf16.mxu1 %v7955_v60 }
 0x251   :  { %v7355_v14 = vpop.eup %7354  ;;  %6382 = vmatpush1.bf16.msra.mxu1 %v7961_v17 }
 0x252   :  { %304 = vrot.lane.b32.xlu1 %v7355_v14, %s7682_s11  ;;  %v387_v14 = vld [vmem:[#allocation8 + $0x1f8] sm:$0xff]  ;;  %6384 = vmatprep.subr.bf16.mxu1 %v7967_v19 }
 0x253   :  { %v7970_v27 = vpack.c.bf16 %v387_v14, %v383_v13  ;;  %v320_v13 = vld [vmem:[#allocation7 + $0x60] sm:$0xff]  ;;  %v7994_v14 = vpack.c.bf16 %v323_v62, %v319_v61  ;;  %v890_v61 = vld [vmem:[#allocation11 + $0x8] sm:$0xff] }
 0x254   :  { %v7999_v23 = vpack.c.bf16 %v320_v13, %v316_v12  ;;  %v8051_v62 = vpack.c.bf16 %v890_v61, %v889_v57  ;;  %v891_v12 = vld [vmem:[#allocation11 + $0x10] sm:$0xff]  ;;  %v892_v13 = vld [vmem:[#allocation11 + $0x18] sm:$0xff] }
 0x255   :  { %6416 = vmatprep.subr.bf16.mxu0 %v7970_v27  ;;  %6386 = vmatpush1.bf16.msra.mxu1 %v7973_v36  ;;  %9001 = vst [vmem:[#allocation34_spill] sm:$0xff] %v7994_v14  ;;  %v8058_v20 = vpack.c.bf16 %v892_v13, %v891_v12  ;;  %v899_v57 = vld [vmem:[#allocation11 + $0x50] sm:$0xff]  ;;  %v900_v61 = vld [vmem:[#allocation11 + $0x58] sm:$0xff]  ;;  %v901_v13 = vld [vmem:[#allocation11 + $0x60] sm:$0xff] }
 0x256   :  { %6418 = vmatpush1.bf16.msra.mxu0 %v7977_v39  ;;  %6420 = vmatprep.subr.bf16.mxu1 %v7979_v44  ;;  %9005 = vst [vmem:[#allocation38_spill] sm:$0xff] %v8051_v62  ;;  %v8083_v12 = vpack.c.bf16 %v900_v61, %v899_v57 }
 0x257   :  { %6428 = vmatprep.subr.bf16.mxu0 %v7982_v52  ;;  %9006 = vst [vmem:[#allocation39_spill] sm:$0xff] %v8058_v20 }
 0x258   :  { %453 = vmatmul.mubr.f32.vlgmr.msra.gmra.mrb[2].mxu1 %v8909_v2  ;;  %9010 = vst [vmem:[#allocation43_spill] sm:$0xff] %v8083_v12 }
 0x259   :  { %524 = vmatmul.mubr.f32.vlgmr.msra.gmra.mrb[2].mxu0 %v8909_v2  ;;  %6422 = vmatpush1.bf16.msra.mxu1 %v7985_v3 }
 0x25a   :  { %6430 = vmatpush1.bf16.msra.mxu0 %v7989_v5  ;;  %6424 = vmatprep.subr.bf16.mxu1 %v7991_v9 }
 0x25b   :  { %6432 = vmatprep.subr.bf16.mxu0 %v7994_v14  ;;  %599 = vmatprep.mubr.f32.mxu1 %v8909_v2 }
 0x25c   :  { %670 = vmatprep.mubr.f32.mxu0 %v8909_v2 }
 0x25d   :  { %6426 = vmatpush1.bf16.msra.mxu1 %v7999_v23 }
 0x25e   :  { %6434 = vmatpush1.bf16.msra.mxu0 %v8003_v28  ;;  %6435 = vmatprep.subr.bf16.mxu1 %v8907_v1 }
 0x25f   :  { %6444 = vmatprep.subr.bf16.mxu0 %v8907_v1 }
 0x2c4   :  { %v305_v30 = vpop.permute.xlu1 %304 }
 0x2c5   :  { %v307_v32 = vmul.f32 %v305_v30, %v7877_v24  ;;  %v722_v24 = vld [vmem:[#allocation3 + $0x8] sm:$0xff]  ;;  %v894_v30 = vld [vmem:[#allocation11 + $0x28] sm:$0xff] }
 0x2c7   :  { %531 = vrot.lane.b32.xlu1 %v307_v32, %s7675_s30  ;;  %v8065_v32 = vpack.c.bf16 %v894_v30, %v893_v22  ;;  %v902_v22 = vld [vmem:[#allocation11 + $0x68] sm:$0xff] }
 0x2c8   :  { %v8089_v30 = vpack.c.bf16 %v902_v22, %v901_v13  ;;  %v677_v13 = vld [vmem:[#allocation10] sm:$0xf] }
 0x2c9   :  { %9007 = vst [vmem:[#allocation40_spill] sm:$0xff] %v8065_v32 }
 0x2ca   :  { %9011 = vst [vmem:[#allocation44_spill] sm:$0xff] %v8089_v30 }
 0x339   :  { %v532_v48 = vpop.permute.xlu1 %531 }
 0x33a   :  { %5538 = vmatmul.mubr.msk.f32.vlgmr.msra.gmra.mrb[2].mxu1 %vm130_vm2, %v532_v48  ;;  %5539 = vmatmul.mubr.msk.f32.vlgmr.msra.gmra.mrb[2].mxu0 %vm130_vm2, %v532_v48 }
 0x33b   :  { %6437 = vmatpush3.bf16.msra.mxu1 %v7850_v6  ;;  %5849 = vmatprep.mubr.msk.f32.mxu1 %vm7680_vm0, %v8909_v2 }
 0x33c   :  { %6438 = vmatprep.subr.bf16.mxu1 %v8907_v1  ;;  %6446 = vmatpush3.bf16.msra.mxu0 %v8020_v45 }
 0x33d   :  { %6447 = vmatprep.subr.bf16.mxu0 %v8907_v1  ;;  %5867 = vmatprep.mubr.msk.f32.mxu0 %vm7680_vm0, %v8909_v2 }
 0x33f   :  { %6440 = vmatpush3.bf16.msra.mxu1 %v7861_v11 }
 0x340   :  { %6441 = vmatprep.subr.bf16.mxu1 %v8907_v1  ;;  %6449 = vmatpush3.bf16.msra.mxu0 %v8048_v54 }
 0x341   :  { %6475 = vmatprep.subr.bf16.mxu0 %v7885_v33 }
 0x342   :  { %5850 = vmatmul.mubr.msk.f32.vlgmr.msra.gmra.mrb[4].mxu1 %vm130_vm2, %v532_v48  ;;  %v8071_v48 = vpack.c.bf16 %v896_v35, %v895_v34  ;;  %v903_v34 = vld [vmem:[#allocation11 + $0x70] sm:$0xff]  ;;  %v904_v35 = vld [vmem:[#allocation11 + $0x78] sm:$0xff] }
 0x343   :  { %6443 = vmatpush3.bf16.msra.mxu1 %v7858_v10  ;;  %5856 = vmatprep.mubr.msk.f32.mxu1 %vm7680_vm0, %v8909_v2 }
 0x344   :  { %6450 = vmatprep.subr.bf16.mxu1 %v8907_v1  ;;  %5868 = vmatmul.mubr.f32.vlgmr.msra.gmra.mrb[4].mxu0 %v8909_v2  ;;  %9008 = vst [vmem:[#allocation41_spill] sm:$0xff] %v8071_v48 }
 0x345   :  { %6477 = vmatpush1.bf16.msra.mxu0 %v7887_v37  ;;  %1143 = vmatprep.mubr.f32.mxu0 %v8909_v2 }
 0x346   :  { %5857 = vmatmul.mubr.msk.f32.vlgmr.msra.gmra.mrb[6].mxu1 %vm204_vm1, %v722_v24  ;;  %6479 = vmatprep.subr.bf16.mxu0 %v7896_v46  ;;  %v897_v24 = vld [vmem:[#allocation11 + $0x40] sm:$0xff] }
 0x347   :  { %5902 = vmatprep.mubr.msk.f32.mxu1 %vm7680_vm0, %v8909_v2  ;;  %6452 = vmatpush3.bf16.msra.mxu1 %v8051_v62  ;;  %v8077_v53 = vpack.c.bf16 %v898_v50, %v897_v24  ;;  %v8095_v24 = vpack.c.bf16 %v904_v35, %v903_v34  ;;  %v679_v50 = vlaneseq }
 0x348   :  { %6453 = vmatprep.subr.bf16.mxu1 %v8907_v1 }
 0x349   :  { %6481 = vmatpush1.bf16.msra.mxu0 %v7898_v47  ;;  %9009 = vst [vmem:[#allocation42_spill] sm:$0xff] %v8077_v53  ;;  %9012 = vst [vmem:[#allocation45_spill] sm:$0xff] %v8095_v24  ;;  %v680_v57 = vshrl.u32 %v679_v50, 7 }
 0x34a   :  { %6483 = vmatprep.subr.bf16.mxu0 %v7906_v56 }
 0x34b   :  { %6455 = vmatpush3.bf16.msra.mxu1 %v8058_v20  ;;  %v681_v61 = vsub.s32 0, %v680_v57  ;;  %v685_v22 = vsub.s32 1, %v680_v57  ;;  %v689_v2 = vsub.s32 2, %v680_v57 }
 0x34c   :  { %6456 = vmatprep.subr.bf16.mxu1 %v8907_v1 }
 0x34d   :  { %6485 = vmatpush1.bf16.msra.mxu0 %v7910_v63  ;;  %v8104_v34 = vrot.slane %v677_v13, %v685_v22 }
 0x34e   :  { %6487 = vmatprep.subr.bf16.mxu0 %v7918_v8 }
 0x34f   :  { %6458 = vmatpush3.bf16.msra.mxu1 %v8065_v32  ;;  %9014 = vst [vmem:[#allocation47_spill] sm:$0xff] %v8104_v34 }
 0x350   :  { %6459 = vmatprep.subr.bf16.mxu1 %v8907_v1 }
 0x351   :  { %6489 = vmatpush1.bf16.msra.mxu0 %v7925_v21 }
 0x352   :  { %6491 = vmatprep.subr.bf16.mxu0 %v7931_v26 }
 0x353   :  { %6461 = vmatpush3.bf16.msra.mxu1 %v8071_v48 }
 0x354   :  { %6462 = vmatprep.subr.bf16.mxu1 %v8907_v1 }
 0x355   :  { %6493 = vmatpush1.bf16.msra.mxu0 %v7937_v40 }
 0x356   :  { %6495 = vmatprep.subr.bf16.mxu0 %v7943_v43 }
 0x357   :  { %6464 = vmatpush3.bf16.msra.mxu1 %v8077_v53  ;;  %v8107_v53 = vrot.slane %v677_v13, %v689_v2 }
 0x358   :  { %6465 = vmatprep.subr.bf16.mxu1 %v8907_v1 }
 0x359   :  { %6497 = vmatpush1.bf16.msra.mxu0 %v7949_v58 }
 0x35a   :  { %6499 = vmatprep.subr.bf16.mxu0 %v7955_v60 }
 0x35b   :  { %6467 = vmatpush3.bf16.msra.mxu1 %v8083_v12  ;;  %v693_v12 = vsub.s32 3, %v680_v57 }
 0x35c   :  { %6468 = vmatprep.subr.bf16.mxu1 %v8907_v1 }
 0x35d   :  { %6501 = vmatpush1.bf16.msra.mxu0 %v7961_v17  ;;  %v8110_v62 = vrot.slane %v677_v13, %v693_v12 }
 0x35e   :  { %6503 = vmatprep.subr.bf16.mxu0 %v7967_v19 }
 0x35f   :  { %6470 = vmatpush3.bf16.msra.mxu1 %v8089_v30  ;;  %9015 = vst [vmem:[#allocation48_spill] sm:$0xff] %v8110_v62 }
 0x360   :  { %6471 = vmatprep.subr.bf16.mxu1 %v8907_v1  ;;  %v8102_v1 = vrot.slane %v677_v13, %v681_v61 }
 0x361   :  { %6505 = vmatpush1.bf16.msra.mxu0 %v7973_v36 }
 0x362   :  { %6539 = vmatprep.subr.bf16.mxu0 %v7979_v44  ;;  %9013 = vst [vmem:[#allocation46_spill] sm:$0xff] %v8102_v1 }
 0x363   :  { %6473 = vmatpush3.bf16.msra.mxu1 %v8095_v24 }
 0x364   :  { %6507 = vmatprep.subr.bf16.mxu1 %v7889_v38 }
 0x40d   :  { %v601_v35 = vpop.f32.mrb[2].mxu1  ;;  %v672_v30 = vpop.f32.mrb[2].mxu0 }
 0x40e   :  { %v699_v24 = vadd.f32 %v8102_v1, %v601_v35  ;;  %v603_v38 = vpop.f32.mrb[3].mxu1  ;;  %v674_v48 = vpop.f32.mrb[3].mxu0  ;;  %v701_v61 = vadd.f32 %v8107_v53, %v672_v30 }
 0x40f   :  { %v700_v32 = vadd.f32 %v8104_v34, %v603_v38  ;;  %v702_v22 = vadd.f32 %v8110_v62, %v674_v48 }
 0x410   :  { %v703_v50 = vmul.f32 0.5, %v699_v24 }
 0x411   :  { %v707_v20 = vmul.f32 0.5, %v700_v32  ;;  %v712_v35 = vmul.f32 0.5, %v702_v22 }
 0x412   :  { %7356 = vtanh.f32 %v703_v50 }
 0x413   :  { %7358 = vtanh.f32 %v707_v20 }
 0x414   :  { %7360 = vtanh.f32 %v701_v61 }
 0x415   :  { %v789_v44 = vpop.f32.mrb[4].mxu1  ;;  %7362 = vtanh.f32 %v712_v35  ;;  %v9017_v35 = vmov 0.0|0.0  }
 0x416   :  { %v5851_v57 = vpop.f32.mrb[5].mxu1 }
 0x417   :  { %v9016_v57 = vmov 0.0  }
 0x419   :  { %v862_v2 = vpop.f32.mrb[6].mxu1 }
 0x41a   :  { %v863_v1 = vadd.f32 %v862_v2, %v789_v44  ;;  %v5858_v36 = vpop.f32.mrb[7].mxu1  ;;  %v975_v2 = vpop.f32.mrb[4].mxu0 }
 0x41c   :  { %v7357_v19 = vpop.eup %7356  ;;  %v866_v38 = vadd.f32 %v7873_v16, %v863_v1 }
 0x41d   :  { %v7359_v24 = vpop.eup %7358  ;;  %v705_v32 = vmul.f32 0.5, %v7357_v19 }
 0x41e   :  { %v709_v12 = vmul.f32 0.5, %v7359_v24  ;;  %7364 = vtanh.f32 %v866_v38  ;;  %v7361_v30 = vpop.eup %7360  ;;  %v5869_v24 = vpop.f32.mrb[5].mxu0 }
 0x41f   :  { %v706_v13 = vadd.f32 0.5, %v705_v32  ;;  %v7363_v61 = vpop.eup %7362  ;;  %v867_v32 = vmul.f32 0.5, %v866_v38 }
 0x420   :  { %v710_v20 = vadd.f32 0.5, %v709_v12  ;;  %v714_v36 = vmul.f32 0.5, %v7363_v61 }
 0x421   :  { %v717_v50 = vmul.f32 %v7361_v30, %v706_v13 }
 0x422   :  { %v716_v48 = vmul.f32 0.0, %v710_v20  ;;  %v715_v1 = vadd.f32 0.5, %v714_v36 }
 0x424   :  { %v8115_v62 = vadd.f32 %v717_v50, %v716_v48 }
 0x426   :  { %7366 = vtanh.f32 %v8115_v62 }
 0x427   :  { %7368 = vtanh.f32 %v867_v32 }
 0x428   :  { %v7365_v44 = vpop.eup %7364 }
 0x429   :  { %874 = vrot.lane.b32.xlu0 %v7365_v44, %s7682_s11 }
 0x430   :  { %v7367_v22 = vpop.eup %7366 }
 0x431   :  { %v720_v19 = vmul.f32 %v7367_v22, %v715_v1  ;;  %v7369_v12 = vpop.eup %7368  ;;  %v8151_v1 = vld [vmem:[%s8903_s9] ss:$0 sm:$0xff] }
 0x432   :  { %v869_v13 = vmul.f32 0.5, %v7369_v12 }
 0x433   :  { %5903 = vmatmul.mubr.f32.vlgmr.msra.gmra.mrb[8].mxu1 %v720_v19  ;;  %1144 = vmatmul.mubr.f32.vlgmr.msra.gmra.mrb[6].mxu0 %v720_v19 }
 0x434   :  { %6509 = vmatpush1.bf16.msra.mxu1 %v7892_v42  ;;  %1214 = vmatprep.mubr.f32.mxu1 %v9016_v57  ;;  %v870_v30 = vadd.f32 0.5, %v869_v13 }
 0x435   :  { %6511 = vmatprep.subr.bf16.mxu1 %v7901_v51  ;;  %6541 = vmatpush1.bf16.msra.mxu0 %v7985_v3 }
 0x436   :  { %6543 = vmatprep.subr.bf16.mxu0 %v7991_v9  ;;  %1290 = vmatprep.mubr.f32.mxu0 %v9016_v57  ;;  %v872_v36 = vmul.f32 %v870_v30, %v7882_v29 }
 0x438   :  { %6513 = vmatpush1.bf16.msra.mxu1 %v7904_v55 }
 0x439   :  { %6515 = vmatprep.subr.bf16.mxu1 %v7912_v0  ;;  %6545 = vmatpush1.bf16.msra.mxu0 %v7999_v23 }
 0x43a   :  { %6554 = vmatprep.subr.bf16.mxu0 %v9017_v35 }
 0x43c   :  { %6517 = vmatpush1.bf16.msra.mxu1 %v7916_v7 }
 0x43d   :  { %6519 = vmatprep.subr.bf16.mxu1 %v7921_v15 }
 0x440   :  { %6521 = vmatpush1.bf16.msra.mxu1 %v7929_v25 }
 0x441   :  { %6523 = vmatprep.subr.bf16.mxu1 %v7934_v31 }
 0x444   :  { %6525 = vmatpush1.bf16.msra.mxu1 %v7941_v41 }
 0x445   :  { %6527 = vmatprep.subr.bf16.mxu1 %v7946_v49 }
 0x448   :  { %6529 = vmatpush1.bf16.msra.mxu1 %v7953_v59 }
 0x449   :  { %6531 = vmatprep.subr.bf16.mxu1 %v7958_v4 }
 0x44c   :  { %6533 = vmatpush1.bf16.msra.mxu1 %v7965_v18 }
 0x44d   :  { %6535 = vmatprep.subr.bf16.mxu1 %v7970_v27 }
 0x450   :  { %6537 = vmatpush1.bf16.msra.mxu1 %v7977_v39 }
 0x451   :  { %6547 = vmatprep.subr.bf16.mxu1 %v7982_v52 }
 0x453   :  { %1215 = vmatmul.mubr.f32.vlgmr.msra.gmra.mrb[10].mxu1 %v720_v19 }
 0x454   :  { %6549 = vmatpush1.bf16.msra.mxu1 %v7989_v5  ;;  %1361 = vmatprep.mubr.f32.mxu1 %v9016_v57 }
 0x455   :  { %6551 = vmatprep.subr.bf16.mxu1 %v7994_v14 }
 0x458   :  { %6553 = vmatpush1.bf16.msra.mxu1 %v8003_v28 }
 0x459   :  { %6594 = vmatprep.subr.bf16.mxu1 %v7885_v33 }
 0x49b   :  { %v875_v20 = vpop.permute.xlu0 %874 }
 0x49c   :  { %v877_v50 = vmul.f32 %v875_v20, %v870_v30 }
 0x49e   :  { %879 = vrot.lane.b32.xlu1 %v877_v50, %s7675_s30 }
 0x506   :  { %v1045_v48 = vpop.f32.mrb[8].mxu1 }
 0x507   :  { %v1046_v61 = vadd.f32 %v1045_v48, %v975_v2  ;;  %v5904_v44 = vpop.f32.mrb[9].mxu1 }
 0x509   :  { %v1056_v19 = vadd.f32 %v8151_v1, %v1046_v61 }
 0x50b   :  { %v1057_v29 = vmul.f32 0.5, %v1056_v19 }
 0x510   :  { %v880_v22 = vpop.permute.xlu1 %879 }
 0x511   :  { %v8153_v38 = vadd.f32 %v880_v22, %v872_v36 }
 0x513   :  { %7370 = vtanh.f32 %v8153_v38 }
 0x514   :  { %7372 = vtanh.f32 %v1056_v19  ;;  %v1391_v19 = vld [vmem:[#allocation3 + $0x10] sm:$0xff] }
 0x515   :  { %7374 = vtanh.f32 %v1057_v29  ;;  %v9020_v29 = vld [vmem:[#allocation30_spill] sm:$0xff] }
 0x51d   :  { %v7371_v24 = vpop.eup %7370 }
 0x51e   :  { %885 = vrot.lane.b32.xlu0 %v7371_v24, %s7682_s11  ;;  %v7373_v2 = vpop.eup %7372 }
 0x51f   :  { %v7375_v32 = vpop.eup %7374 }
 0x520   :  { %v1059_v12 = vmul.f32 0.5, %v7375_v32  ;;  %v9021_v32 = vld [vmem:[#allocation31_spill] sm:$0xff] }
 0x522   :  { %1064 = vrot.lane.b32.xlu0 %v7373_v2, %s7682_s11  ;;  %v1060_v50 = vadd.f32 0.5, %v1059_v12  ;;  %v9019_v2 = vld [vmem:[#allocation29_spill] sm:$0xff] }
 0x590   :  { %v886_v13 = vpop.permute.xlu0 %885 }
 0x591   :  { %v888_v20 = vmul.f32 %v886_v13, %v870_v30  ;;  %v1062_v30 = vmul.f32 0.0, %v1060_v50 }
 0x593   :  { %1222 = vrot.lane.b32.xlu1 %v888_v20, %s7675_s30 }
 0x594   :  { %v1065_v48 = vpop.permute.xlu0 %1064 }
 0x595   :  { %v1067_v61 = vmul.f32 %v1065_v48, %v1060_v50 }
 0x597   :  { %1069 = vrot.lane.b32.xlu1 %v1067_v61, %s7675_s30  ;;  %v9022_v61 = vld [vmem:[#allocation46_spill] sm:$0xff] }
 0x605   :  { %v1223_v44 = vpop.permute.xlu1 %1222 }
 0x606   :  { %5543 = vmatmul.mubr.msk.f32.vlgmr.msra.gmra.mrb[6].mxu0 %vm130_vm2, %v1223_v44  ;;  %5544 = vmatmul.mubr.msk.f32.vlgmr.msra.gmra.mrb[10].mxu1 %vm130_vm2, %v1223_v44 }
 0x607   :  { %6556 = vmatpush3.bf16.msra.mxu0 %v7850_v6  ;;  %5913 = vmatprep.mubr.msk.f32.mxu0 %vm7680_vm0, %v9016_v57 }
 0x608   :  { %6557 = vmatprep.subr.bf16.mxu0 %v9017_v35  ;;  %6596 = vmatpush1.bf16.msra.mxu1 %v7887_v37 }
 0x609   :  { %v1070_v36 = vpop.permute.xlu1 %1069  ;;  %6598 = vmatprep.subr.bf16.mxu1 %v7896_v46  ;;  %1790 = vmatprep.mubr.f32.mxu1 %v9016_v57 }
 0x60a   :  { %v8170_v22 = vadd.f32 %v1070_v36, %v1062_v30 }
 0x60b   :  { %6559 = vmatpush3.bf16.msra.mxu0 %v7861_v11 }
 0x60c   :  { %9018 = vst [vmem:[#allocation49_spill] sm:$0xff] %v8170_v22  ;;  %7376 = vtanh.f32 %v8170_v22  ;;  %6560 = vmatprep.subr.bf16.mxu0 %v9017_v35  ;;  %6600 = vmatpush1.bf16.msra.mxu1 %v7898_v47 }
 0x60d   :  { %6602 = vmatprep.subr.bf16.mxu1 %v7906_v56 }
 0x60e   :  { %5914 = vmatmul.mubr.msk.f32.vlgmr.msra.gmra.mrb[8].mxu0 %vm130_vm2, %v1223_v44 }
 0x60f   :  { %6562 = vmatpush3.bf16.msra.mxu0 %v7858_v10  ;;  %5920 = vmatprep.mubr.msk.f32.mxu0 %vm7680_vm0, %v9016_v57 }
 0x610   :  { %6604 = vmatpush1.bf16.msra.mxu1 %v7910_v63  ;;  %6563 = vmatprep.subr.bf16.mxu0 %v9017_v35 }
 0x611   :  { %6606 = vmatprep.subr.bf16.mxu1 %v7918_v8 }
 0x612   :  { %5921 = vmatmul.mubr.msk.f32.vlgmr.msra.gmra.mrb[10].mxu0 %vm204_vm1, %v1391_v19 }
 0x613   :  { %6565 = vmatpush3.bf16.msra.mxu0 %v8020_v45  ;;  %5931 = vmatprep.mubr.msk.f32.mxu0 %vm7680_vm0, %v9016_v57 }
 0x614   :  { %6608 = vmatpush1.bf16.msra.mxu1 %v7925_v21  ;;  %6566 = vmatprep.subr.bf16.mxu0 %v9017_v35 }
 0x615   :  { %6610 = vmatprep.subr.bf16.mxu1 %v7931_v26 }
 0x616   :  { %v7377_v24 = vpop.eup %7376 }
 0x617   :  { %1075 = vrot.lane.b32.xlu0 %v7377_v24, %s7682_s11  ;;  %6568 = vmatpush3.bf16.msra.mxu0 %v8048_v54 }
 0x618   :  { %6612 = vmatpush1.bf16.msra.mxu1 %v7937_v40  ;;  %6569 = vmatprep.subr.bf16.mxu0 %v9017_v35 }
 0x619   :  { %6614 = vmatprep.subr.bf16.mxu1 %v7943_v43 }
 0x61c   :  { %6616 = vmatpush1.bf16.msra.mxu1 %v7949_v58 }
 0x61d   :  { %6618 = vmatprep.subr.bf16.mxu1 %v7955_v60 }
 0x620   :  { %6620 = vmatpush1.bf16.msra.mxu1 %v7961_v17 }
 0x621   :  { %6622 = vmatprep.subr.bf16.mxu1 %v9019_v2 }
 0x624   :  { %6624 = vmatpush1.bf16.msra.mxu1 %v9020_v29  ;;  %v9023_v29 = vld [vmem:[#allocation48_spill] sm:$0xff] }
 0x625   :  { %6658 = vmatprep.subr.bf16.mxu1 %v9021_v32 }
 0x689   :  { %v1076_v12 = vpop.permute.xlu0 %1075 }
 0x68a   :  { %v1078_v13 = vmul.f32 %v1076_v12, %v1060_v50 }
 0x68c   :  { %1559 = vrot.lane.b32.xlu1 %v1078_v13, %s7675_s30 }
 0x6d9   :  { %v1292_v20 = vpop.f32.mrb[6].mxu0  ;;  %v1363_v48 = vpop.f32.mrb[10].mxu1 }
 0x6da   :  { %v1368_v44 = vadd.f32 %v1292_v20, %v9022_v61  ;;  %v1294_v30 = vpop.f32.mrb[7].mxu0  ;;  %v1365_v36 = vpop.f32.mrb[11].mxu1  ;;  %v1370_v2 = vadd.f32 %v1363_v48, %v8107_v53 }
 0x6db   :  { %v1369_v19 = vadd.f32 %v1294_v30, %v8104_v34  ;;  %v1371_v32 = vadd.f32 %v1365_v36, %v9023_v29 }
 0x6dc   :  { %v1372_v24 = vmul.f32 0.5, %v1368_v44 }
 0x6dd   :  { %v1376_v17 = vmul.f32 0.5, %v1369_v19  ;;  %v1381_v12 = vmul.f32 0.5, %v1371_v32 }
 0x6de   :  { %7378 = vtanh.f32 %v1372_v24 }
 0x6df   :  { %7380 = vtanh.f32 %v1376_v17 }
 0x6e0   :  { %7382 = vtanh.f32 %v1370_v2 }
 0x6e1   :  { %v1458_v60 = vpop.f32.mrb[8].mxu0  ;;  %7384 = vtanh.f32 %v1381_v12 }
 0x6e2   :  { %v5915_v50 = vpop.f32.mrb[9].mxu0 }
 0x6e5   :  { %v1531_v13 = vpop.f32.mrb[10].mxu0 }
 0x6e6   :  { %v1532_v58 = vadd.f32 %v1531_v13, %v1458_v60  ;;  %v5922_v22 = vpop.f32.mrb[11].mxu0 }
 0x6e8   :  { %v7379_v20 = vpop.eup %7378  ;;  %v8208_v61 = vadd.f32 %v7873_v16, %v1532_v58 }
 0x6e9   :  { %v7381_v30 = vpop.eup %7380  ;;  %v1374_v44 = vmul.f32 0.5, %v7379_v20  ;;  %v9024_v20 = vld [vmem:[#allocation38_spill] sm:$0xff] }
 0x6ea   :  { %v1378_v19 = vmul.f32 0.5, %v7381_v30  ;;  %7386 = vtanh.f32 %v8208_v61  ;;  %v7383_v48 = vpop.eup %7382  ;;  %v9026_v30 = vld [vmem:[#allocation40_spill] sm:$0xff] }
 0x6eb   :  { %v1375_v17 = vadd.f32 0.5, %v1374_v44  ;;  %v7385_v60 = vpop.eup %7384  ;;  %v9027_v44 = vld [vmem:[#allocation41_spill] sm:$0xff] }
 0x6ec   :  { %v1379_v36 = vadd.f32 0.5, %v1378_v19  ;;  %v1383_v16 = vmul.f32 0.5, %v7385_v60  ;;  %v9028_v19 = vld [vmem:[#allocation42_spill] sm:$0xff] }
 0x6ed   :  { %v1386_v24 = vmul.f32 %v7383_v48, %v1375_v17  ;;  %v9029_v17 = vld [vmem:[#allocation43_spill] sm:$0xff]  ;;  %v9030_v48 = vld [vmem:[#allocation44_spill] sm:$0xff] }
 0x6ee   :  { %v1385_v2 = vmul.f32 %v1379_v36, %v8115_v62  ;;  %v1384_v58 = vadd.f32 0.5, %v1383_v16  ;;  %v9025_v62 = vld [vmem:[#allocation39_spill] sm:$0xff]  ;;  %v9031_v36 = vld [vmem:[#allocation45_spill] sm:$0xff] }
 0x6f0   :  { %v8212_v32 = vadd.f32 %v1386_v24, %v1385_v2  ;;  %v9032_v24 = vld [vmem:[#allocation19_spill] sm:$0xff]  ;;  %v1536_v2 = vmul.f32 0.5, %v8208_v61 }
 0x6f2   :  { %7388 = vtanh.f32 %v8212_v32 }
 0x6f3   :  { %7390 = vtanh.f32 %v1536_v2 }
 0x6f4   :  { %v7387_v22 = vpop.eup %7386 }
 0x6f5   :  { %1543 = vrot.lane.b32.xlu0 %v7387_v22, %s7682_s11 }
 0x6fc   :  { %v7389_v50 = vpop.eup %7388 }
 0x6fd   :  { %v1389_v12 = vmul.f32 %v7389_v50, %v1384_v58  ;;  %v7391_v60 = vpop.eup %7390 }
 0x6fe   :  { %v1560_v13 = vpop.permute.xlu1 %1559  ;;  %v1538_v22 = vmul.f32 0.5, %v7391_v60 }
 0x6ff   :  { %5932 = vmatmul.mubr.msk.f32.vlgmr.msra.gmra.mrb[12].mxu0 %vm130_vm2, %v1560_v13  ;;  %1791 = vmatmul.mubr.f32.vlgmr.msra.gmra.mrb[12].mxu1 %v1389_v12 }
 0x700   :  { %6571 = vmatpush3.bf16.msra.mxu0 %v9024_v20  ;;  %5966 = vmatprep.mubr.msk.f32.mxu0 %vm7680_vm0, %v9016_v57  ;;  %v1539_v16 = vadd.f32 0.5, %v1538_v22 }
 0x701   :  { %6572 = vmatprep.subr.bf16.mxu0 %v9017_v35  ;;  %6660 = vmatpush1.bf16.msra.mxu1 %v7985_v3 }
 0x702   :  { %6662 = vmatprep.subr.bf16.mxu1 %v7991_v9  ;;  %1937 = vmatprep.mubr.f32.mxu1 %v9016_v57 }
 0x704   :  { %6574 = vmatpush3.bf16.msra.mxu0 %v9025_v62 }
 0x705   :  { %6575 = vmatprep.subr.bf16.mxu0 %v9017_v35  ;;  %6664 = vmatpush1.bf16.msra.mxu1 %v7999_v23 }
 0x706   :  { %6673 = vmatprep.subr.bf16.mxu1 %v9017_v35 }
 0x708   :  { %6577 = vmatpush3.bf16.msra.mxu0 %v9026_v30 }
 0x709   :  { %6578 = vmatprep.subr.bf16.mxu0 %v9017_v35 }
 0x70c   :  { %6580 = vmatpush3.bf16.msra.mxu0 %v9027_v44 }
 0x70d   :  { %6581 = vmatprep.subr.bf16.mxu0 %v9017_v35 }
 0x710   :  { %6583 = vmatpush3.bf16.msra.mxu0 %v9028_v19 }
 0x711   :  { %6584 = vmatprep.subr.bf16.mxu0 %v9017_v35 }
 0x714   :  { %6586 = vmatpush3.bf16.msra.mxu0 %v9029_v17 }
 0x715   :  { %6587 = vmatprep.subr.bf16.mxu0 %v9017_v35 }
 0x718   :  { %6589 = vmatpush3.bf16.msra.mxu0 %v9030_v48 }
 0x719   :  { %6590 = vmatprep.subr.bf16.mxu0 %v9017_v35 }
 0x71c   :  { %6592 = vmatpush3.bf16.msra.mxu0 %v9031_v36 }
 0x71d   :  { %6626 = vmatprep.subr.bf16.mxu0 %v9032_v24 }
 0x71f   :  { %5967 = vmatmul.mubr.f32.vlgmr.msra.gmra.mrb[14].mxu0 %v1389_v12 }
 0x720   :  { %6628 = vmatpush1.bf16.msra.mxu0 %v7892_v42  ;;  %1861 = vmatprep.mubr.f32.mxu0 %v9016_v57 }
 0x721   :  { %6630 = vmatprep.subr.bf16.mxu0 %v7901_v51 }
 0x724   :  { %6632 = vmatpush1.bf16.msra.mxu0 %v7904_v55 }
 0x725   :  { %6634 = vmatprep.subr.bf16.mxu0 %v7912_v0 }
 0x728   :  { %6636 = vmatpush1.bf16.msra.mxu0 %v7916_v7 }
 0x729   :  { %6638 = vmatprep.subr.bf16.mxu0 %v7921_v15 }
 0x72c   :  { %6640 = vmatpush1.bf16.msra.mxu0 %v7929_v25 }
 0x72d   :  { %6642 = vmatprep.subr.bf16.mxu0 %v7934_v31 }
 0x730   :  { %6644 = vmatpush1.bf16.msra.mxu0 %v7941_v41 }
 0x731   :  { %6646 = vmatprep.subr.bf16.mxu0 %v7946_v49 }
 0x734   :  { %6648 = vmatpush1.bf16.msra.mxu0 %v7953_v59 }
 0x735   :  { %6650 = vmatprep.subr.bf16.mxu0 %v7958_v4 }
 0x738   :  { %6652 = vmatpush1.bf16.msra.mxu0 %v7965_v18 }
 0x739   :  { %6654 = vmatprep.subr.bf16.mxu0 %v7970_v27 }
 0x73c   :  { %6656 = vmatpush1.bf16.msra.mxu0 %v7977_v39 }
 0x73d   :  { %6666 = vmatprep.subr.bf16.mxu0 %v7982_v52 }
 0x73f   :  { %1862 = vmatmul.mubr.f32.vlgmr.msra.gmra.mrb[16].mxu0 %v1389_v12 }
 0x740   :  { %6668 = vmatpush1.bf16.msra.mxu0 %v7989_v5  ;;  %2008 = vmatprep.mubr.f32.mxu0 %v9016_v57  ;;  %v1541_v5 = vmul.f32 %v1539_v16, %v8153_v38 }
 0x741   :  { %6670 = vmatprep.subr.bf16.mxu0 %v7994_v14 }
 0x744   :  { %6672 = vmatpush1.bf16.msra.mxu0 %v8003_v28 }
 0x745   :  { %6713 = vmatprep.subr.bf16.mxu0 %v7885_v33 }
 0x767   :  { %v1544_v58 = vpop.permute.xlu0 %1543 }
 0x768   :  { %v1546_v50 = vmul.f32 %v1544_v58, %v1539_v16 }
 0x76a   :  { %1548 = vrot.lane.b32.xlu1 %v1546_v50, %s7675_s30 }
 0x7d2   :  { %v1629_v12 = vpop.f32.mrb[12].mxu0 }
 0x7d3   :  { %v5933_v13 = vpop.f32.mrb[13].mxu0 }
 0x7dc   :  { %v1549_v52 = vpop.permute.xlu1 %1548 }
 0x7dd   :  { %v8265_v14 = vadd.f32 %v1549_v52, %v1541_v5 }
 0x7df   :  { %9033 = vst [vmem:[#allocation48_spill] sm:$0xff] %v8265_v14  ;;  %7392 = vtanh.f32 %v8265_v14 }
 0x7e9   :  { %v7393_v33 = vpop.eup %7392 }
 0x7ea   :  { %1554 = vrot.lane.b32.xlu0 %v7393_v33, %s7682_s11 }
 0x7f2   :  { %v1699_v61 = vpop.f32.mrb[14].mxu0 }
 0x7f3   :  { %v1700_v2 = vadd.f32 %v1699_v61, %v1629_v12  ;;  %v5968_v60 = vpop.f32.mrb[15].mxu0 }
 0x7f5   :  { %v1703_v22 = vadd.f32 %v8151_v1, %v1700_v2  ;;  %v9035_v2 = vld [vmem:[#allocation26_spill] sm:$0xff] }
 0x7f7   :  { %7394 = vtanh.f32 %v1703_v22  ;;  %v1704_v38 = vmul.f32 0.5, %v1703_v22  ;;  %v9036_v22 = vld [vmem:[#allocation27_spill] sm:$0xff] }
 0x7f9   :  { %7396 = vtanh.f32 %v1704_v38  ;;  %v9040_v38 = vld [vmem:[#allocation30_spill] sm:$0xff] }
 0x801   :  { %v7395_v58 = vpop.eup %7394 }
 0x802   :  { %1711 = vrot.lane.b32.xlu0 %v7395_v58, %s7682_s11 }
 0x803   :  { %v7397_v52 = vpop.eup %7396 }
 0x804   :  { %v1706_v5 = vmul.f32 0.5, %v7397_v52  ;;  %v9041_v52 = vld [vmem:[#allocation31_spill] sm:$0xff] }
 0x806   :  { %v1707_v14 = vadd.f32 0.5, %v1706_v5 }
 0x85c   :  { %v1555_v50 = vpop.permute.xlu0 %1554 }
 0x85d   :  { %v1557_v13 = vmul.f32 %v1555_v50, %v1539_v16  ;;  %v9034_v16 = vld [vmem:[#allocation49_spill] sm:$0xff]  ;;  %v9038_v50 = vld [vmem:[#allocation28_spill] sm:$0xff] }
 0x85e   :  { %v1709_v61 = vmul.f32 %v1707_v14, %v9034_v16 }
 0x85f   :  { %1869 = vrot.lane.b32.xlu1 %v1557_v13, %s7675_s30  ;;  %v9039_v13 = vld [vmem:[#allocation29_spill] sm:$0xff] }
 0x874   :  { %v1712_v28 = vpop.permute.xlu0 %1711 }
 0x875   :  { %v1714_v33 = vmul.f32 %v1712_v28, %v1707_v14  ;;  %v2038_v28 = vld [vmem:[#allocation3 + $0x18] sm:$0xff] }
 0x877   :  { %1716 = vrot.lane.b32.xlu1 %v1714_v33, %s7675_s30 }
 0x8d1   :  { %v1870_v12 = vpop.permute.xlu1 %1869 }
 0x8d2   :  { %5548 = vmatmul.mubr.msk.f32.vlgmr.msra.gmra.mrb[12].mxu1 %vm130_vm2, %v1870_v12  ;;  %5549 = vmatmul.mubr.msk.f32.vlgmr.msra.gmra.mrb[16].mxu0 %vm130_vm2, %v1870_v12 }
 0x8d3   :  { %6675 = vmatpush3.bf16.msra.mxu1 %v7850_v6  ;;  %5977 = vmatprep.mubr.msk.f32.mxu1 %vm7680_vm0, %v9016_v57 }
 0x8d4   :  { %6676 = vmatprep.subr.bf16.mxu1 %v9017_v35  ;;  %6715 = vmatpush1.bf16.msra.mxu0 %v7887_v37 }
 0x8d5   :  { %6717 = vmatprep.subr.bf16.mxu0 %v7896_v46  ;;  %2437 = vmatprep.mubr.f32.mxu0 %v9016_v57 }
 0x8d7   :  { %6678 = vmatpush3.bf16.msra.mxu1 %v7861_v11 }
 0x8d8   :  { %6679 = vmatprep.subr.bf16.mxu1 %v9017_v35  ;;  %6719 = vmatpush1.bf16.msra.mxu0 %v7898_v47 }
 0x8d9   :  { %6721 = vmatprep.subr.bf16.mxu0 %v7906_v56 }
 0x8da   :  { %5978 = vmatmul.mubr.msk.f32.vlgmr.msra.gmra.mrb[14].mxu1 %vm130_vm2, %v1870_v12 }
 0x8db   :  { %6681 = vmatpush3.bf16.msra.mxu1 %v7858_v10  ;;  %5984 = vmatprep.mubr.msk.f32.mxu1 %vm7680_vm0, %v9016_v57 }
 0x8dc   :  { %6723 = vmatpush1.bf16.msra.mxu0 %v7910_v63  ;;  %6682 = vmatprep.subr.bf16.mxu1 %v9017_v35 }
 0x8dd   :  { %6725 = vmatprep.subr.bf16.mxu0 %v7918_v8 }
 0x8de   :  { %5985 = vmatmul.mubr.msk.f32.vlgmr.msra.gmra.mrb[16].mxu1 %vm204_vm1, %v2038_v28 }
 0x8df   :  { %6684 = vmatpush3.bf16.msra.mxu1 %v8020_v45  ;;  %5995 = vmatprep.mubr.msk.f32.mxu1 %vm7680_vm0, %v9016_v57 }
 0x8e0   :  { %6727 = vmatpush1.bf16.msra.mxu0 %v7925_v21  ;;  %6685 = vmatprep.subr.bf16.mxu1 %v9017_v35 }
 0x8e1   :  { %6729 = vmatprep.subr.bf16.mxu0 %v7931_v26 }
 0x8e3   :  { %6687 = vmatpush3.bf16.msra.mxu1 %v8048_v54 }
 0x8e4   :  { %6731 = vmatpush1.bf16.msra.mxu0 %v7937_v40  ;;  %6688 = vmatprep.subr.bf16.mxu1 %v9017_v35 }
 0x8e5   :  { %6733 = vmatprep.subr.bf16.mxu0 %v7943_v43 }
 0x8e8   :  { %6735 = vmatpush1.bf16.msra.mxu0 %v9035_v2 }
 0x8e9   :  { %v1717_v60 = vpop.permute.xlu1 %1716  ;;  %6737 = vmatprep.subr.bf16.mxu0 %v9036_v22 }
 0x8ea   :  { %v8307_v58 = vadd.f32 %v1717_v60, %v1709_v61  ;;  %v9042_v61 = vld [vmem:[#allocation46_spill] sm:$0xff] }
 0x8ec   :  { %9037 = vst [vmem:[#allocation38_spill] sm:$0xff] %v8307_v58  ;;  %7398 = vtanh.f32 %v8307_v58  ;;  %6739 = vmatpush1.bf16.msra.mxu0 %v9038_v50 }
 0x8ed   :  { %6741 = vmatprep.subr.bf16.mxu0 %v9039_v13 }
 0x8f0   :  { %6743 = vmatpush1.bf16.msra.mxu0 %v9040_v38 }
 0x8f1   :  { %6777 = vmatprep.subr.bf16.mxu0 %v9041_v52 }
 0x8f6   :  { %v7399_v5 = vpop.eup %7398 }
 0x8f7   :  { %1722 = vrot.lane.b32.xlu0 %v7399_v5, %s7682_s11 }
 0x969   :  { %v1723_v33 = vpop.permute.xlu0 %1722 }
 0x96a   :  { %v1725_v12 = vmul.f32 %v1723_v33, %v1707_v14 }
 0x96c   :  { %2206 = vrot.lane.b32.xlu1 %v1725_v12, %s7675_s30 }
 0x9a5   :  { %v1939_v28 = vpop.f32.mrb[12].mxu1  ;;  %v2010_v16 = vpop.f32.mrb[16].mxu0 }
 0x9a6   :  { %v2015_v60 = vadd.f32 %v1939_v28, %v9042_v61  ;;  %v1941_v58 = vpop.f32.mrb[13].mxu1  ;;  %v2012_v22 = vpop.f32.mrb[17].mxu0  ;;  %v2017_v52 = vadd.f32 %v2010_v16, %v8107_v53 }
 0x9a7   :  { %v2016_v50 = vadd.f32 %v1941_v58, %v8104_v34  ;;  %v2018_v5 = vadd.f32 %v2012_v22, %v9023_v29  ;;  %v8323_v58 = vld [vmem:[%s8897_s3] ss:$0 sm:$0xff] }
 0x9a8   :  { %v2019_v13 = vmul.f32 0.5, %v2015_v60  ;;  %9043 = vst [vmem:[#allocation39_spill] sm:$0xff] %v8323_v58 }
 0x9a9   :  { %v2023_v2 = vmul.f32 0.5, %v2016_v50  ;;  %v2028_v33 = vmul.f32 0.5, %v2018_v5 }
 0x9aa   :  { %7400 = vtanh.f32 %v2019_v13 }
 0x9ab   :  { %7402 = vtanh.f32 %v2023_v2 }
 0x9ac   :  { %7404 = vtanh.f32 %v2017_v52 }
 0x9ad   :  { %v2105_v38 = vpop.f32.mrb[14].mxu1  ;;  %7406 = vtanh.f32 %v2028_v33 }
 0x9ae   :  { %v5979_v14 = vpop.f32.mrb[15].mxu1 }
 0x9b1   :  { %v2178_v12 = vpop.f32.mrb[16].mxu1 }
 0x9b2   :  { %v2179_v43 = vadd.f32 %v2178_v12, %v2105_v38  ;;  %v5986_v40 = vpop.f32.mrb[17].mxu1 }
 0x9b4   :  { %v7401_v28 = vpop.eup %7400  ;;  %v2182_v50 = vadd.f32 %v8323_v58, %v2179_v43 }
 0x9b5   :  { %v7403_v13 = vpop.eup %7402  ;;  %v2021_v16 = vmul.f32 0.5, %v7401_v28 }
 0x9b6   :  { %v2025_v2 = vmul.f32 0.5, %v7403_v13  ;;  %7408 = vtanh.f32 %v2182_v50  ;;  %v7405_v52 = vpop.eup %7404  ;;  %v9044_v13 = vld [vmem:[#allocation32_spill] sm:$0xff] }
 0x9b7   :  { %v2022_v22 = vadd.f32 0.5, %v2021_v16  ;;  %v7407_v14 = vpop.eup %7406  ;;  %v9045_v16 = vld [vmem:[#allocation33_spill] sm:$0xff] }
 0x9b8   :  { %v2026_v60 = vadd.f32 0.5, %v2025_v2  ;;  %v2030_v43 = vmul.f32 0.5, %v7407_v14  ;;  %v9046_v2 = vld [vmem:[#allocation34_spill] sm:$0xff] }
 0x9b9   :  { %v2033_v5 = vmul.f32 %v7405_v52, %v2022_v22  ;;  %v9047_v22 = vld [vmem:[#allocation35_spill] sm:$0xff]  ;;  %v9048_v52 = vld [vmem:[#allocation18_spill] sm:$0xff] }
 0x9ba   :  { %v2032_v38 = vmul.f32 %v2026_v60, %v8212_v32  ;;  %v2031_v58 = vadd.f32 0.5, %v2030_v43 }
 0x9bc   :  { %v8327_v40 = vadd.f32 %v2033_v5, %v2032_v38 }
 0x9be   :  { %7410 = vtanh.f32 %v8327_v40 }
 0x9c0   :  { %v7409_v12 = vpop.eup %7408 }
 0x9c1   :  { %2190 = vrot.lane.b32.xlu0 %v7409_v12, %s7682_s11 }
 0x9c8   :  { %v7411_v28 = vpop.eup %7410 }
 0x9c9   :  { %v2036_v33 = vmul.f32 %v7411_v28, %v2031_v58  ;;  %v2183_v58 = vmul.f32 0.5, %v2182_v50  ;;  %v9049_v50 = vld [vmem:[#allocation48_spill] sm:$0xff] }
 0x9cb   :  { %2438 = vmatmul.mubr.f32.vlgmr.msra.gmra.mrb[18].mxu0 %v2036_v33  ;;  %7412 = vtanh.f32 %v2183_v58 }
 0x9cc   :  { %6779 = vmatpush1.bf16.msra.mxu0 %v7985_v3  ;;  %2584 = vmatprep.mubr.f32.mxu0 %v9016_v57 }
 0x9cd   :  { %6781 = vmatprep.subr.bf16.mxu0 %v7991_v9 }
 0x9d0   :  { %6783 = vmatpush1.bf16.msra.mxu0 %v7999_v23 }
 0x9d1   :  { %6792 = vmatprep.subr.bf16.mxu0 %v9017_v35 }
 0x9d5   :  { %v7413_v60 = vpop.eup %7412 }
 0x9d6   :  { %v2185_v5 = vmul.f32 0.5, %v7413_v60 }
 0x9d8   :  { %v2186_v38 = vadd.f32 0.5, %v2185_v5 }
 0x9da   :  { %v2188_v43 = vmul.f32 %v2186_v38, %v9049_v50 }
 0x9de   :  { %v2207_v32 = vpop.permute.xlu1 %2206 }
 0x9df   :  { %5996 = vmatmul.mubr.msk.f32.vlgmr.msra.gmra.mrb[18].mxu1 %vm130_vm2, %v2207_v32 }
 0x9e0   :  { %6690 = vmatpush3.bf16.msra.mxu1 %v9024_v20  ;;  %6030 = vmatprep.mubr.msk.f32.mxu1 %vm7680_vm0, %v9016_v57 }
 0x9e1   :  { %6691 = vmatprep.subr.bf16.mxu1 %v9017_v35 }
 0x9e4   :  { %6693 = vmatpush3.bf16.msra.mxu1 %v9025_v62 }
 0x9e5   :  { %6694 = vmatprep.subr.bf16.mxu1 %v9017_v35 }
 0x9e8   :  { %6696 = vmatpush3.bf16.msra.mxu1 %v9026_v30 }
 0x9e9   :  { %6697 = vmatprep.subr.bf16.mxu1 %v9017_v35 }
 0x9ec   :  { %6699 = vmatpush3.bf16.msra.mxu1 %v9027_v44 }
 0x9ed   :  { %6700 = vmatprep.subr.bf16.mxu1 %v9017_v35 }
 0x9f0   :  { %6702 = vmatpush3.bf16.msra.mxu1 %v9028_v19 }
 0x9f1   :  { %6703 = vmatprep.subr.bf16.mxu1 %v9017_v35 }
 0x9f4   :  { %6705 = vmatpush3.bf16.msra.mxu1 %v9029_v17 }
 0x9f5   :  { %6706 = vmatprep.subr.bf16.mxu1 %v9017_v35 }
 0x9f8   :  { %6708 = vmatpush3.bf16.msra.mxu1 %v9030_v48 }
 0x9f9   :  { %6709 = vmatprep.subr.bf16.mxu1 %v9017_v35 }
 0x9fc   :  { %6711 = vmatpush3.bf16.msra.mxu1 %v9031_v36 }
 0x9fd   :  { %6745 = vmatprep.subr.bf16.mxu1 %v9032_v24 }
 0x9ff   :  { %6031 = vmatmul.mubr.f32.vlgmr.msra.gmra.mrb[20].mxu1 %v2036_v33 }
 0xa00   :  { %6747 = vmatpush1.bf16.msra.mxu1 %v7892_v42  ;;  %2508 = vmatprep.mubr.f32.mxu1 %v9016_v57 }
 0xa01   :  { %6749 = vmatprep.subr.bf16.mxu1 %v7901_v51 }
 0xa04   :  { %6751 = vmatpush1.bf16.msra.mxu1 %v7904_v55 }
 0xa05   :  { %6753 = vmatprep.subr.bf16.mxu1 %v7912_v0 }
 0xa08   :  { %6755 = vmatpush1.bf16.msra.mxu1 %v7916_v7 }
 0xa09   :  { %6757 = vmatprep.subr.bf16.mxu1 %v7921_v15 }
 0xa0c   :  { %6759 = vmatpush1.bf16.msra.mxu1 %v7929_v25 }
 0xa0d   :  { %6761 = vmatprep.subr.bf16.mxu1 %v7934_v31 }
 0xa10   :  { %6763 = vmatpush1.bf16.msra.mxu1 %v7941_v41 }
 0xa11   :  { %6765 = vmatprep.subr.bf16.mxu1 %v7946_v49 }
 0xa14   :  { %6767 = vmatpush1.bf16.msra.mxu1 %v7953_v59 }
 0xa15   :  { %6769 = vmatprep.subr.bf16.mxu1 %v7958_v4 }
 0xa18   :  { %6771 = vmatpush1.bf16.msra.mxu1 %v7965_v18 }
 0xa19   :  { %6773 = vmatprep.subr.bf16.mxu1 %v7970_v27 }
 0xa1c   :  { %6775 = vmatpush1.bf16.msra.mxu1 %v7977_v39 }
 0xa1d   :  { %6785 = vmatprep.subr.bf16.mxu1 %v9044_v13 }
 0xa1f   :  { %2509 = vmatmul.mubr.f32.vlgmr.msra.gmra.mrb[22].mxu1 %v2036_v33 }
 0xa20   :  { %6787 = vmatpush1.bf16.msra.mxu1 %v9045_v16  ;;  %2655 = vmatprep.mubr.f32.mxu1 %v9016_v57 }
 0xa21   :  { %6789 = vmatprep.subr.bf16.mxu1 %v9046_v2 }
 0xa24   :  { %6791 = vmatpush1.bf16.msra.mxu1 %v9047_v22 }
 0xa25   :  { %6832 = vmatprep.subr.bf16.mxu1 %v9048_v52 }
 0xa33   :  { %v2191_v14 = vpop.permute.xlu0 %2190 }
 0xa34   :  { %v2193_v12 = vmul.f32 %v2191_v14, %v2186_v38 }
 0xa36   :  { %2195 = vrot.lane.b32.xlu1 %v2193_v12, %s7675_s30 }
 0xaa8   :  { %v2196_v28 = vpop.permute.xlu1 %2195 }
 0xaa9   :  { %v8379_v33 = vadd.f32 %v2196_v28, %v2188_v43 }
 0xaab   :  { %9050 = vst [vmem:[#allocation40_spill] sm:$0xff] %v8379_v33  ;;  %7414 = vtanh.f32 %v8379_v33 }
 0xab2   :  { %v2276_v32 = vpop.f32.mrb[18].mxu1 }
 0xab3   :  { %v5997_v58 = vpop.f32.mrb[19].mxu1 }
 0xab5   :  { %v7415_v2 = vpop.eup %7414 }
 0xab6   :  { %2201 = vrot.lane.b32.xlu0 %v7415_v2, %s7682_s11 }
 0xad2   :  { %v2346_v52 = vpop.f32.mrb[20].mxu1 }
 0xad3   :  { %v2347_v22 = vadd.f32 %v2346_v52, %v2276_v32  ;;  %v6032_v60 = vpop.f32.mrb[21].mxu1  ;;  %v9053_v32 = vld [vmem:[#allocation26_spill] sm:$0xff] }
 0xad4   :  { %v9054_v60 = vld [vmem:[#allocation27_spill] sm:$0xff] }
 0xad5   :  { %v2350_v5 = vadd.f32 %v8151_v1, %v2347_v22  ;;  %v9051_v22 = vld [vmem:[#allocation24_spill] sm:$0xff] }
 0xad7   :  { %7416 = vtanh.f32 %v2350_v5  ;;  %v2351_v43 = vmul.f32 0.5, %v2350_v5  ;;  %v9055_v5 = vld [vmem:[#allocation28_spill] sm:$0xff] }
 0xad9   :  { %7418 = vtanh.f32 %v2351_v43  ;;  %v9059_v43 = vld [vmem:[#allocation38_spill] sm:$0xff] }
 0xae1   :  { %v7417_v14 = vpop.eup %7416 }
 0xae2   :  { %2358 = vrot.lane.b32.xlu0 %v7417_v14, %s7682_s11  ;;  %v9056_v14 = vld [vmem:[#allocation29_spill] sm:$0xff] }
 0xae3   :  { %v7419_v28 = vpop.eup %7418 }
 0xae4   :  { %v2353_v58 = vmul.f32 0.5, %v7419_v28 }
 0xae6   :  { %v2354_v33 = vadd.f32 0.5, %v2353_v58 }
 0xae8   :  { %v2356_v28 = vmul.f32 %v2354_v33, %v9059_v43 }
 0xb28   :  { %v2202_v12 = vpop.permute.xlu0 %2201 }
 0xb29   :  { %v2204_v50 = vmul.f32 %v2202_v12, %v2186_v38  ;;  %v9052_v38 = vld [vmem:[#allocation25_spill] sm:$0xff]  ;;  %v9057_v12 = vld [vmem:[#allocation30_spill] sm:$0xff] }
 0xb2b   :  { %2516 = vrot.lane.b32.xlu1 %v2204_v50, %s7675_s30  ;;  %v9058_v50 = vld [vmem:[#allocation31_spill] sm:$0xff] }
 0xb54   :  { %v2359_v16 = vpop.permute.xlu0 %2358 }
 0xb55   :  { %v2361_v2 = vmul.f32 %v2359_v16, %v2354_v33  ;;  %v2685_v16 = vld [vmem:[#allocation3 + $0x20] sm:$0xff] }
 0xb57   :  { %2363 = vrot.lane.b32.xlu1 %v2361_v2, %s7675_s30 }
 0xb9d   :  { %v2517_v52 = vpop.permute.xlu1 %2516 }
 0xb9e   :  { %5553 = vmatmul.mubr.msk.f32.vlgmr.msra.gmra.mrb[18].mxu0 %vm130_vm2, %v2517_v52  ;;  %5554 = vmatmul.mubr.msk.f32.vlgmr.msra.gmra.mrb[22].mxu1 %vm130_vm2, %v2517_v52 }
 0xb9f   :  { %6794 = vmatpush3.bf16.msra.mxu0 %v7850_v6  ;;  %6041 = vmatprep.mubr.msk.f32.mxu0 %vm7680_vm0, %v9016_v57 }
 0xba0   :  { %6795 = vmatprep.subr.bf16.mxu0 %v9017_v35  ;;  %6834 = vmatpush1.bf16.msra.mxu1 %v7887_v37 }
 0xba1   :  { %6836 = vmatprep.subr.bf16.mxu1 %v7896_v46  ;;  %3084 = vmatprep.mubr.f32.mxu1 %v9016_v57 }
 0xba3   :  { %6797 = vmatpush3.bf16.msra.mxu0 %v7861_v11 }
 0xba4   :  { %6798 = vmatprep.subr.bf16.mxu0 %v9017_v35  ;;  %6838 = vmatpush1.bf16.msra.mxu1 %v7898_v47 }
 0xba5   :  { %6840 = vmatprep.subr.bf16.mxu1 %v7906_v56 }
 0xba6   :  { %6042 = vmatmul.mubr.msk.f32.vlgmr.msra.gmra.mrb[20].mxu0 %vm130_vm2, %v2517_v52 }
 0xba7   :  { %6800 = vmatpush3.bf16.msra.mxu0 %v7858_v10  ;;  %6048 = vmatprep.mubr.msk.f32.mxu0 %vm7680_vm0, %v9016_v57 }
 0xba8   :  { %6842 = vmatpush1.bf16.msra.mxu1 %v7910_v63  ;;  %6801 = vmatprep.subr.bf16.mxu0 %v9017_v35 }
 0xba9   :  { %6844 = vmatprep.subr.bf16.mxu1 %v7918_v8 }
 0xbaa   :  { %6049 = vmatmul.mubr.msk.f32.vlgmr.msra.gmra.mrb[22].mxu0 %vm204_vm1, %v2685_v16 }
 0xbab   :  { %6803 = vmatpush3.bf16.msra.mxu0 %v8020_v45  ;;  %6059 = vmatprep.mubr.msk.f32.mxu0 %vm7680_vm0, %v9016_v57 }
 0xbac   :  { %6846 = vmatpush1.bf16.msra.mxu1 %v7925_v21  ;;  %6804 = vmatprep.subr.bf16.mxu0 %v9017_v35 }
 0xbad   :  { %6848 = vmatprep.subr.bf16.mxu1 %v7931_v26 }
 0xbaf   :  { %6806 = vmatpush3.bf16.msra.mxu0 %v8048_v54 }
 0xbb0   :  { %6850 = vmatpush1.bf16.msra.mxu1 %v9051_v22  ;;  %6807 = vmatprep.subr.bf16.mxu0 %v9017_v35 }
 0xbb1   :  { %6852 = vmatprep.subr.bf16.mxu1 %v9052_v38 }
 0xbb4   :  { %6854 = vmatpush1.bf16.msra.mxu1 %v9053_v32 }
 0xbb5   :  { %6856 = vmatprep.subr.bf16.mxu1 %v9054_v60 }
 0xbb8   :  { %6858 = vmatpush1.bf16.msra.mxu1 %v9055_v5 }
 0xbb9   :  { %6860 = vmatprep.subr.bf16.mxu1 %v9056_v14 }
 0xbbc   :  { %6862 = vmatpush1.bf16.msra.mxu1 %v9057_v12 }
 0xbbd   :  { %6896 = vmatprep.subr.bf16.mxu1 %v9058_v50 }
 0xbc9   :  { %v2364_v58 = vpop.permute.xlu1 %2363 }
 0xbca   :  { %v8425_v2 = vadd.f32 %v2364_v58, %v2356_v28 }
 0xbcc   :  { %9060 = vst [vmem:[#allocation41_spill] sm:$0xff] %v8425_v2  ;;  %7420 = vtanh.f32 %v8425_v2 }
 0xbd6   :  { %v7421_v52 = vpop.eup %7420 }
 0xbd7   :  { %2369 = vrot.lane.b32.xlu0 %v7421_v52, %s7682_s11 }
 0xc49   :  { %v2370_v16 = vpop.permute.xlu0 %2369 }
 0xc4a   :  { %v2372_v60 = vmul.f32 %v2370_v16, %v2354_v33 }
 0xc4c   :  { %2853 = vrot.lane.b32.xlu1 %v2372_v60, %s7675_s30 }
 0xc71   :  { %v2586_v5 = vpop.f32.mrb[18].mxu0  ;;  %v2657_v14 = vpop.f32.mrb[22].mxu1 }
 0xc72   :  { %v2662_v12 = vadd.f32 %v2586_v5, %v9042_v61  ;;  %v2588_v32 = vpop.f32.mrb[19].mxu0  ;;  %v2659_v50 = vpop.f32.mrb[23].mxu1  ;;  %v2664_v58 = vadd.f32 %v2657_v14, %v8107_v53  ;;  %v9061_v61 = vld [vmem:[#allocation39_spill] sm:$0xff] }
 0xc73   :  { %v2663_v43 = vadd.f32 %v2588_v32, %v8104_v34  ;;  %v2665_v52 = vadd.f32 %v2659_v50, %v9023_v29 }
 0xc74   :  { %v2666_v38 = vmul.f32 0.5, %v2662_v12 }
 0xc75   :  { %v2670_v28 = vmul.f32 0.5, %v2663_v43  ;;  %v2675_v60 = vmul.f32 0.5, %v2665_v52 }
 0xc76   :  { %7422 = vtanh.f32 %v2666_v38 }
 0xc77   :  { %7424 = vtanh.f32 %v2670_v28 }
 0xc78   :  { %7426 = vtanh.f32 %v2664_v58 }
 0xc79   :  { %v2752_v2 = vpop.f32.mrb[20].mxu0  ;;  %7428 = vtanh.f32 %v2675_v60 }
 0xc7a   :  { %v6043_v33 = vpop.f32.mrb[21].mxu0 }
 0xc7d   :  { %v2825_v16 = vpop.f32.mrb[22].mxu0 }
 0xc7e   :  { %v2826_v22 = vadd.f32 %v2825_v16, %v2752_v2  ;;  %v6050_v54 = vpop.f32.mrb[23].mxu0 }
 0xc80   :  { %v7423_v5 = vpop.eup %7422  ;;  %v2829_v26 = vadd.f32 %v9061_v61, %v2826_v22 }
 0xc81   :  { %v7425_v21 = vpop.eup %7424  ;;  %v2668_v32 = vmul.f32 0.5, %v7423_v5 }
 0xc82   :  { %v2672_v12 = vmul.f32 0.5, %v7425_v21  ;;  %7430 = vtanh.f32 %v2829_v26  ;;  %v7427_v14 = vpop.eup %7426 }
 0xc83   :  { %v2669_v38 = vadd.f32 0.5, %v2668_v32  ;;  %v7429_v2 = vpop.eup %7428 }
 0xc84   :  { %v2673_v43 = vadd.f32 0.5, %v2672_v12  ;;  %v2677_v22 = vmul.f32 0.5, %v7429_v2 }
 0xc85   :  { %v2680_v28 = vmul.f32 %v7427_v14, %v2669_v38  ;;  %v9062_v38 = vld [vmem:[#allocation33_spill] sm:$0xff]  ;;  %v9063_v14 = vld [vmem:[#allocation34_spill] sm:$0xff] }
 0xc86   :  { %v2679_v50 = vmul.f32 %v2673_v43, %v8327_v40  ;;  %v2678_v52 = vadd.f32 0.5, %v2677_v22  ;;  %v2830_v40 = vmul.f32 0.5, %v2829_v26  ;;  %v9064_v43 = vld [vmem:[#allocation35_spill] sm:$0xff] }
 0xc88   :  { %v8436_v58 = vadd.f32 %v2680_v28, %v2679_v50  ;;  %v9065_v28 = vld [vmem:[#allocation18_spill] sm:$0xff]  ;;  %v9066_v50 = vld [vmem:[#allocation40_spill] sm:$0xff] }
 0xc8a   :  { %7432 = vtanh.f32 %v8436_v58 }
 0xc8b   :  { %7434 = vtanh.f32 %v2830_v40 }
 0xc8c   :  { %v7431_v54 = vpop.eup %7430 }
 0xc8d   :  { %2837 = vrot.lane.b32.xlu0 %v7431_v54, %s7682_s11 }
 0xc94   :  { %v7433_v33 = vpop.eup %7432 }
 0xc95   :  { %v2683_v60 = vmul.f32 %v7433_v33, %v2678_v52  ;;  %v7435_v16 = vpop.eup %7434 }
 0xc96   :  { %v2832_v26 = vmul.f32 0.5, %v7435_v16 }
 0xc97   :  { %3085 = vmatmul.mubr.f32.vlgmr.msra.gmra.mrb[24].mxu1 %v2683_v60 }
 0xc98   :  { %6898 = vmatpush1.bf16.msra.mxu1 %v7985_v3  ;;  %3231 = vmatprep.mubr.f32.mxu1 %v9016_v57  ;;  %v2833_v5 = vadd.f32 0.5, %v2832_v26 }
 0xc99   :  { %6900 = vmatprep.subr.bf16.mxu1 %v7991_v9 }
 0xc9a   :  { %v2835_v2 = vmul.f32 %v2833_v5, %v9066_v50 }
 0xc9c   :  { %6902 = vmatpush1.bf16.msra.mxu1 %v7999_v23 }
 0xc9d   :  { %6911 = vmatprep.subr.bf16.mxu1 %v9017_v35 }
 0xcbe   :  { %v2854_v21 = vpop.permute.xlu1 %2853 }
 0xcbf   :  { %6060 = vmatmul.mubr.msk.f32.vlgmr.msra.gmra.mrb[24].mxu0 %vm130_vm2, %v2854_v21 }
 0xcc0   :  { %6809 = vmatpush3.bf16.msra.mxu0 %v9024_v20  ;;  %6094 = vmatprep.mubr.msk.f32.mxu0 %vm7680_vm0, %v9016_v57 }
 0xcc1   :  { %6810 = vmatprep.subr.bf16.mxu0 %v9017_v35 }
 0xcc4   :  { %6812 = vmatpush3.bf16.msra.mxu0 %v9025_v62 }
 0xcc5   :  { %6813 = vmatprep.subr.bf16.mxu0 %v9017_v35 }
 0xcc8   :  { %6815 = vmatpush3.bf16.msra.mxu0 %v9026_v30 }
 0xcc9   :  { %6816 = vmatprep.subr.bf16.mxu0 %v9017_v35 }
 0xccc   :  { %6818 = vmatpush3.bf16.msra.mxu0 %v9027_v44 }
 0xccd   :  { %6819 = vmatprep.subr.bf16.mxu0 %v9017_v35 }
 0xcd0   :  { %6821 = vmatpush3.bf16.msra.mxu0 %v9028_v19 }
 0xcd1   :  { %6822 = vmatprep.subr.bf16.mxu0 %v9017_v35 }
 0xcd4   :  { %6824 = vmatpush3.bf16.msra.mxu0 %v9029_v17 }
 0xcd5   :  { %6825 = vmatprep.subr.bf16.mxu0 %v9017_v35 }
 0xcd8   :  { %6827 = vmatpush3.bf16.msra.mxu0 %v9030_v48 }
 0xcd9   :  { %6828 = vmatprep.subr.bf16.mxu0 %v9017_v35 }
 0xcdc   :  { %6830 = vmatpush3.bf16.msra.mxu0 %v9031_v36 }
 0xcdd   :  { %6864 = vmatprep.subr.bf16.mxu0 %v9032_v24 }
 0xcdf   :  { %6095 = vmatmul.mubr.f32.vlgmr.msra.gmra.mrb[26].mxu0 %v2683_v60 }
 0xce0   :  { %6866 = vmatpush1.bf16.msra.mxu0 %v7892_v42  ;;  %3155 = vmatprep.mubr.f32.mxu0 %v9016_v57 }
 0xce1   :  { %6868 = vmatprep.subr.bf16.mxu0 %v7901_v51 }
 0xce4   :  { %6870 = vmatpush1.bf16.msra.mxu0 %v7904_v55 }
 0xce5   :  { %6872 = vmatprep.subr.bf16.mxu0 %v7912_v0 }
 0xce8   :  { %6874 = vmatpush1.bf16.msra.mxu0 %v7916_v7 }
 0xce9   :  { %6876 = vmatprep.subr.bf16.mxu0 %v7921_v15 }
 0xcec   :  { %6878 = vmatpush1.bf16.msra.mxu0 %v7929_v25 }
 0xced   :  { %6880 = vmatprep.subr.bf16.mxu0 %v7934_v31 }
 0xcf0   :  { %6882 = vmatpush1.bf16.msra.mxu0 %v7941_v41 }
 0xcf1   :  { %6884 = vmatprep.subr.bf16.mxu0 %v7946_v49 }
 0xcf4   :  { %6886 = vmatpush1.bf16.msra.mxu0 %v7953_v59 }
 0xcf5   :  { %6888 = vmatprep.subr.bf16.mxu0 %v7958_v4 }
 0xcf8   :  { %6890 = vmatpush1.bf16.msra.mxu0 %v7965_v18 }
 0xcf9   :  { %6892 = vmatprep.subr.bf16.mxu0 %v7970_v27 }
 0xcfc   :  { %6894 = vmatpush1.bf16.msra.mxu0 %v7977_v39 }
 0xcfd   :  { %6904 = vmatprep.subr.bf16.mxu0 %v9044_v13 }
 0xcff   :  { %v2838_v32 = vpop.permute.xlu0 %2837  ;;  %3156 = vmatmul.mubr.f32.vlgmr.msra.gmra.mrb[28].mxu0 %v2683_v60 }
 0xd00   :  { %v2840_v12 = vmul.f32 %v2838_v32, %v2833_v5  ;;  %6906 = vmatpush1.bf16.msra.mxu0 %v9062_v38  ;;  %3302 = vmatprep.mubr.f32.mxu0 %v9016_v57 }
 0xd01   :  { %6908 = vmatprep.subr.bf16.mxu0 %v9063_v14 }
 0xd02   :  { %2842 = vrot.lane.b32.xlu1 %v2840_v12, %s7675_s30 }
 0xd04   :  { %6910 = vmatpush1.bf16.msra.mxu0 %v9064_v43 }
 0xd05   :  { %6951 = vmatprep.subr.bf16.mxu0 %v9065_v28 }
 0xd74   :  { %v2843_v54 = vpop.permute.xlu1 %2842 }
 0xd75   :  { %v8488_v22 = vadd.f32 %v2843_v54, %v2835_v2 }
 0xd77   :  { %9067 = vst [vmem:[#allocation42_spill] sm:$0xff] %v8488_v22  ;;  %7436 = vtanh.f32 %v8488_v22 }
 0xd81   :  { %v7437_v52 = vpop.eup %7436 }
 0xd82   :  { %2848 = vrot.lane.b32.xlu0 %v7437_v52, %s7682_s11 }
 0xd92   :  { %v2923_v33 = vpop.f32.mrb[24].mxu0 }
 0xd93   :  { %v6061_v60 = vpop.f32.mrb[25].mxu0 }
 0xdb2   :  { %v2993_v21 = vpop.f32.mrb[26].mxu0 }
 0xdb3   :  { %v2994_v40 = vadd.f32 %v2993_v21, %v2923_v33  ;;  %v6096_v16 = vpop.f32.mrb[27].mxu0  ;;  %v9071_v21 = vld [vmem:[#allocation24_spill] sm:$0xff] }
 0xdb4   :  { %v9073_v16 = vld [vmem:[#allocation26_spill] sm:$0xff] }
 0xdb5   :  { %v2997_v26 = vadd.f32 %v8151_v1, %v2994_v40  ;;  %v3332_v1 = vld [vmem:[#allocation3 + $0x28] sm:$0xff]  ;;  %v9072_v40 = vld [vmem:[#allocation25_spill] sm:$0xff] }
 0xdb7   :  { %7438 = vtanh.f32 %v2997_v26  ;;  %v2998_v2 = vmul.f32 0.5, %v2997_v26  ;;  %v9074_v26 = vld [vmem:[#allocation27_spill] sm:$0xff] }
 0xdb9   :  { %7440 = vtanh.f32 %v2998_v2  ;;  %v9078_v2 = vld [vmem:[#allocation31_spill] sm:$0xff] }
 0xdc1   :  { %v7439_v32 = vpop.eup %7438 }
 0xdc2   :  { %3005 = vrot.lane.b32.xlu0 %v7439_v32, %s7682_s11  ;;  %v9075_v32 = vld [vmem:[#allocation28_spill] sm:$0xff] }
 0xdc3   :  { %v7441_v54 = vpop.eup %7440 }
 0xdc4   :  { %v3000_v22 = vmul.f32 0.5, %v7441_v54  ;;  %v9079_v54 = vld [vmem:[#allocation41_spill] sm:$0xff] }
 0xdc6   :  { %v3001_v52 = vadd.f32 0.5, %v3000_v22  ;;  %v9070_v22 = vld [vmem:[#allocation37_spill] sm:$0xff] }
 0xdf4   :  { %v2849_v12 = vpop.permute.xlu0 %2848 }
 0xdf5   :  { %v2851_v50 = vmul.f32 %v2849_v12, %v2833_v5  ;;  %v9068_v5 = vld [vmem:[#allocation22_spill] sm:$0xff]  ;;  %v9076_v12 = vld [vmem:[#allocation29_spill] sm:$0xff] }
 0xdf7   :  { %3163 = vrot.lane.b32.xlu1 %v2851_v50, %s7675_s30  ;;  %v9077_v50 = vld [vmem:[#allocation30_spill] sm:$0xff] }
 0xe34   :  { %v3006_v28 = vpop.permute.xlu0 %3005 }
 0xe35   :  { %v3008_v60 = vmul.f32 %v3006_v28, %v3001_v52  ;;  %v9069_v28 = vld [vmem:[#allocation23_spill] sm:$0xff] }
 0xe37   :  { %3010 = vrot.lane.b32.xlu1 %v3008_v60, %s7675_s30  ;;  %v3003_v60 = vmul.f32 %v3001_v52, %v9079_v54 }
 0xe69   :  { %v3164_v33 = vpop.permute.xlu1 %3163 }
 0xe6a   :  { %5558 = vmatmul.mubr.msk.f32.vlgmr.msra.gmra.mrb[24].mxu1 %vm130_vm2, %v3164_v33  ;;  %5559 = vmatmul.mubr.msk.f32.vlgmr.msra.gmra.mrb[28].mxu0 %vm130_vm2, %v3164_v33 }
 0xe6b   :  { %6913 = vmatpush3.bf16.msra.mxu1 %v7850_v6  ;;  %6105 = vmatprep.mubr.msk.f32.mxu1 %vm7680_vm0, %v9016_v57 }
 0xe6c   :  { %6914 = vmatprep.subr.bf16.mxu1 %v9017_v35  ;;  %6953 = vmatpush1.bf16.msra.mxu0 %v7887_v37 }
 0xe6d   :  { %6955 = vmatprep.subr.bf16.mxu0 %v7896_v46  ;;  %3731 = vmatprep.mubr.f32.mxu0 %v9016_v57 }
 0xe6f   :  { %6916 = vmatpush3.bf16.msra.mxu1 %v7861_v11 }
 0xe70   :  { %6917 = vmatprep.subr.bf16.mxu1 %v9017_v35  ;;  %6957 = vmatpush1.bf16.msra.mxu0 %v7898_v47 }
 0xe71   :  { %6959 = vmatprep.subr.bf16.mxu0 %v7906_v56 }
 0xe72   :  { %6106 = vmatmul.mubr.msk.f32.vlgmr.msra.gmra.mrb[26].mxu1 %vm130_vm2, %v3164_v33 }
 0xe73   :  { %6919 = vmatpush3.bf16.msra.mxu1 %v7858_v10  ;;  %6112 = vmatprep.mubr.msk.f32.mxu1 %vm7680_vm0, %v9016_v57 }
 0xe74   :  { %6961 = vmatpush1.bf16.msra.mxu0 %v7910_v63  ;;  %6920 = vmatprep.subr.bf16.mxu1 %v9017_v35 }
 0xe75   :  { %6963 = vmatprep.subr.bf16.mxu0 %v7918_v8 }
 0xe76   :  { %6113 = vmatmul.mubr.msk.f32.vlgmr.msra.gmra.mrb[28].mxu1 %vm204_vm1, %v3332_v1 }
 0xe77   :  { %6922 = vmatpush3.bf16.msra.mxu1 %v8020_v45  ;;  %6123 = vmatprep.mubr.msk.f32.mxu1 %vm7680_vm0, %v9016_v57 }
 0xe78   :  { %6965 = vmatpush1.bf16.msra.mxu0 %v9068_v5  ;;  %6923 = vmatprep.subr.bf16.mxu1 %v9017_v35 }
 0xe79   :  { %6967 = vmatprep.subr.bf16.mxu0 %v9069_v28 }
 0xe7b   :  { %6925 = vmatpush3.bf16.msra.mxu1 %v9070_v22 }
 0xe7c   :  { %6969 = vmatpush1.bf16.msra.mxu0 %v9071_v21  ;;  %6926 = vmatprep.subr.bf16.mxu1 %v9017_v35  ;;  %v9081_v21 = vld [vmem:[#allocation46_spill] sm:$0xff] }
 0xe7d   :  { %6971 = vmatprep.subr.bf16.mxu0 %v9072_v40 }
 0xe80   :  { %6973 = vmatpush1.bf16.msra.mxu0 %v9073_v16 }
 0xe81   :  { %6975 = vmatprep.subr.bf16.mxu0 %v9074_v26 }
 0xe84   :  { %6977 = vmatpush1.bf16.msra.mxu0 %v9075_v32 }
 0xe85   :  { %6979 = vmatprep.subr.bf16.mxu0 %v9076_v12 }
 0xe88   :  { %6981 = vmatpush1.bf16.msra.mxu0 %v9077_v50 }
 0xe89   :  { %7015 = vmatprep.subr.bf16.mxu0 %v9078_v2 }
 0xea9   :  { %v3011_v33 = vpop.permute.xlu1 %3010 }
 0xeaa   :  { %v8534_v1 = vadd.f32 %v3011_v33, %v3003_v60 }
 0xeac   :  { %9080 = vst [vmem:[#allocation43_spill] sm:$0xff] %v8534_v1  ;;  %7442 = vtanh.f32 %v8534_v1 }
 0xeb6   :  { %v7443_v40 = vpop.eup %7442 }
 0xeb7   :  { %3016 = vrot.lane.b32.xlu0 %v7443_v40, %s7682_s11 }
 0xf29   :  { %v3017_v16 = vpop.permute.xlu0 %3016 }
 0xf2a   :  { %v3019_v26 = vmul.f32 %v3017_v16, %v3001_v52 }
 0xf2c   :  { %3500 = vrot.lane.b32.xlu1 %v3019_v26, %s7675_s30 }
 0xf3d   :  { %v3233_v32 = vpop.f32.mrb[24].mxu1  ;;  %v3304_v12 = vpop.f32.mrb[28].mxu0 }
 0xf3e   :  { %v3309_v50 = vadd.f32 %v3233_v32, %v9081_v21  ;;  %v3235_v22 = vpop.f32.mrb[25].mxu1  ;;  %v3306_v2 = vpop.f32.mrb[29].mxu0  ;;  %v3311_v33 = vadd.f32 %v3304_v12, %v8107_v53 }
 0xf3f   :  { %v3310_v54 = vadd.f32 %v3235_v22, %v8104_v34  ;;  %v3312_v40 = vadd.f32 %v3306_v2, %v9023_v29 }
 0xf40   :  { %v3313_v28 = vmul.f32 0.5, %v3309_v50 }
 0xf41   :  { %v3317_v60 = vmul.f32 0.5, %v3310_v54  ;;  %v3322_v16 = vmul.f32 0.5, %v3312_v40 }
 0xf42   :  { %7444 = vtanh.f32 %v3313_v28 }
 0xf43   :  { %7446 = vtanh.f32 %v3317_v60 }
 0xf44   :  { %7448 = vtanh.f32 %v3311_v33 }
 0xf45   :  { %v3399_v1 = vpop.f32.mrb[26].mxu1  ;;  %7450 = vtanh.f32 %v3322_v16 }
 0xf46   :  { %v6107_v52 = vpop.f32.mrb[27].mxu1 }
 0xf49   :  { %v3472_v26 = vpop.f32.mrb[28].mxu1 }
 0xf4a   :  { %v3473_v5 = vadd.f32 %v3472_v26, %v3399_v1  ;;  %v6114_v45 = vpop.f32.mrb[29].mxu1 }
 0xf4c   :  { %v7445_v32 = vpop.eup %7444  ;;  %v3476_v21 = vadd.f32 %v9061_v61, %v3473_v5 }
 0xf4d   :  { %v7447_v8 = vpop.eup %7446  ;;  %v3315_v22 = vmul.f32 0.5, %v7445_v32 }
 0xf4e   :  { %v3319_v50 = vmul.f32 0.5, %v7447_v8  ;;  %7452 = vtanh.f32 %v3476_v21  ;;  %v7449_v12 = vpop.eup %7448 }
 0xf4f   :  { %v3316_v28 = vadd.f32 0.5, %v3315_v22  ;;  %v7451_v1 = vpop.eup %7450 }
 0xf50   :  { %v3320_v54 = vadd.f32 0.5, %v3319_v50  ;;  %v3324_v5 = vmul.f32 0.5, %v7451_v1 }
 0xf51   :  { %v3327_v60 = vmul.f32 %v7449_v12, %v3316_v28  ;;  %v9082_v28 = vld [vmem:[#allocation18_spill] sm:$0xff] }
 0xf52   :  { %v3326_v2 = vmul.f32 %v3320_v54, %v8436_v58  ;;  %v3325_v40 = vadd.f32 0.5, %v3324_v5  ;;  %v3477_v58 = vmul.f32 0.5, %v3476_v21  ;;  %v9083_v12 = vld [vmem:[#allocation42_spill] sm:$0xff] }
 0xf54   :  { %v8545_v33 = vadd.f32 %v3327_v60, %v3326_v2 }
 0xf56   :  { %7454 = vtanh.f32 %v8545_v33 }
 0xf57   :  { %7456 = vtanh.f32 %v3477_v58 }
 0xf58   :  { %v7453_v45 = vpop.eup %7452 }
 0xf59   :  { %3484 = vrot.lane.b32.xlu0 %v7453_v45, %s7682_s11 }
 0xf60   :  { %v7455_v52 = vpop.eup %7454 }
 0xf61   :  { %v3330_v16 = vmul.f32 %v7455_v52, %v3325_v40  ;;  %v7457_v26 = vpop.eup %7456 }
 0xf62   :  { %v3479_v21 = vmul.f32 0.5, %v7457_v26 }
 0xf63   :  { %3732 = vmatmul.mubr.f32.vlgmr.msra.gmra.mrb[30].mxu0 %v3330_v16 }
 0xf64   :  { %7017 = vmatpush1.bf16.msra.mxu0 %v7985_v3  ;;  %3878 = vmatprep.mubr.f32.mxu0 %v9016_v57  ;;  %v3480_v32 = vadd.f32 0.5, %v3479_v21 }
 0xf65   :  { %7019 = vmatprep.subr.bf16.mxu0 %v7991_v9 }
 0xf66   :  { %v3482_v54 = vmul.f32 %v3480_v32, %v9083_v12 }
 0xf68   :  { %7021 = vmatpush1.bf16.msra.mxu0 %v7999_v23 }
 0xf69   :  { %7030 = vmatprep.subr.bf16.mxu0 %v9017_v35 }
 0xf9e   :  { %v3501_v8 = vpop.permute.xlu1 %3500 }
 0xf9f   :  { %6124 = vmatmul.mubr.msk.f32.vlgmr.msra.gmra.mrb[30].mxu1 %vm130_vm2, %v3501_v8  ;;  %v8604_v8 = vld [vmem:[%s8903_s9] ss:$0 sm:$0xff] }
 0xfa0   :  { %6928 = vmatpush3.bf16.msra.mxu1 %v9024_v20  ;;  %6158 = vmatprep.mubr.msk.f32.mxu1 %vm7680_vm0, %v9016_v57 }
 0xfa1   :  { %6929 = vmatprep.subr.bf16.mxu1 %v9017_v35 }
 0xfa4   :  { %6931 = vmatpush3.bf16.msra.mxu1 %v9025_v62 }
 0xfa5   :  { %6932 = vmatprep.subr.bf16.mxu1 %v9017_v35 }
 0xfa8   :  { %6934 = vmatpush3.bf16.msra.mxu1 %v9026_v30 }
 0xfa9   :  { %6935 = vmatprep.subr.bf16.mxu1 %v9017_v35 }
 0xfac   :  { %6937 = vmatpush3.bf16.msra.mxu1 %v9027_v44 }
 0xfad   :  { %6938 = vmatprep.subr.bf16.mxu1 %v9017_v35 }
 0xfb0   :  { %6940 = vmatpush3.bf16.msra.mxu1 %v9028_v19 }
 0xfb1   :  { %6941 = vmatprep.subr.bf16.mxu1 %v9017_v35 }
 0xfb4   :  { %6943 = vmatpush3.bf16.msra.mxu1 %v9029_v17 }
 0xfb5   :  { %6944 = vmatprep.subr.bf16.mxu1 %v9017_v35 }
 0xfb8   :  { %6946 = vmatpush3.bf16.msra.mxu1 %v9030_v48 }
 0xfb9   :  { %6947 = vmatprep.subr.bf16.mxu1 %v9017_v35 }
 0xfbc   :  { %6949 = vmatpush3.bf16.msra.mxu1 %v9031_v36 }
 0xfbd   :  { %6983 = vmatprep.subr.bf16.mxu1 %v9032_v24 }
 0xfbf   :  { %6159 = vmatmul.mubr.f32.vlgmr.msra.gmra.mrb[32].mxu1 %v3330_v16 }
 0xfc0   :  { %6985 = vmatpush1.bf16.msra.mxu1 %v7892_v42  ;;  %3802 = vmatprep.mubr.f32.mxu1 %v9016_v57 }
 0xfc1   :  { %6987 = vmatprep.subr.bf16.mxu1 %v7901_v51 }
 0xfc4   :  { %6989 = vmatpush1.bf16.msra.mxu1 %v7904_v55 }
 0xfc5   :  { %6991 = vmatprep.subr.bf16.mxu1 %v7912_v0 }
 0xfc8   :  { %6993 = vmatpush1.bf16.msra.mxu1 %v7916_v7 }
 0xfc9   :  { %6995 = vmatprep.subr.bf16.mxu1 %v7921_v15 }
 0xfcb   :  { %v3485_v22 = vpop.permute.xlu0 %3484 }
 0xfcc   :  { %v3487_v50 = vmul.f32 %v3485_v22, %v3480_v32  ;;  %6997 = vmatpush1.bf16.msra.mxu1 %v7929_v25 }
 0xfcd   :  { %6999 = vmatprep.subr.bf16.mxu1 %v7934_v31 }
 0xfce   :  { %3489 = vrot.lane.b32.xlu1 %v3487_v50, %s7675_s30 }
 0xfd0   :  { %7001 = vmatpush1.bf16.msra.mxu1 %v7941_v41 }
 0xfd1   :  { %7003 = vmatprep.subr.bf16.mxu1 %v7946_v49 }
 0xfd4   :  { %7005 = vmatpush1.bf16.msra.mxu1 %v7953_v59 }
 0xfd5   :  { %7007 = vmatprep.subr.bf16.mxu1 %v7958_v4 }
 0xfd8   :  { %7009 = vmatpush1.bf16.msra.mxu1 %v7965_v18 }
 0xfd9   :  { %7011 = vmatprep.subr.bf16.mxu1 %v7970_v27 }
 0xfdc   :  { %7013 = vmatpush1.bf16.msra.mxu1 %v7977_v39 }
 0xfdd   :  { %7023 = vmatprep.subr.bf16.mxu1 %v9044_v13 }
 0xfdf   :  { %3803 = vmatmul.mubr.f32.vlgmr.msra.gmra.mrb[34].mxu1 %v3330_v16 }
 0xfe0   :  { %7025 = vmatpush1.bf16.msra.mxu1 %v9062_v38  ;;  %3949 = vmatprep.mubr.f32.mxu1 %v9016_v57 }
 0xfe1   :  { %7027 = vmatprep.subr.bf16.mxu1 %v9063_v14 }
 0xfe4   :  { %7029 = vmatpush1.bf16.msra.mxu1 %v9064_v43 }
 0xfe5   :  { %7070 = vmatprep.subr.bf16.mxu1 %v9082_v28 }
0x1040   :  { %v3490_v60 = vpop.permute.xlu1 %3489 }
0x1041   :  { %v8597_v2 = vadd.f32 %v3490_v60, %v3482_v54 }
0x1043   :  { %7458 = vtanh.f32 %v8597_v2 }
0x104d   :  { %v7459_v1 = vpop.eup %7458 }
0x104e   :  { %3495 = vrot.lane.b32.xlu0 %v7459_v1, %s7682_s11 }
0x1072   :  { %v3570_v45 = vpop.f32.mrb[30].mxu1 }
0x1073   :  { %v6125_v5 = vpop.f32.mrb[31].mxu1 }
0x1092   :  { %v3640_v40 = vpop.f32.mrb[32].mxu1 }
0x1093   :  { %v3641_v52 = vadd.f32 %v3640_v40, %v3570_v45  ;;  %v6160_v16 = vpop.f32.mrb[33].mxu1  ;;  %v9084_v40 = vld [vmem:[#allocation21_spill] sm:$0xff] }
0x1094   :  { %v9086_v16 = vld [vmem:[#allocation22_spill] sm:$0xff] }
0x1095   :  { %v3644_v58 = vadd.f32 %v8604_v8, %v3641_v52  ;;  %v9085_v52 = vld [vmem:[#allocation36_spill] sm:$0xff] }
0x1097   :  { %7460 = vtanh.f32 %v3644_v58  ;;  %v3645_v50 = vmul.f32 0.5, %v3644_v58  ;;  %v9087_v58 = vld [vmem:[#allocation23_spill] sm:$0xff] }
0x1099   :  { %7462 = vtanh.f32 %v3645_v50  ;;  %v9091_v50 = vld [vmem:[#allocation26_spill] sm:$0xff] }
0x10a1   :  { %v7461_v26 = vpop.eup %7460 }
0x10a2   :  { %3652 = vrot.lane.b32.xlu0 %v7461_v26, %s7682_s11  ;;  %v9088_v26 = vld [vmem:[#allocation37_spill] sm:$0xff] }
0x10a3   :  { %v7463_v12 = vpop.eup %7462 }
0x10a4   :  { %v3647_v54 = vmul.f32 0.5, %v7463_v12  ;;  %v9092_v12 = vld [vmem:[#allocation27_spill] sm:$0xff] }
0x10a6   :  { %v3648_v60 = vadd.f32 0.5, %v3647_v54  ;;  %v9093_v54 = vld [vmem:[#allocation28_spill] sm:$0xff] }
0x10c0   :  { %v3496_v21 = vpop.permute.xlu0 %3495 }
0x10c1   :  { %v3498_v22 = vmul.f32 %v3496_v21, %v3480_v32  ;;  %v3979_v32 = vld [vmem:[#allocation3 + $0x30] sm:$0xff] }
0x10c2   :  { %v9089_v21 = vld [vmem:[#allocation24_spill] sm:$0xff] }
0x10c3   :  { %3810 = vrot.lane.b32.xlu1 %v3498_v22, %s7675_s30  ;;  %v9090_v22 = vld [vmem:[#allocation25_spill] sm:$0xff] }
0x1114   :  { %v3653_v1 = vpop.permute.xlu0 %3652 }
0x1115   :  { %v3655_v45 = vmul.f32 %v3653_v1, %v3648_v60  ;;  %v9094_v1 = vld [vmem:[#allocation29_spill] sm:$0xff] }
0x1117   :  { %3657 = vrot.lane.b32.xlu1 %v3655_v45, %s7675_s30  ;;  %v9095_v45 = vld [vmem:[#allocation30_spill] sm:$0xff] }
0x1135   :  { %v3811_v5 = vpop.permute.xlu1 %3810 }
0x1136   :  { %5563 = vmatmul.mubr.msk.f32.vlgmr.msra.gmra.mrb[30].mxu0 %vm130_vm2, %v3811_v5  ;;  %5564 = vmatmul.mubr.msk.f32.vlgmr.msra.gmra.mrb[34].mxu1 %vm130_vm2, %v3811_v5 }
0x1137   :  { %7032 = vmatpush3.bf16.msra.mxu0 %v7850_v6  ;;  %6169 = vmatprep.mubr.msk.f32.mxu0 %vm7680_vm0, %v9016_v57 }
0x1138   :  { %7033 = vmatprep.subr.bf16.mxu0 %v9017_v35  ;;  %7072 = vmatpush1.bf16.msra.mxu1 %v7887_v37 }
0x1139   :  { %7074 = vmatprep.subr.bf16.mxu1 %v7896_v46  ;;  %4378 = vmatprep.mubr.f32.mxu1 %v9016_v57 }
0x113b   :  { %7035 = vmatpush3.bf16.msra.mxu0 %v7861_v11 }
0x113c   :  { %7036 = vmatprep.subr.bf16.mxu0 %v9017_v35  ;;  %7076 = vmatpush1.bf16.msra.mxu1 %v7898_v47 }
0x113d   :  { %7078 = vmatprep.subr.bf16.mxu1 %v7906_v56 }
0x113e   :  { %6170 = vmatmul.mubr.msk.f32.vlgmr.msra.gmra.mrb[32].mxu0 %vm130_vm2, %v3811_v5  ;;  %v9096_v5 = vld [vmem:[#allocation31_spill] sm:$0xff] }
0x113f   :  { %7038 = vmatpush3.bf16.msra.mxu0 %v7858_v10  ;;  %6176 = vmatprep.mubr.msk.f32.mxu0 %vm7680_vm0, %v9016_v57 }
0x1140   :  { %7080 = vmatpush1.bf16.msra.mxu1 %v7910_v63  ;;  %7039 = vmatprep.subr.bf16.mxu0 %v9017_v35 }
0x1141   :  { %7082 = vmatprep.subr.bf16.mxu1 %v9084_v40 }
0x1142   :  { %6177 = vmatmul.mubr.msk.f32.vlgmr.msra.gmra.mrb[34].mxu0 %vm204_vm1, %v3979_v32  ;;  %v9097_v32 = vld [vmem:[#allocation43_spill] sm:$0xff] }
0x1143   :  { %7041 = vmatpush3.bf16.msra.mxu0 %v9085_v52  ;;  %6187 = vmatprep.mubr.msk.f32.mxu0 %vm7680_vm0, %v9016_v57 }
0x1144   :  { %7084 = vmatpush1.bf16.msra.mxu1 %v9086_v16  ;;  %7042 = vmatprep.subr.bf16.mxu0 %v9017_v35  ;;  %v9099_v16 = vld [vmem:[#allocation46_spill] sm:$0xff] }
0x1145   :  { %7086 = vmatprep.subr.bf16.mxu1 %v9087_v58 }
0x1147   :  { %7044 = vmatpush3.bf16.msra.mxu0 %v9088_v26  ;;  %v3650_v26 = vmul.f32 %v3648_v60, %v9097_v32 }
0x1148   :  { %7088 = vmatpush1.bf16.msra.mxu1 %v9089_v21  ;;  %7045 = vmatprep.subr.bf16.mxu0 %v9017_v35 }
0x1149   :  { %7090 = vmatprep.subr.bf16.mxu1 %v9090_v22 }
0x114c   :  { %7092 = vmatpush1.bf16.msra.mxu1 %v9091_v50 }
0x114d   :  { %7094 = vmatprep.subr.bf16.mxu1 %v9092_v12 }
0x1150   :  { %7096 = vmatpush1.bf16.msra.mxu1 %v9093_v54 }
0x1151   :  { %7098 = vmatprep.subr.bf16.mxu1 %v9094_v1 }
0x1154   :  { %7100 = vmatpush1.bf16.msra.mxu1 %v9095_v45 }
0x1155   :  { %7134 = vmatprep.subr.bf16.mxu1 %v9096_v5 }
0x1189   :  { %v3658_v58 = vpop.permute.xlu1 %3657 }
0x118a   :  { %v8648_v21 = vadd.f32 %v3658_v58, %v3650_v26 }
0x118c   :  { %9098 = vst [vmem:[#allocation44_spill] sm:$0xff] %v8648_v21  ;;  %7464 = vtanh.f32 %v8648_v21 }
0x1196   :  { %v7465_v22 = vpop.eup %7464 }
0x1197   :  { %3663 = vrot.lane.b32.xlu0 %v7465_v22, %s7682_s11 }
0x1209   :  { %v3880_v50 = vpop.f32.mrb[30].mxu0  ;;  %v3664_v12 = vpop.permute.xlu0 %3663 }
0x120a   :  { %v3956_v54 = vadd.f32 %v3880_v50, %v9099_v16  ;;  %v3666_v52 = vmul.f32 %v3664_v12, %v3648_v60  ;;  %v3951_v1 = vpop.f32.mrb[34].mxu1  ;;  %v3882_v40 = vpop.f32.mrb[31].mxu0 }
0x120b   :  { %v3957_v45 = vadd.f32 %v3882_v40, %v8104_v34  ;;  %v3953_v5 = vpop.f32.mrb[35].mxu1  ;;  %v3958_v26 = vadd.f32 %v3951_v1, %v8107_v53 }
0x120c   :  { %v3960_v63 = vmul.f32 0.5, %v3956_v54  ;;  %4147 = vrot.lane.b32.xlu1 %v3666_v52, %s7675_s30  ;;  %v3959_v22 = vadd.f32 %v3953_v5, %v9023_v29 }
0x120d   :  { %v3964_v58 = vmul.f32 0.5, %v3957_v45 }
0x120e   :  { %7466 = vtanh.f32 %v3960_v63  ;;  %v3969_v50 = vmul.f32 0.5, %v3959_v22 }
0x120f   :  { %7468 = vtanh.f32 %v3964_v58 }
0x1210   :  { %7470 = vtanh.f32 %v3958_v26 }
0x1211   :  { %v4046_v32 = vpop.f32.mrb[32].mxu0  ;;  %7472 = vtanh.f32 %v3969_v50 }
0x1212   :  { %v6171_v21 = vpop.f32.mrb[33].mxu0 }
0x1215   :  { %v4119_v60 = vpop.f32.mrb[34].mxu0 }
0x1216   :  { %v4120_v12 = vadd.f32 %v4119_v60, %v4046_v32  ;;  %v6178_v16 = vpop.f32.mrb[35].mxu0 }
0x1218   :  { %v7467_v10 = vpop.eup %7466  ;;  %v4123_v40 = vadd.f32 %v9061_v61, %v4120_v12 }
0x1219   :  { %v7469_v54 = vpop.eup %7468  ;;  %v3962_v34 = vmul.f32 0.5, %v7467_v10 }
0x121a   :  { %v3966_v52 = vmul.f32 0.5, %v7469_v54  ;;  %7474 = vtanh.f32 %v4123_v40  ;;  %v7471_v1 = vpop.eup %7470 }
0x121b   :  { %v3963_v63 = vadd.f32 0.5, %v3962_v34  ;;  %v7473_v21 = vpop.eup %7472 }
0x121c   :  { %v3967_v45 = vadd.f32 0.5, %v3966_v52  ;;  %v3971_v61 = vmul.f32 0.5, %v7473_v21 }
0x121d   :  { %v3974_v58 = vmul.f32 %v7471_v1, %v3963_v63 }
0x121e   :  { %v3973_v5 = vmul.f32 %v3967_v45, %v8545_v33  ;;  %v3972_v22 = vadd.f32 0.5, %v3971_v61  ;;  %v4124_v33 = vmul.f32 0.5, %v4123_v40 }
0x1220   :  { %v8659_v26 = vadd.f32 %v3974_v58, %v3973_v5 }
0x1222   :  { %7476 = vtanh.f32 %v8659_v26 }
0x1223   :  { %7478 = vtanh.f32 %v4124_v33 }
0x1224   :  { %v7475_v16 = vpop.eup %7474 }
0x1225   :  { %4131 = vrot.lane.b32.xlu0 %v7475_v16, %s7682_s11 }
0x122c   :  { %v7477_v10 = vpop.eup %7476 }
0x122d   :  { %v3977_v32 = vmul.f32 %v7477_v10, %v3972_v22  ;;  %v7479_v50 = vpop.eup %7478 }
0x122e   :  { %v4126_v60 = vmul.f32 0.5, %v7479_v50 }
0x122f   :  { %4379 = vmatmul.mubr.f32.vlgmr.msra.gmra.mrb[36].mxu1 %v3977_v32 }
0x1230   :  { %7136 = vmatpush1.bf16.msra.mxu1 %v7985_v3  ;;  %4525 = vmatprep.mubr.f32.mxu1 %v9016_v57  ;;  %v4127_v12 = vadd.f32 0.5, %v4126_v60 }
0x1231   :  { %7138 = vmatprep.subr.bf16.mxu1 %v7991_v9 }
0x1232   :  { %v4129_v52 = vmul.f32 %v4127_v12, %v8597_v2 }
0x1234   :  { %7140 = vmatpush1.bf16.msra.mxu1 %v7999_v23 }
0x1235   :  { %7149 = vmatprep.subr.bf16.mxu1 %v9017_v35 }
0x127e   :  { %v4148_v34 = vpop.permute.xlu1 %4147 }
0x127f   :  { %6188 = vmatmul.mubr.msk.f32.vlgmr.msra.gmra.mrb[36].mxu0 %vm130_vm2, %v4148_v34 }
0x1280   :  { %7047 = vmatpush3.bf16.msra.mxu0 %v9024_v20  ;;  %6222 = vmatprep.mubr.msk.f32.mxu0 %vm7680_vm0, %v9016_v57 }
0x1281   :  { %7048 = vmatprep.subr.bf16.mxu0 %v9017_v35 }
0x1284   :  { %7050 = vmatpush3.bf16.msra.mxu0 %v9025_v62 }
0x1285   :  { %7051 = vmatprep.subr.bf16.mxu0 %v9017_v35 }
0x1288   :  { %7053 = vmatpush3.bf16.msra.mxu0 %v9026_v30 }
0x1289   :  { %7054 = vmatprep.subr.bf16.mxu0 %v9017_v35 }
0x128c   :  { %7056 = vmatpush3.bf16.msra.mxu0 %v9027_v44 }
0x128d   :  { %7057 = vmatprep.subr.bf16.mxu0 %v9017_v35 }
0x1290   :  { %7059 = vmatpush3.bf16.msra.mxu0 %v9028_v19 }
0x1291   :  { %7060 = vmatprep.subr.bf16.mxu0 %v9017_v35 }
0x1294   :  { %7062 = vmatpush3.bf16.msra.mxu0 %v9029_v17 }
0x1295   :  { %7063 = vmatprep.subr.bf16.mxu0 %v9017_v35 }
0x1297   :  { %v4132_v40 = vpop.permute.xlu0 %4131 }
0x1298   :  { %v4134_v54 = vmul.f32 %v4132_v40, %v4127_v12  ;;  %7065 = vmatpush3.bf16.msra.mxu0 %v9030_v48 }
0x1299   :  { %7066 = vmatprep.subr.bf16.mxu0 %v9017_v35 }
0x129a   :  { %4136 = vrot.lane.b32.xlu1 %v4134_v54, %s7675_s30 }
0x129c   :  { %7068 = vmatpush3.bf16.msra.mxu0 %v9031_v36 }
0x129d   :  { %7102 = vmatprep.subr.bf16.mxu0 %v9032_v24 }
0x129f   :  { %6223 = vmatmul.mubr.f32.vlgmr.msra.gmra.mrb[38].mxu0 %v3977_v32 }
0x12a0   :  { %7104 = vmatpush1.bf16.msra.mxu0 %v7892_v42  ;;  %4449 = vmatprep.mubr.f32.mxu0 %v9016_v57 }
0x12a1   :  { %7106 = vmatprep.subr.bf16.mxu0 %v7901_v51 }
0x12a4   :  { %7108 = vmatpush1.bf16.msra.mxu0 %v7904_v55 }
0x12a5   :  { %7110 = vmatprep.subr.bf16.mxu0 %v7912_v0 }
0x12a8   :  { %7112 = vmatpush1.bf16.msra.mxu0 %v7916_v7 }
0x12a9   :  { %7114 = vmatprep.subr.bf16.mxu0 %v7921_v15 }
0x12ac   :  { %7116 = vmatpush1.bf16.msra.mxu0 %v7929_v25 }
0x12ad   :  { %7118 = vmatprep.subr.bf16.mxu0 %v7934_v31 }
0x12b0   :  { %7120 = vmatpush1.bf16.msra.mxu0 %v7941_v41 }
0x12b1   :  { %7122 = vmatprep.subr.bf16.mxu0 %v7946_v49 }
0x12b4   :  { %7124 = vmatpush1.bf16.msra.mxu0 %v7953_v59 }
0x12b5   :  { %7126 = vmatprep.subr.bf16.mxu0 %v7958_v4 }
0x12b8   :  { %7128 = vmatpush1.bf16.msra.mxu0 %v7965_v18 }
0x12b9   :  { %7130 = vmatprep.subr.bf16.mxu0 %v7970_v27 }
0x12bc   :  { %7132 = vmatpush1.bf16.msra.mxu0 %v7977_v39 }
0x12bd   :  { %7142 = vmatprep.subr.bf16.mxu0 %v9044_v13 }
0x12bf   :  { %4450 = vmatmul.mubr.f32.vlgmr.msra.gmra.mrb[40].mxu0 %v3977_v32 }
0x12c0   :  { %7144 = vmatpush1.bf16.msra.mxu0 %v9062_v38  ;;  %4596 = vmatprep.mubr.f32.mxu0 %v9016_v57 }
0x12c1   :  { %7146 = vmatprep.subr.bf16.mxu0 %v9063_v14 }
0x12c4   :  { %7148 = vmatpush1.bf16.msra.mxu0 %v9064_v43 }
0x12c5   :  { %7189 = vmatprep.subr.bf16.mxu0 %v9082_v28 }
0x130c   :  { %v4137_v63 = vpop.permute.xlu1 %4136 }
0x130d   :  { %v8711_v1 = vadd.f32 %v4137_v63, %v4129_v52  ;;  %v9106_v52 = vld [vmem:[#allocation37_spill] sm:$0xff]  ;;  %v9107_v63 = vld [vmem:[#allocation24_spill] sm:$0xff] }
0x130f   :  { %7480 = vtanh.f32 %v8711_v1 }
0x1319   :  { %v7481_v45 = vpop.eup %7480 }
0x131a   :  { %4142 = vrot.lane.b32.xlu0 %v7481_v45, %s7682_s11  ;;  %v9108_v45 = vld [vmem:[#allocation25_spill] sm:$0xff] }
0x1352   :  { %v4217_v58 = vpop.f32.mrb[36].mxu0 }
0x1353   :  { %v6189_v5 = vpop.f32.mrb[37].mxu0 }
0x1354   :  { %v9110_v5 = vld [vmem:[#allocation27_spill] sm:$0xff] }
0x1372   :  { %v4287_v21 = vpop.f32.mrb[38].mxu0 }
0x1373   :  { %v4288_v16 = vadd.f32 %v4287_v21, %v4217_v58  ;;  %v6224_v61 = vpop.f32.mrb[39].mxu0  ;;  %v9109_v58 = vld [vmem:[#allocation26_spill] sm:$0xff]  ;;  %v9111_v21 = vld [vmem:[#allocation28_spill] sm:$0xff] }
0x1374   :  { %v9113_v61 = vld [vmem:[#allocation30_spill] sm:$0xff] }
0x1375   :  { %v4291_v22 = vadd.f32 %v8604_v8, %v4288_v16  ;;  %v9112_v16 = vld [vmem:[#allocation29_spill] sm:$0xff] }
0x1377   :  { %7482 = vtanh.f32 %v4291_v22  ;;  %v4292_v32 = vmul.f32 0.5, %v4291_v22  ;;  %v9114_v22 = vld [vmem:[#allocation31_spill] sm:$0xff] }
0x1379   :  { %7484 = vtanh.f32 %v4292_v32 }
0x1381   :  { %v7483_v10 = vpop.eup %7482 }
0x1382   :  { %4299 = vrot.lane.b32.xlu0 %v7483_v10, %s7682_s11  ;;  %v9115_v10 = vld [vmem:[#allocation44_spill] sm:$0xff] }
0x1383   :  { %v7485_v34 = vpop.eup %7484 }
0x1384   :  { %v4294_v33 = vmul.f32 0.5, %v7485_v34 }
0x1386   :  { %v8718_v50 = vadd.f32 0.5, %v4294_v33 }
0x138c   :  { %v4143_v28 = vpop.permute.xlu0 %4142 }
0x138d   :  { %v4145_v2 = vmul.f32 %v4143_v28, %v4127_v12  ;;  %v9101_v12 = vld [vmem:[#allocation20_spill] sm:$0xff]  ;;  %v4297_v28 = vmul.f32 %v8718_v50, %v9115_v10 }
0x138f   :  { %4457 = vrot.lane.b32.xlu1 %v4145_v2, %s7675_s30 }
0x13f4   :  { %v4300_v60 = vpop.permute.xlu0 %4299 }
0x13f5   :  { %v4302_v40 = vmul.f32 %v4300_v60, %v8718_v50 }
0x13f7   :  { %4304 = vrot.lane.b32.xlu1 %v4302_v40, %s7675_s30  ;;  %v9116_v40 = vld [vmem:[#allocation46_spill] sm:$0xff] }
0x1401   :  { %v4458_v54 = vpop.permute.xlu1 %4457 }
0x1402   :  { %5568 = vmatmul.mubr.msk.f32.vlgmr.msra.gmra.mrb[36].mxu1 %vm130_vm2, %v4458_v54  ;;  %5569 = vmatmul.mubr.msk.f32.vlgmr.msra.gmra.mrb[40].mxu0 %vm130_vm2, %v4458_v54 }
0x1403   :  { %7151 = vmatpush3.bf16.msra.mxu1 %v7850_v6  ;;  %6233 = vmatprep.mubr.msk.f32.mxu1 %vm7680_vm0, %v9016_v57  ;;  %v9100_v6 = vld [vmem:[#allocation17_spill] sm:$0xff] }
0x1404   :  { %7152 = vmatprep.subr.bf16.mxu1 %v9017_v35  ;;  %7191 = vmatpush1.bf16.msra.mxu0 %v7887_v37  ;;  %v4626_v37 = vld [vmem:[#allocation3 + $0x38] sm:$0xff] }
0x1405   :  { %7193 = vmatprep.subr.bf16.mxu0 %v7896_v46  ;;  %5025 = vmatprep.mubr.f32.mxu0 %v9016_v57  ;;  %v9102_v46 = vld [vmem:[#allocation21_spill] sm:$0xff] }
0x1407   :  { %7154 = vmatpush3.bf16.msra.mxu1 %v7861_v11  ;;  %v9103_v11 = vld [vmem:[#allocation36_spill] sm:$0xff] }
0x1408   :  { %7155 = vmatprep.subr.bf16.mxu1 %v9017_v35  ;;  %7195 = vmatpush1.bf16.msra.mxu0 %v7898_v47  ;;  %v9104_v47 = vld [vmem:[#allocation22_spill] sm:$0xff] }
0x1409   :  { %7197 = vmatprep.subr.bf16.mxu0 %v7906_v56  ;;  %v9105_v56 = vld [vmem:[#allocation23_spill] sm:$0xff] }
0x140a   :  { %6234 = vmatmul.mubr.msk.f32.vlgmr.msra.gmra.mrb[38].mxu1 %vm130_vm2, %v4458_v54 }
0x140b   :  { %7157 = vmatpush3.bf16.msra.mxu1 %v9100_v6  ;;  %6240 = vmatprep.mubr.msk.f32.mxu1 %vm7680_vm0, %v9016_v57 }
0x140c   :  { %7199 = vmatpush1.bf16.msra.mxu0 %v9101_v12  ;;  %7158 = vmatprep.subr.bf16.mxu1 %v9017_v35  ;;  %v9117_v12 = vld [vmem:[#allocation47_spill] sm:$0xff] }
0x140d   :  { %7201 = vmatprep.subr.bf16.mxu0 %v9102_v46 }
0x140e   :  { %6241 = vmatmul.mubr.msk.f32.vlgmr.msra.gmra.mrb[40].mxu1 %vm204_vm1, %v4626_v37 }
0x140f   :  { %7160 = vmatpush3.bf16.msra.mxu1 %v9103_v11  ;;  %6251 = vmatprep.mubr.msk.f32.mxu1 %vm7680_vm0, %v9016_v57 }
0x1410   :  { %7203 = vmatpush1.bf16.msra.mxu0 %v9104_v47  ;;  %7161 = vmatprep.subr.bf16.mxu1 %v9017_v35 }
0x1411   :  { %7205 = vmatprep.subr.bf16.mxu0 %v9105_v56 }
0x1413   :  { %7163 = vmatpush3.bf16.msra.mxu1 %v9106_v52 }
0x1414   :  { %7207 = vmatpush1.bf16.msra.mxu0 %v9107_v63  ;;  %7164 = vmatprep.subr.bf16.mxu1 %v9017_v35 }
0x1415   :  { %7209 = vmatprep.subr.bf16.mxu0 %v9108_v45 }
0x1418   :  { %7211 = vmatpush1.bf16.msra.mxu0 %v9109_v58 }
0x1419   :  { %7213 = vmatprep.subr.bf16.mxu0 %v9110_v5 }
0x141c   :  { %7215 = vmatpush1.bf16.msra.mxu0 %v9111_v21 }
0x141d   :  { %7217 = vmatprep.subr.bf16.mxu0 %v9112_v16 }
0x1420   :  { %7219 = vmatpush1.bf16.msra.mxu0 %v9113_v61 }
0x1421   :  { %7253 = vmatprep.subr.bf16.mxu0 %v9114_v22 }
0x1469   :  { %v4305_v2 = vpop.permute.xlu1 %4304 }
0x146a   :  { %v8761_v32 = vadd.f32 %v4305_v2, %v4297_v28  ;;  %v7528_v28 = vld [vmem:[%s8897_s3] ss:$0 sm:$0xff] }
0x146c   :  { %7486 = vtanh.f32 %v8761_v32 }
0x1476   :  { %v7487_v34 = vpop.eup %7486 }
0x1477   :  { %4310 = vrot.lane.b32.xlu0 %v7487_v34, %s7682_s11 }
0x14d5   :  { %v4527_v33 = vpop.f32.mrb[36].mxu1  ;;  %v4598_v60 = vpop.f32.mrb[40].mxu0 }
0x14d6   :  { %v4603_v54 = vadd.f32 %v4527_v33, %v9116_v40  ;;  %v4529_v6 = vpop.f32.mrb[37].mxu1  ;;  %v4600_v37 = vpop.f32.mrb[41].mxu0  ;;  %v4605_v63 = vadd.f32 %v4598_v60, %v8107_v53 }
0x14d7   :  { %v4604_v46 = vadd.f32 %v4529_v6, %v9117_v12  ;;  %v4606_v45 = vadd.f32 %v4600_v37, %v9023_v29 }
0x14d8   :  { %v4607_v47 = vmul.f32 0.5, %v4603_v54 }
0x14d9   :  { %v4611_v56 = vmul.f32 0.5, %v4604_v46  ;;  %v4616_v21 = vmul.f32 0.5, %v4606_v45 }
0x14da   :  { %7488 = vtanh.f32 %v4607_v47 }
0x14db   :  { %7490 = vtanh.f32 %v4611_v56 }
0x14dc   :  { %7492 = vtanh.f32 %v4605_v63 }
0x14dd   :  { %v4693_v58 = vpop.f32.mrb[38].mxu1  ;;  %7494 = vtanh.f32 %v4616_v21 }
0x14de   :  { %v6235_v5 = vpop.f32.mrb[39].mxu1 }
0x14e1   :  { %v4766_v16 = vpop.f32.mrb[40].mxu1 }
0x14e2   :  { %v4767_v61 = vadd.f32 %v4766_v16, %v4693_v58  ;;  %v6242_v22 = vpop.f32.mrb[41].mxu1 }
0x14e4   :  { %v7489_v10 = vpop.eup %7488  ;;  %v4770_v2 = vadd.f32 %v7528_v28, %v4767_v61 }
0x14e5   :  { %v7491_v34 = vpop.eup %7490  ;;  %v4609_v33 = vmul.f32 0.5, %v7489_v10 }
0x14e6   :  { %v4613_v60 = vmul.f32 0.5, %v7491_v34  ;;  %7496 = vtanh.f32 %v4770_v2  ;;  %v7493_v6 = vpop.eup %7492 }
0x14e7   :  { %v4610_v54 = vadd.f32 0.5, %v4609_v33  ;;  %v7495_v58 = vpop.eup %7494 }
0x14e8   :  { %v4614_v37 = vadd.f32 0.5, %v4613_v60  ;;  %v4618_v21 = vmul.f32 0.5, %v7495_v58 }
0x14e9   :  { %v4621_v46 = vmul.f32 %v7493_v6, %v4610_v54  ;;  %v4311_v47 = vpop.permute.xlu0 %4310 }
0x14ea   :  { %v4620_v56 = vmul.f32 %v4614_v37, %v8659_v26  ;;  %v4313_v63 = vmul.f32 %v4311_v47, %v8718_v50  ;;  %v4619_v16 = vadd.f32 0.5, %v4618_v21  ;;  %v4771_v26 = vmul.f32 0.5, %v4770_v2 }
0x14ec   :  { %v8774_v45 = vadd.f32 %v4621_v46, %v4620_v56  ;;  %4794 = vrot.lane.b32.xlu1 %v4313_v63, %s7675_s30 }
0x14ee   :  { %7498 = vtanh.f32 %v8774_v45 }
0x14ef   :  { %7500 = vtanh.f32 %v4771_v26 }
0x14f0   :  { %v7497_v5 = vpop.eup %7496 }
0x14f1   :  { %4778 = vrot.lane.b32.xlu0 %v7497_v5, %s7682_s11 }
0x14f8   :  { %v7499_v61 = vpop.eup %7498 }
0x14f9   :  { %v4624_v22 = vmul.f32 %v7499_v61, %v4619_v16  ;;  %v7501_v50 = vpop.eup %7500 }
0x14fa   :  { %v4773_v28 = vmul.f32 0.5, %v7501_v50 }
0x14fb   :  { %5026 = vmatmul.mubr.f32.vlgmr.msra.gmra.mrb[42].mxu0 %v4624_v22 }
0x14fc   :  { %7255 = vmatpush1.bf16.msra.mxu0 %v7985_v3  ;;  %5172 = vmatprep.mubr.f32.mxu0 %v9016_v57  ;;  %v4774_v3 = vadd.f32 0.5, %v4773_v28 }
0x14fd   :  { %7257 = vmatprep.subr.bf16.mxu0 %v7991_v9 }
0x1500   :  { %7259 = vmatpush1.bf16.msra.mxu0 %v7999_v23 }
0x1501   :  { %7268 = vmatprep.subr.bf16.mxu0 %v9017_v35 }
0x155e   :  { %v4795_v10 = vpop.permute.xlu1 %4794 }
0x155f   :  { %6252 = vmatmul.mubr.msk.f32.vlgmr.msra.gmra.mrb[42].mxu1 %vm130_vm2, %v4795_v10 }
0x1560   :  { %7166 = vmatpush3.bf16.msra.mxu1 %v9024_v20  ;;  %6286 = vmatprep.mubr.msk.f32.mxu1 %vm7680_vm0, %v9016_v57 }
0x1561   :  { %7167 = vmatprep.subr.bf16.mxu1 %v9017_v35 }
0x1563   :  { %v4779_v9 = vpop.permute.xlu0 %4778 }
0x1564   :  { %v4781_v34 = vmul.f32 %v4779_v9, %v4774_v3  ;;  %7169 = vmatpush3.bf16.msra.mxu1 %v9025_v62 }
0x1565   :  { %7170 = vmatprep.subr.bf16.mxu1 %v9017_v35 }
0x1566   :  { %4783 = vrot.lane.b32.xlu1 %v4781_v34, %s7675_s30 }
0x1568   :  { %7172 = vmatpush3.bf16.msra.mxu1 %v9026_v30 }
0x1569   :  { %7173 = vmatprep.subr.bf16.mxu1 %v9017_v35 }
0x156c   :  { %7175 = vmatpush3.bf16.msra.mxu1 %v9027_v44 }
0x156d   :  { %7176 = vmatprep.subr.bf16.mxu1 %v9017_v35 }
0x1570   :  { %7178 = vmatpush3.bf16.msra.mxu1 %v9028_v19 }
0x1571   :  { %7179 = vmatprep.subr.bf16.mxu1 %v9017_v35 }
0x1574   :  { %7181 = vmatpush3.bf16.msra.mxu1 %v9029_v17 }
0x1575   :  { %7182 = vmatprep.subr.bf16.mxu1 %v9017_v35 }
0x1578   :  { %7184 = vmatpush3.bf16.msra.mxu1 %v9030_v48 }
0x1579   :  { %7185 = vmatprep.subr.bf16.mxu1 %v9017_v35 }
0x157c   :  { %7187 = vmatpush3.bf16.msra.mxu1 %v9031_v36 }
0x157d   :  { %7221 = vmatprep.subr.bf16.mxu1 %v9032_v24 }
0x157f   :  { %6287 = vmatmul.mubr.f32.vlgmr.msra.gmra.mrb[44].mxu1 %v4624_v22 }
0x1580   :  { %7223 = vmatpush1.bf16.msra.mxu1 %v7892_v42  ;;  %5096 = vmatprep.mubr.f32.mxu1 %v9016_v57  ;;  %v4776_v42 = vmul.f32 %v4774_v3, %v8711_v1 }
0x1581   :  { %7225 = vmatprep.subr.bf16.mxu1 %v7901_v51 }
0x1584   :  { %7227 = vmatpush1.bf16.msra.mxu1 %v7904_v55 }
0x1585   :  { %7229 = vmatprep.subr.bf16.mxu1 %v7912_v0 }
0x1588   :  { %7231 = vmatpush1.bf16.msra.mxu1 %v7916_v7 }
0x1589   :  { %7233 = vmatprep.subr.bf16.mxu1 %v7921_v15 }
0x158c   :  { %7235 = vmatpush1.bf16.msra.mxu1 %v7929_v25 }
0x158d   :  { %7237 = vmatprep.subr.bf16.mxu1 %v7934_v31 }
0x1590   :  { %7239 = vmatpush1.bf16.msra.mxu1 %v7941_v41 }
0x1591   :  { %7241 = vmatprep.subr.bf16.mxu1 %v7946_v49 }
0x1594   :  { %7243 = vmatpush1.bf16.msra.mxu1 %v7953_v59 }
0x1595   :  { %7245 = vmatprep.subr.bf16.mxu1 %v7958_v4 }
0x1598   :  { %7247 = vmatpush1.bf16.msra.mxu1 %v7965_v18 }
0x1599   :  { %7249 = vmatprep.subr.bf16.mxu1 %v7970_v27 }
0x159c   :  { %7251 = vmatpush1.bf16.msra.mxu1 %v7977_v39 }
0x159d   :  { %7261 = vmatprep.subr.bf16.mxu1 %v9044_v13 }
0x159f   :  { %5097 = vmatmul.mubr.f32.vlgmr.msra.gmra.mrb[46].mxu1 %v4624_v22 }
0x15a0   :  { %7263 = vmatpush1.bf16.msra.mxu1 %v9062_v38  ;;  %5243 = vmatprep.mubr.f32.mxu1 %v9016_v57 }
0x15a1   :  { %7265 = vmatprep.subr.bf16.mxu1 %v9063_v14 }
0x15a4   :  { %7267 = vmatpush1.bf16.msra.mxu1 %v9064_v43 }
0x15a5   :  { %7298 = vmatprep.subr.bf16.mxu1 %v9017_v35 }
0x15d8   :  { %v4784_v51 = vpop.permute.xlu1 %4783 }
0x15d9   :  { %v4786_v55 = vadd.f32 %v4784_v51, %v4776_v42 }
0x15db   :  { %7502 = vtanh.f32 %v4786_v55 }
0x15e5   :  { %v7503_v0 = vpop.eup %7502 }
0x15e6   :  { %4789 = vrot.lane.b32.xlu0 %v7503_v0, %s7682_s11 }
0x1632   :  { %v4864_v7 = vpop.f32.mrb[42].mxu1 }
0x1633   :  { %v6253_v15 = vpop.f32.mrb[43].mxu1 }
0x1652   :  { %v4934_v25 = vpop.f32.mrb[44].mxu1 }
0x1653   :  { %v4935_v31 = vadd.f32 %v4934_v25, %v4864_v7  ;;  %v6288_v41 = vpop.f32.mrb[45].mxu1 }
0x1654   :  { %v5442_v41 = vld [vmem:[%s8904_s10 + $0x10] sm:$0xff] }
0x1655   :  { %v4938_v49 = vadd.f32 %v8604_v8, %v4935_v31  ;;  %v5441_v31 = vld [vmem:[%s8904_s10 + $0x8] sm:$0xff] }
0x1657   :  { %7504 = vtanh.f32 %v4938_v49  ;;  %v4939_v27 = vmul.f32 0.5, %v4938_v49 }
0x1658   :  { %v4790_v59 = vpop.permute.xlu0 %4789 }
0x1659   :  { %v4792_v4 = vmul.f32 %v4790_v59, %v4774_v3  ;;  %7506 = vtanh.f32 %v4939_v27  ;;  %v5443_v59 = vld [vmem:[%s8904_s10 + $0x18] sm:$0xff] }
0x165b   :  { %5104 = vrot.lane.b32.xlu1 %v4792_v4, %s7675_s30  ;;  %v7302_v4 = vpack.c.bf16 %v5443_v59, %v5442_v41 }
0x1661   :  { %v7505_v18 = vpop.eup %7504 }
0x1662   :  { %4946 = vrot.lane.b32.xlu0 %v7505_v18, %s7682_s11 }
0x1663   :  { %v7507_v39 = vpop.eup %7506 }
0x1664   :  { %v4941_v24 = vmul.f32 0.5, %v7507_v39 }
0x1666   :  { %v4942_v13 = vadd.f32 0.5, %v4941_v24  ;;  %v5576_v24 = vld [vmem:[#allocation2] ss:$0 sm:$0xff] }
0x1668   :  { %v4944_v43 = vmul.f32 %v4942_v13, %v8761_v32 }
0x16cd   :  { %v5105_v23 = vpop.permute.xlu1 %5104 }
0x16ce   :  { %5573 = vmatmul.mubr.msk.f32.vlgmr.msra.gmra.mrb[42].mxu0 %vm130_vm2, %v5105_v23  ;;  %5574 = vmatmul.mubr.msk.f32.vlgmr.msra.gmra.mrb[46].mxu1 %vm130_vm2, %v5105_v23 }
0x16cf   :  { %7270 = vmatpush3.bf16.msra.mxu0 %v9103_v11  ;;  %6297 = vmatprep.mubr.msk.f32.mxu0 %vm7680_vm0, %v9016_v57 }
0x16d0   :  { %7271 = vmatprep.subr.bf16.mxu0 %v9017_v35  ;;  %6343 = vmatprep.mubr.msk.f32.mxu1 %vm7680_vm0, %v9016_v57 }
0x16d3   :  { %7273 = vmatpush3.bf16.msra.mxu0 %v9106_v52 }
0x16d4   :  { %v4947_v38 = vpop.permute.xlu0 %4946  ;;  %7274 = vmatprep.subr.bf16.mxu0 %v9017_v35 }
0x16d5   :  { %v4949_v14 = vmul.f32 %v4947_v38, %v4942_v13 }
0x16d7   :  { %4951 = vrot.lane.b32.xlu1 %v4949_v14, %s7675_s30 }
0x1749   :  { %v4952_v1 = vpop.permute.xlu1 %4951 }
0x174a   :  { %v8843_v11 = vadd.f32 %v4952_v1, %v4944_v43 }
0x174c   :  { %7508 = vtanh.f32 %v8843_v11 }
0x1756   :  { %v7509_v2 = vpop.eup %7508 }
0x1757   :  { %4957 = vrot.lane.b32.xlu0 %v7509_v2, %s7682_s11 }
0x17a1   :  { %v5174_v33 = vpop.f32.mrb[42].mxu0  ;;  %v5245_v60 = vpop.f32.mrb[46].mxu1 }
0x17a2   :  { %v5250_v52 = vadd.f32 %v5174_v33, %v9116_v40  ;;  %v5176_v54 = vpop.f32.mrb[43].mxu0  ;;  %v5247_v6 = vpop.f32.mrb[47].mxu1  ;;  %v5252_v32 = vadd.f32 %v5245_v60, %v8107_v53 }
0x17a3   :  { %v5251_v37 = vadd.f32 %v5176_v54, %v9117_v12  ;;  %v5253_v56 = vadd.f32 %v5247_v6, %v9023_v29 }
0x17a4   :  { %v5254_v46 = vmul.f32 0.5, %v5250_v52 }
0x17a5   :  { %v5258_v47 = vmul.f32 0.5, %v5251_v37  ;;  %v5263_v63 = vmul.f32 0.5, %v5253_v56 }
0x17a6   :  { %7510 = vtanh.f32 %v5254_v46 }
0x17a7   :  { %7512 = vtanh.f32 %v5258_v47 }
0x17a8   :  { %7514 = vtanh.f32 %v5252_v32 }
0x17a9   :  { %7516 = vtanh.f32 %v5263_v63 }
0x17b0   :  { %v7511_v58 = vpop.eup %7510 }
0x17b1   :  { %v7513_v5 = vpop.eup %7512  ;;  %v5256_v21 = vmul.f32 0.5, %v7511_v58 }
0x17b2   :  { %v5260_v16 = vmul.f32 0.5, %v7513_v5  ;;  %v7515_v61 = vpop.eup %7514 }
0x17b3   :  { %v5257_v40 = vadd.f32 0.5, %v5256_v21  ;;  %v7517_v10 = vpop.eup %7516 }
0x17b4   :  { %v5261_v22 = vadd.f32 0.5, %v5260_v16  ;;  %v5265_v53 = vmul.f32 0.5, %v7517_v10 }
0x17b5   :  { %v5268_v26 = vmul.f32 %v7515_v61, %v5257_v40 }
0x17b6   :  { %v5267_v12 = vmul.f32 %v5261_v22, %v8774_v45  ;;  %v5266_v28 = vadd.f32 0.5, %v5265_v53 }
0x17b8   :  { %v5269_v50 = vadd.f32 %v5268_v26, %v5267_v12 }
0x17ba   :  { %7518 = vtanh.f32 %v5269_v50 }
0x17c4   :  { %v7519_v3 = vpop.eup %7518 }
0x17c5   :  { %v5271_v9 = vmul.f32 %v7519_v3, %v5266_v28 }
0x17c9   :  { %v4958_v29 = vpop.permute.xlu0 %4957 }
0x17ca   :  { %v4960_v34 = vmul.f32 %v4958_v29, %v4942_v13 }
0x17cc   :  { %5273 = vrot.lane.b32.xlu1 %v4960_v34, %s7675_s30 }
0x183e   :  { %v5274_v42 = vpop.permute.xlu1 %5273 }
0x183f   :  { %6298 = vmatmul.mubr.msk.f32.vlgmr.msra.gmra.mrb[44].mxu0 %vm130_vm2, %v5274_v42 }
0x1840   :  { %7276 = vmatpush3.bf16.msra.mxu0 %v9024_v20  ;;  %6332 = vmatprep.mubr.msk.f32.mxu0 %vm7680_vm0, %v9016_v57 }
0x1841   :  { %7277 = vmatprep.subr.bf16.mxu0 %v9017_v35 }
0x1844   :  { %7279 = vmatpush3.bf16.msra.mxu0 %v9025_v62 }
0x1845   :  { %7280 = vmatprep.subr.bf16.mxu0 %v9017_v35 }
0x1848   :  { %7282 = vmatpush3.bf16.msra.mxu0 %v9026_v30 }
0x1849   :  { %7283 = vmatprep.subr.bf16.mxu0 %v9017_v35 }
0x184c   :  { %7285 = vmatpush3.bf16.msra.mxu0 %v9027_v44 }
0x184d   :  { %7286 = vmatprep.subr.bf16.mxu0 %v9017_v35 }
0x1850   :  { %7288 = vmatpush3.bf16.msra.mxu0 %v9028_v19 }
0x1851   :  { %7289 = vmatprep.subr.bf16.mxu0 %v9017_v35 }
0x1854   :  { %7291 = vmatpush3.bf16.msra.mxu0 %v9029_v17 }
0x1855   :  { %7292 = vmatprep.subr.bf16.mxu0 %v9017_v35 }
0x1858   :  { %7294 = vmatpush3.bf16.msra.mxu0 %v9030_v48 }
0x1859   :  { %7295 = vmatprep.subr.bf16.mxu0 %v9017_v35 }
0x185c   :  { %7297 = vmatpush3.bf16.msra.mxu0 %v9031_v36 }
0x185f   :  { %6333 = vmatmul.mubr.f32.vlgmr.msra.gmra.mrb[46].mxu0 %v5271_v9 }
0x1912   :  { %v5343_v57 = vpop.f32.mrb[44].mxu0 }
0x1913   :  { %v6299_v20 = vpop.f32.mrb[45].mxu0 }
0x1932   :  { %v5413_v62 = vpop.f32.mrb[46].mxu0 }
0x1933   :  { %v5414_v30 = vadd.f32 %v5413_v62, %v5343_v57  ;;  %v6334_v44 = vpop.f32.mrb[47].mxu0 }
0x1935   :  { %v5417_v19 = vadd.f32 %v8604_v8, %v5414_v30  ;;  %v5440_v8 = vld [vmem:[%s8904_s10] sm:$0xff] }
0x1936   :  { %v7299_v49 = vpack.c.bf16 %v5441_v31, %v5440_v8 }
0x1937   :  { %7520 = vtanh.f32 %v5417_v19  ;;  %v5418_v17 = vmul.f32 0.5, %v5417_v19 }
0x1938   :  { %7300 = vmatpush3.bf16.msra.mxu1 %v7299_v49 }
0x1939   :  { %7522 = vtanh.f32 %v5418_v17  ;;  %7301 = vmatprep.subr.bf16.mxu1 %v9017_v35 }
0x193c   :  { %7303 = vmatpush3.bf16.msra.mxu1 %v7302_v4 }
0x1941   :  { %v7521_v45 = vpop.eup %7520 }
0x1942   :  { %5425 = vrot.lane.b32.xlu0 %v7521_v45, %s7682_s11 }
0x1943   :  { %v7523_v51 = vpop.eup %7522 }
0x1944   :  { %v5420_v48 = vmul.f32 0.5, %v7523_v51 }
0x1946   :  { %v5421_v55 = vadd.f32 0.5, %v5420_v48 }
0x1948   :  { %v5423_v36 = vmul.f32 %v5421_v55, %v8843_v11 }
0x19b4   :  { %v5426_v0 = vpop.permute.xlu0 %5425 }
0x19b5   :  { %v5428_v7 = vmul.f32 %v5426_v0, %v5421_v55 }
0x19b7   :  { %5430 = vrot.lane.b32.xlu1 %v5428_v7, %s7675_s30 }
0x1a29   :  { %v5431_v15 = vpop.permute.xlu1 %5430 }
0x1a2a   :  { %v5433_v25 = vadd.f32 %v5431_v15, %v5423_v36 }
0x1a2c   :  { %7524 = vtanh.f32 %v5433_v25 }
0x1a36   :  { %v7525_v18 = vpop.eup %7524 }
0x1a37   :  { %5436 = vrot.lane.b32.xlu0 %v7525_v18, %s7682_s11 }
0x1aa9   :  { %v5437_v27 = vpop.permute.xlu0 %5436 }
0x1aaa   :  { %v5439_v39 = vmul.f32 %v5437_v27, %v5421_v55 }
0x1aac   :  { %5452 = vrot.lane.b32.xlu1 %v5439_v39, %s7675_s30 }
0x1b1e   :  { %v5453_v23 = vpop.permute.xlu1 %5452 }
0x1b1f   :  { %6344 = vmatmul.mubr.msk.f32.vlgmr.msra.gmra.mrb[48].mxu1 %vm130_vm2, %v5453_v23 }
0x1bf2   :  { %v5522_v13 = vpop.f32.mrb[48].mxu1 }
0x1bf3   :  { %v5523_v38 = vadd.f32 %v5576_v24, %v5522_v13  ;;  %v6345_v14 = vpop.f32.mrb[49].mxu1 }
0x1bf5   :  { %5527 = vst.msk [vmem:[%s8906_s12] sm:$0xff] %vm5526_vm3, %v5523_v38 }
0x1bf6   :  { %5532 = vsyncpa [#allocation4], 1 }
0x1bf7   :  { %5533 = vsyncpa [#allocation6], 1 }
0x1bf8   :  { %5534 = vsyncpa [#allocation9], 1 }
0x1bf9   :  { %5535 = vsyncpa [#allocation12], 1 }

</bundles_post_ra>
